<compile_context>
chip_gen: v7x
topology: tpu7x:2x2x1
jax: 0.10.0
libtpu: 0.0.40
codegen_flags: <defaults>
</compile_context>

<pallas_src>
import functools

import jax
import jax.numpy as jnp
from jax.experimental import pallas as pl
from jax.experimental.pallas import tpu as pltpu

PCONV_EPS = 1e-8
BN_EPS = 1e-5
LANE = 128


def _round_up(x, m):
    return (x + m - 1) // m * m


def _choose_tm(m_rows):
    """Row-tile size: large enough to amortize per-step overhead, small enough
    to keep >= 2 grid steps whenever possible (pipelining, v7x 2 TensorCores).
    Multiples of 16 keep bf16 sublane packing aligned."""
    for tm in (1024, 512, 256, 128, 64, 32, 16):
        if m_rows >= 2 * tm:
            return tm
    return 16


# ---------------------------------------------------------------------------
# Pallas kernel: fused partial-conv matmul + mask renorm + BN + activation
# ---------------------------------------------------------------------------
def _pconv_matmul_kernel(xm_ref, m_ref, w_ref, bias_ref, scale_ref, shift_ref,
                         out_ref, *, mask_numel, eps, has_bias, act,
                         leaky_slope):
    xm = xm_ref[...]                                   # (TM, Kp)     bf16
    m = m_ref[...].astype(jnp.float32)                 # (TM, kh*kw)  -> f32

    # Standard conv on the masked input: bf16 x bf16 -> f32 accumulate (MXU).
    raw = jnp.dot(xm, w_ref[...], preferred_element_type=jnp.float32)

    # Mask-update conv (ones kernel over kh*kw*Cin). Mask was channel-summed
    # in the wrapper, so only the lane (window) reduction remains here.
    msum = jnp.sum(m, axis=-1, keepdims=True)          # (TM, 1)
    updated_mask = jnp.clip(msum, 0.0, 1.0)
    # Divide -> approximate reciprocal on the EUP (separate VLIW slot).
    mask_ratio = mask_numel * pl.reciprocal(msum + eps, approx=True)
    mask_ratio = mask_ratio * updated_mask

    if has_bias:
        b = bias_ref[...]                              # (1, Cout)
        out = ((raw - b) * mask_ratio + b) * updated_mask
    else:
        out = raw * mask_ratio

    # Eval-mode BatchNorm folded to an affine transform.
    # TODO(synk): fold real running mean/var/gamma/beta for real checkpoints.
    out = out * scale_ref[...] + shift_ref[...]

    if act == "relu":
        out = jnp.maximum(out, 0.0)
    elif act == "leaky_relu":
        out = jnp.where(out >= 0.0, out, out * leaky_slope)

    out_ref[...] = out.astype(out_ref.dtype)


def _pconv_matmul(xm_p, m_p, w2d, bias, scale, shift, *, tm, mask_numel,
                  has_bias, act, leaky_slope=0.2):
    m_pad, k_pad = xm_p.shape
    kk = m_p.shape[1]
    cout = w2d.shape[1]
    grid = (m_pad // tm,)

    kernel = functools.partial(
        _pconv_matmul_kernel, mask_numel=float(mask_numel), eps=PCONV_EPS,
        has_bias=has_bias, act=act, leaky_slope=leaky_slope)

    return pl.pallas_call(
        kernel,
        out_shape=jax.ShapeDtypeStruct((m_pad, cout), jnp.float32),
        grid=grid,
        in_specs=[
            pl.BlockSpec((tm, k_pad), lambda i: (i, 0)),    # bf16 patches
            pl.BlockSpec((tm, kk), lambda i: (i, 0)),       # bf16 mask patches
            pl.BlockSpec((k_pad, cout), lambda i: (0, 0)),  # bf16 weights
            pl.BlockSpec((1, cout), lambda i: (0, 0)),      # bias
            pl.BlockSpec((1, cout), lambda i: (0, 0)),      # BN scale
            pl.BlockSpec((1, cout), lambda i: (0, 0)),      # BN shift
        ],
        out_specs=pl.BlockSpec((tm, cout), lambda i: (i, 0)),
        compiler_params=pltpu.CompilerParams(
            dimension_semantics=("parallel",),
            # Double-buffered bf16 (TM, Kp) tiles stay in the low-MB range at
            # these widths -- comfortably under v7x's 64 MiB physical VMEM.
            vmem_limit_bytes=32 * 1024 * 1024),
    )(xm_p, m_p, w2d, bias, scale, shift)


# ---------------------------------------------------------------------------
# Glue: patch extraction (im2col), layer wrapper, parameter construction
# ---------------------------------------------------------------------------
def _extract_patches(x, kh, kw, stride, pad):
    """x: (N, H, W, C) -> ((N*Ho*Wo, kh*kw*C), (N, Ho, Wo)); tap-major, C-minor.

    The producing elementwise ops (mask multiply, upsample, concat, bf16 cast)
    fuse into this pad/slice/stack pipeline, so only the patch matrix itself is
    materialized in HBM."""
    xp = jnp.pad(x, ((0, 0), (pad, pad), (pad, pad), (0, 0)))
    n, hp, wp, c = xp.shape
    ho = (hp - kh) // stride + 1
    wo = (wp - kw) // stride + 1
    taps = []
    for i in range(kh):
        for j in range(kw):
            taps.append(xp[:, i:i + stride * (ho - 1) + 1:stride,
                           j:j + stride * (wo - 1) + 1:stride, :])
    p = jnp.stack(taps, axis=3)                         # (N, Ho, Wo, kh*kw, C)
    return p.reshape(n * ho * wo, kh * kw * c), (n, ho, wo)


def _pconv_layer(xm, mask_csum, layer):
    """One MaskConvModule: partial conv + (BN) + (act).

    xm:        (N, H, W, Cin)  already-masked features (x * mask), f32.
    mask_csum: (N, H, W, 1)    mask summed over its Cin channels (integers).
    Returns (features (N, Ho, Wo, Cout) f32, updated 1-channel mask).
    """
    k, stride, pad = layer["k"], layer["stride"], layer["pad"]
    cin = xm.shape[-1]
    kdim = k * k * cin
    k_pad = layer["w2d"].shape[0]
    assert k_pad == _round_up(kdim, LANE), (k_pad, kdim)

    # bf16 patches of the masked input (dominant HBM bytes halved vs f32).
    xm_p, (n, ho, wo) = _extract_patches(
        xm.astype(jnp.bfloat16), k, k, stride, pad)
    # Channel-summed mask patches: (M, kh*kw), exact small integers.
    m_p, _ = _extract_patches(mask_csum, k, k, stride, pad)

    m_rows = n * ho * wo
    tm = _choose_tm(m_rows)
    m_pad_rows = _round_up(m_rows, tm)

    # Updated mask (clamp of the ones-kernel conv) is identical across output
    # channels -> carried as a single channel, no Cout-broadcast write.
    new_mask = jnp.clip(jnp.sum(m_p, axis=1), 0.0, 1.0).reshape(n, ho, wo, 1)

    # Zero-pad rows to a TM multiple and K to a lane multiple (exact).
    xm_p = jnp.pad(xm_p, ((0, m_pad_rows - m_rows), (0, k_pad - kdim)))
    m_p = jnp.pad(m_p.astype(jnp.bfloat16), ((0, m_pad_rows - m_rows), (0, 0)))

    out = _pconv_matmul(
        xm_p, m_p, layer["w2d"], layer["bias"], layer["scale"], layer["shift"],
        tm=tm, mask_numel=kdim, has_bias=layer["has_bias"], act=layer["act"])
    return out[:m_rows].reshape(n, ho, wo, layer["cout"]), new_mask


def _make_layer(key, cin, cout, k, stride, pad, has_bias, with_bn, act):
    kw_, kb_ = jax.random.split(key)
    w = jax.random.normal(kw_, (k, k, cin, cout), jnp.float32)
    w = w * (0.1 / (k * k * cin) ** 0.5)
    kdim = k * k * cin
    k_pad = _round_up(kdim, LANE)
    # (KH*KW*Cin, Cout), K zero-padded to a lane multiple, bf16 for the MXU.
    w2d = jnp.pad(w.reshape(kdim, cout), ((0, k_pad - kdim), (0, 0)))
    w2d = w2d.astype(jnp.bfloat16)
    bias = (jax.random.normal(kb_, (1, cout), jnp.float32) * 0.01
            if has_bias else jnp.zeros((1, cout), jnp.float32))
    if with_bn:
        # eval-mode BN with default init: gamma=1, beta=0, mean=0, var=1.
        scale = jnp.full((1, cout), 1.0 / (1.0 + BN_EPS) ** 0.5, jnp.float32)
    else:
        scale = jnp.ones((1, cout), jnp.float32)
    shift = jnp.zeros((1, cout), jnp.float32)
    return dict(w2d=w2d, bias=bias, scale=scale, shift=shift, k=k,
                stride=stride, pad=pad, cout=cout, has_bias=has_bias, act=act)


def build_pconv_encoder_decoder(key, in_channels=4):
    """Small 3-layer PConvEncoder + 3-layer PConvDecoder (same structure as the
    mmediting defaults, with reduced depth / channel widths)."""
    keys = jax.random.split(key, 6)
    c1, c2, c3 = 8, 16, 16
    encoder = [
        # enc1: k=7 s=2 p=3, no norm, ReLU, bias=True
        _make_layer(keys[0], in_channels, c1, 7, 2, 3, True, False, "relu"),
        # enc2: k=5 s=2 p=2, BN, ReLU, bias=False
        _make_layer(keys[1], c1, c2, 5, 2, 2, False, True, "relu"),
        # enc3: k=3 s=2 p=1, BN, ReLU, bias=False
        _make_layer(keys[2], c2, c3, 3, 2, 1, False, True, "relu"),
    ]
    decoder = [
        # dec3: (c3 + c2) -> c2, BN, LeakyReLU(0.2)
        _make_layer(keys[3], c3 + c2, c2, 3, 1, 1, False, True, "leaky_relu"),
        # dec2: (c2 + c1) -> c1, BN, LeakyReLU(0.2)
        _make_layer(keys[4], c2 + c1, c1, 3, 1, 1, False, True, "leaky_relu"),
        # dec1: (c1 + in) -> in, no norm, no act, bias=True
        _make_layer(keys[5], c1 + in_channels, in_channels, 3, 1, 1,
                    True, False, "none"),
    ]
    return dict(encoder=encoder, decoder=decoder)


def _upsample2x(t):
    return jnp.repeat(jnp.repeat(t, 2, axis=1), 2, axis=2)


def pconv_encoder_decoder_forward(params, x_nchw, mask_nchw):
    """Matches PConvEncoderDecoder.forward: returns (x, final_mask), NCHW."""
    x = jnp.transpose(x_nchw, (0, 2, 3, 1)).astype(jnp.float32)
    m_in = jnp.transpose(mask_nchw, (0, 2, 3, 1)).astype(jnp.float32)

    # ---- encoder: keep hidden feats / 1-channel masks for skip connections --
    feats = [x]        # h0, h1, ...
    masks = [m_in]     # h0 mask may be per-channel; later masks are 1-channel.
    h = x
    xm = x * m_in                                   # per-channel input mask
    mcs = jnp.sum(m_in, axis=-1, keepdims=True)     # channel-summed mask
    for layer in params["encoder"]:
        h, m1 = _pconv_layer(xm, mcs, layer)
        feats.append(h)
        masks.append(m1)
        xm = h * m1                                 # 1-ch mask broadcast (fused)
        mcs = m1 * h.shape[-1]

    # ---- decoder: nearest x2 upsample, skip concat, partial conv ----
    h_cur, m_cur = feats[-1], masks[-1]
    n_enc = len(params["encoder"])
    for d, layer in enumerate(params["decoder"]):
        h_skip = feats[n_enc - 1 - d]
        m_skip = masks[n_enc - 1 - d]
        # Mask-multiply at low resolution, then upsample: for nearest-neighbour
        # this equals upsample-then-multiply exactly; mask stays 1-channel.
        xm_up = _upsample2x(h_cur * m_cur)
        m_up = _upsample2x(m_cur)
        if m_skip.shape[-1] == 1:
            xm_skip = h_skip * m_skip
            mcs_skip = m_skip * h_skip.shape[-1]
        else:                                       # original (per-channel) mask
            xm_skip = h_skip * m_skip
            mcs_skip = jnp.sum(m_skip, axis=-1, keepdims=True)
        xm = jnp.concatenate([xm_up, xm_skip], axis=-1)
        mcs = m_up * h_cur.shape[-1] + mcs_skip
        h_cur, m_cur = _pconv_layer(xm, mcs, layer)

    out = jnp.transpose(h_cur, (0, 3, 1, 2))
    # All mask channels are identical after a ones-kernel mask conv: broadcast
    # the single carried channel only for the returned tensor.
    final_mask = jnp.transpose(jnp.broadcast_to(m_cur, h_cur.shape),
                               (0, 3, 1, 2))
    return out, final_mask


if __name__ == "__main__":
    key = jax.random.PRNGKey(0)
    k_param, k_x, k_m = jax.random.split(key, 3)

    N, C, H, W = 2, 4, 16, 16
    params = build_pconv_encoder_decoder(k_param, in_channels=C)

    x = jax.random.normal(k_x, (N, C, H, W), jnp.float32)
    # binary hole mask (same mask for all channels, like inpainting masks)
    hole = (jax.random.uniform(k_m, (N, 1, H, W)) > 0.25).astype(jnp.float32)
    mask_in = jnp.broadcast_to(hole, (N, C, H, W))

    fwd = jax.jit(functools.partial(pconv_encoder_decoder_forward, params))
    out, final_mask = fwd(x, mask_in)
    jax.block_until_ready((out, final_mask))

    assert out.shape == (N, C, H, W), out.shape
    assert final_mask.shape == (N, C, H, W), final_mask.shape
    assert bool(jnp.all(jnp.isfinite(out))), "non-finite output"
    print("KERNEL_OK")
</pallas_src>

<mosaic_0001>
module attributes {stable_mosaic.version = 11 : i64} {
  func.func @_pconv_matmul_kernel(%arg0: i32, %arg1: memref<64x256xbf16, #tpu.memory_space<vmem>>, %arg2: memref<64x49xbf16, #tpu.memory_space<vmem>>, %arg3: memref<256x8xbf16, #tpu.memory_space<vmem>>, %arg4: memref<1x8xf32, #tpu.memory_space<vmem>>, %arg5: memref<1x8xf32, #tpu.memory_space<vmem>>, %arg6: memref<1x8xf32, #tpu.memory_space<vmem>>, %arg7: memref<64x8xf32, #tpu.memory_space<vmem>>) attributes {dimension_semantics = [#tpu.dimension_semantics<parallel>], iteration_bounds = array<i64: 2>, scalar_prefetch = 0 : i64, scratch_operands = 0 : i64, tpu.core_type = #tpu.core_type<tc>, window_params = [{transform_indices = @transform_0, window_bounds = array<i64: 64, 256>}, {transform_indices = @transform_1, window_bounds = array<i64: 64, 49>}, {pipeline_mode = #tpu.pipeline_mode<synchronous>, transform_indices = @transform_2, window_bounds = array<i64: 256, 8>}, {pipeline_mode = #tpu.pipeline_mode<synchronous>, transform_indices = @transform_3, window_bounds = array<i64: 1, 8>}, {pipeline_mode = #tpu.pipeline_mode<synchronous>, transform_indices = @transform_4, window_bounds = array<i64: 1, 8>}, {pipeline_mode = #tpu.pipeline_mode<synchronous>, transform_indices = @transform_5, window_bounds = array<i64: 1, 8>}, {transform_indices = @transform_6, window_bounds = array<i64: 64, 8>}]} {
    %c0 = arith.constant 0 : index
    %c0_0 = arith.constant 0 : index
    %0 = vector.load %arg1[%c0, %c0_0] : memref<64x256xbf16, #tpu.memory_space<vmem>>, vector<64x256xbf16>
    %c0_1 = arith.constant 0 : index
    %c0_2 = arith.constant 0 : index
    %1 = vector.load %arg2[%c0_1, %c0_2] : memref<64x49xbf16, #tpu.memory_space<vmem>>, vector<64x49xbf16>
    %2 = arith.extf %1 : vector<64x49xbf16> to vector<64x49xf32>
    %c0_3 = arith.constant 0 : index
    %c0_4 = arith.constant 0 : index
    %3 = vector.load %arg3[%c0_3, %c0_4] : memref<256x8xbf16, #tpu.memory_space<vmem>>, vector<256x8xbf16>
    %cst = arith.constant dense<0.000000e+00> : vector<64x8xf32>
    %4 = tpu.matmul %0, %3, %cst {dimension_numbers = #tpu.dot_dimension_numbers<[1], [0], [0], [1], [0, 0, 1, 1], [], []>} : vector<64x256xbf16>, vector<256x8xbf16>, vector<64x8xf32> -> vector<64x8xf32>
    %cst_5 = arith.constant dense<0.000000e+00> : vector<64xf32>
    %5 = vector.multi_reduction <add>, %2, %cst_5 [1] : vector<64x49xf32> to vector<64xf32>
    %6 = vector.shape_cast %5 : vector<64xf32> to vector<64x1xf32>
    %cst_6 = arith.constant 0.000000e+00 : f32
    %cst_7 = arith.constant 1.000000e+00 : f32
    %7 = vector.broadcast %cst_6 : f32 to vector<64x1xf32>
    %8 = arith.maximumf %7, %6 : vector<64x1xf32>
    %9 = vector.broadcast %cst_7 : f32 to vector<64x1xf32>
    %10 = arith.minimumf %9, %8 : vector<64x1xf32>
    %cst_8 = arith.constant 9.99999993E-9 : f32
    %11 = vector.broadcast %cst_8 : f32 to vector<64x1xf32>
    %12 = arith.addf %6, %11 : vector<64x1xf32>
    %13 = tpu.reciprocal %12 {approx = true} : vector<64x1xf32> -> vector<64x1xf32>
    %cst_9 = arith.constant 1.960000e+02 : f32
    %14 = vector.broadcast %cst_9 : f32 to vector<64x1xf32>
    %15 = arith.mulf %14, %13 : vector<64x1xf32>
    %16 = arith.mulf %15, %10 : vector<64x1xf32>
    %c0_10 = arith.constant 0 : index
    %c0_11 = arith.constant 0 : index
    %17 = vector.load %arg4[%c0_10, %c0_11] : memref<1x8xf32, #tpu.memory_space<vmem>>, vector<1x8xf32>
    %18 = vector.broadcast %17 : vector<1x8xf32> to vector<64x8xf32>
    %19 = arith.subf %4, %18 : vector<64x8xf32>
    %20 = vector.broadcast %16 : vector<64x1xf32> to vector<64x8xf32>
    %21 = arith.mulf %19, %20 : vector<64x8xf32>
    %22 = vector.broadcast %17 : vector<1x8xf32> to vector<64x8xf32>
    %23 = arith.addf %21, %22 : vector<64x8xf32>
    %24 = vector.broadcast %10 : vector<64x1xf32> to vector<64x8xf32>
    %25 = arith.mulf %23, %24 : vector<64x8xf32>
    %c0_12 = arith.constant 0 : index
    %c0_13 = arith.constant 0 : index
    %26 = vector.load %arg5[%c0_12, %c0_13] : memref<1x8xf32, #tpu.memory_space<vmem>>, vector<1x8xf32>
    %27 = vector.broadcast %26 : vector<1x8xf32> to vector<64x8xf32>
    %28 = arith.mulf %25, %27 : vector<64x8xf32>
    %c0_14 = arith.constant 0 : index
    %c0_15 = arith.constant 0 : index
    %29 = vector.load %arg6[%c0_14, %c0_15] : memref<1x8xf32, #tpu.memory_space<vmem>>, vector<1x8xf32>
    %30 = vector.broadcast %29 : vector<1x8xf32> to vector<64x8xf32>
    %31 = arith.addf %28, %30 : vector<64x8xf32>
    %cst_16 = arith.constant 0.000000e+00 : f32
    %32 = vector.broadcast %cst_16 : f32 to vector<64x8xf32>
    %33 = arith.maximumf %31, %32 : vector<64x8xf32>
    %c0_17 = arith.constant 0 : index
    %c0_18 = arith.constant 0 : index
    %34 = vector.load %arg7[%c0_17, %c0_18] : memref<64x8xf32, #tpu.memory_space<vmem>>, vector<64x8xf32>
    tpu.vector_store %arg7[%c0_17, %c0_18], %33 {strides = array<i32>} : memref<64x8xf32, #tpu.memory_space<vmem>>, vector<64x8xf32>,
    return
  }
  func.func @transform_0(%arg0: i32) -> (i32, i32) {
    %c0_i32 = arith.constant 0 : i32
    %c0_i32_0 = arith.constant 0 : i32
    return %arg0, %c0_i32 : i32, i32
  }
  func.func @transform_1(%arg0: i32) -> (i32, i32) {
    %c0_i32 = arith.constant 0 : i32
    %c0_i32_0 = arith.constant 0 : i32
    return %arg0, %c0_i32 : i32, i32
  }
  func.func @transform_2(%arg0: i32) -> (i32, i32) {
    %c0_i32 = arith.constant 0 : i32
    %c0_i32_0 = arith.constant 0 : i32
    %c0_i32_1 = arith.constant 0 : i32
    return %c0_i32, %c0_i32_0 : i32, i32
  }
  func.func @transform_3(%arg0: i32) -> (i32, i32) {
    %c0_i32 = arith.constant 0 : i32
    %c0_i32_0 = arith.constant 0 : i32
    %c0_i32_1 = arith.constant 0 : i32
    return %c0_i32, %c0_i32_0 : i32, i32
  }
  func.func @transform_4(%arg0: i32) -> (i32, i32) {
    %c0_i32 = arith.constant 0 : i32
    %c0_i32_0 = arith.constant 0 : i32
    %c0_i32_1 = arith.constant 0 : i32
    return %c0_i32, %c0_i32_0 : i32, i32
  }
  func.func @transform_5(%arg0: i32) -> (i32, i32) {
    %c0_i32 = arith.constant 0 : i32
    %c0_i32_0 = arith.constant 0 : i32
    %c0_i32_1 = arith.constant 0 : i32
    return %c0_i32, %c0_i32_0 : i32, i32
  }
  func.func @transform_6(%arg0: i32) -> (i32, i32) {
    %c0_i32 = arith.constant 0 : i32
    %c0_i32_0 = arith.constant 0 : i32
    return %arg0, %c0_i32 : i32, i32
  }
}

module attributes {stable_mosaic.version = 11 : i64} {
  func.func @_pconv_matmul_kernel(%arg0: i32, %arg1: memref<16x256xbf16, #tpu.memory_space<vmem>>, %arg2: memref<16x25xbf16, #tpu.memory_space<vmem>>, %arg3: memref<256x16xbf16, #tpu.memory_space<vmem>>, %arg4: memref<1x16xf32, #tpu.memory_space<vmem>>, %arg5: memref<1x16xf32, #tpu.memory_space<vmem>>, %arg6: memref<1x16xf32, #tpu.memory_space<vmem>>, %arg7: memref<16x16xf32, #tpu.memory_space<vmem>>) attributes {dimension_semantics = [#tpu.dimension_semantics<parallel>], iteration_bounds = array<i64: 2>, scalar_prefetch = 0 : i64, scratch_operands = 0 : i64, tpu.core_type = #tpu.core_type<tc>, window_params = [{transform_indices = @transform_0, window_bounds = array<i64: 16, 256>}, {transform_indices = @transform_1, window_bounds = array<i64: 16, 25>}, {pipeline_mode = #tpu.pipeline_mode<synchronous>, transform_indices = @transform_2, window_bounds = array<i64: 256, 16>}, {pipeline_mode = #tpu.pipeline_mode<synchronous>, transform_indices = @transform_3, window_bounds = array<i64: 1, 16>}, {pipeline_mode = #tpu.pipeline_mode<synchronous>, transform_indices = @transform_4, window_bounds = array<i64: 1, 16>}, {pipeline_mode = #tpu.pipeline_mode<synchronous>, transform_indices = @transform_5, window_bounds = array<i64: 1, 16>}, {transform_indices = @transform_6, window_bounds = array<i64: 16, 16>}]} {
    %c0 = arith.constant 0 : index
    %c0_0 = arith.constant 0 : index
    %0 = vector.load %arg1[%c0, %c0_0] : memref<16x256xbf16, #tpu.memory_space<vmem>>, vector<16x256xbf16>
    %c0_1 = arith.constant 0 : index
    %c0_2 = arith.constant 0 : index
    %1 = vector.load %arg2[%c0_1, %c0_2] : memref<16x25xbf16, #tpu.memory_space<vmem>>, vector<16x25xbf16>
    %2 = arith.extf %1 : vector<16x25xbf16> to vector<16x25xf32>
    %c0_3 = arith.constant 0 : index
    %c0_4 = arith.constant 0 : index
    %3 = vector.load %arg3[%c0_3, %c0_4] : memref<256x16xbf16, #tpu.memory_space<vmem>>, vector<256x16xbf16>
    %cst = arith.constant dense<0.000000e+00> : vector<16x16xf32>
    %4 = tpu.matmul %0, %3, %cst {dimension_numbers = #tpu.dot_dimension_numbers<[1], [0], [0], [1], [0, 0, 1, 1], [], []>} : vector<16x256xbf16>, vector<256x16xbf16>, vector<16x16xf32> -> vector<16x16xf32>
    %cst_5 = arith.constant dense<0.000000e+00> : vector<16xf32>
    %5 = vector.multi_reduction <add>, %2, %cst_5 [1] : vector<16x25xf32> to vector<16xf32>
    %6 = vector.shape_cast %5 : vector<16xf32> to vector<16x1xf32>
    %cst_6 = arith.constant 0.000000e+00 : f32
    %cst_7 = arith.constant 1.000000e+00 : f32
    %7 = vector.broadcast %cst_6 : f32 to vector<16x1xf32>
    %8 = arith.maximumf %7, %6 : vector<16x1xf32>
    %9 = vector.broadcast %cst_7 : f32 to vector<16x1xf32>
    %10 = arith.minimumf %9, %8 : vector<16x1xf32>
    %cst_8 = arith.constant 9.99999993E-9 : f32
    %11 = vector.broadcast %cst_8 : f32 to vector<16x1xf32>
    %12 = arith.addf %6, %11 : vector<16x1xf32>
    %13 = tpu.reciprocal %12 {approx = true} : vector<16x1xf32> -> vector<16x1xf32>
    %cst_9 = arith.constant 2.000000e+02 : f32
    %14 = vector.broadcast %cst_9 : f32 to vector<16x1xf32>
    %15 = arith.mulf %14, %13 : vector<16x1xf32>
    %16 = arith.mulf %15, %10 : vector<16x1xf32>
    %17 = vector.broadcast %16 : vector<16x1xf32> to vector<16x16xf32>
    %18 = arith.mulf %4, %17 : vector<16x16xf32>
    %c0_10 = arith.constant 0 : index
    %c0_11 = arith.constant 0 : index
    %19 = vector.load %arg5[%c0_10, %c0_11] : memref<1x16xf32, #tpu.memory_space<vmem>>, vector<1x16xf32>
    %20 = vector.broadcast %19 : vector<1x16xf32> to vector<16x16xf32>
    %21 = arith.mulf %18, %20 : vector<16x16xf32>
    %c0_12 = arith.constant 0 : index
    %c0_13 = arith.constant 0 : index
    %22 = vector.load %arg6[%c0_12, %c0_13] : memref<1x16xf32, #tpu.memory_space<vmem>>, vector<1x16xf32>
    %23 = vector.broadcast %22 : vector<1x16xf32> to vector<16x16xf32>
    %24 = arith.addf %21, %23 : vector<16x16xf32>
    %cst_14 = arith.constant 0.000000e+00 : f32
    %25 = vector.broadcast %cst_14 : f32 to vector<16x16xf32>
    %26 = arith.maximumf %24, %25 : vector<16x16xf32>
    %c0_15 = arith.constant 0 : index
    %c0_16 = arith.constant 0 : index
    %27 = vector.load %arg7[%c0_15, %c0_16] : memref<16x16xf32, #tpu.memory_space<vmem>>, vector<16x16xf32>
    tpu.vector_store %arg7[%c0_15, %c0_16], %26 {strides = array<i32>} : memref<16x16xf32, #tpu.memory_space<vmem>>, vector<16x16xf32>,
    return
  }
  func.func @transform_0(%arg0: i32) -> (i32, i32) {
    %c0_i32 = arith.constant 0 : i32
    %c0_i32_0 = arith.constant 0 : i32
    return %arg0, %c0_i32 : i32, i32
  }
  func.func @transform_1(%arg0: i32) -> (i32, i32) {
    %c0_i32 = arith.constant 0 : i32
    %c0_i32_0 = arith.constant 0 : i32
    return %arg0, %c0_i32 : i32, i32
  }
  func.func @transform_2(%arg0: i32) -> (i32, i32) {
    %c0_i32 = arith.constant 0 : i32
    %c0_i32_0 = arith.constant 0 : i32
    %c0_i32_1 = arith.constant 0 : i32
    return %c0_i32, %c0_i32_0 : i32, i32
  }
  func.func @transform_3(%arg0: i32) -> (i32, i32) {
    %c0_i32 = arith.constant 0 : i32
    %c0_i32_0 = arith.constant 0 : i32
    %c0_i32_1 = arith.constant 0 : i32
    return %c0_i32, %c0_i32_0 : i32, i32
  }
  func.func @transform_4(%arg0: i32) -> (i32, i32) {
    %c0_i32 = arith.constant 0 : i32
    %c0_i32_0 = arith.constant 0 : i32
    %c0_i32_1 = arith.constant 0 : i32
    return %c0_i32, %c0_i32_0 : i32, i32
  }
  func.func @transform_5(%arg0: i32) -> (i32, i32) {
    %c0_i32 = arith.constant 0 : i32
    %c0_i32_0 = arith.constant 0 : i32
    %c0_i32_1 = arith.constant 0 : i32
    return %c0_i32, %c0_i32_0 : i32, i32
  }
  func.func @transform_6(%arg0: i32) -> (i32, i32) {
    %c0_i32 = arith.constant 0 : i32
    %c0_i32_0 = arith.constant 0 : i32
    return %arg0, %c0_i32 : i32, i32
  }
}

module attributes {stable_mosaic.version = 11 : i64} {
  func.func @_pconv_matmul_kernel(%arg0: i32, %arg1: memref<16x256xbf16, #tpu.memory_space<vmem>>, %arg2: memref<16x9xbf16, #tpu.memory_space<vmem>>, %arg3: memref<256x16xbf16, #tpu.memory_space<vmem>>, %arg4: memref<1x16xf32, #tpu.memory_space<vmem>>, %arg5: memref<1x16xf32, #tpu.memory_space<vmem>>, %arg6: memref<1x16xf32, #tpu.memory_space<vmem>>, %arg7: memref<16x16xf32, #tpu.memory_space<vmem>>) attributes {dimension_semantics = [#tpu.dimension_semantics<parallel>], iteration_bounds = array<i64: 1>, scalar_prefetch = 0 : i64, scratch_operands = 0 : i64, tpu.core_type = #tpu.core_type<tc>, window_params = [{transform_indices = @transform_0, window_bounds = array<i64: 16, 256>}, {transform_indices = @transform_1, window_bounds = array<i64: 16, 9>}, {pipeline_mode = #tpu.pipeline_mode<synchronous>, transform_indices = @transform_2, window_bounds = array<i64: 256, 16>}, {pipeline_mode = #tpu.pipeline_mode<synchronous>, transform_indices = @transform_3, window_bounds = array<i64: 1, 16>}, {pipeline_mode = #tpu.pipeline_mode<synchronous>, transform_indices = @transform_4, window_bounds = array<i64: 1, 16>}, {pipeline_mode = #tpu.pipeline_mode<synchronous>, transform_indices = @transform_5, window_bounds = array<i64: 1, 16>}, {transform_indices = @transform_6, window_bounds = array<i64: 16, 16>}]} {
    %c0 = arith.constant 0 : index
    %c0_0 = arith.constant 0 : index
    %0 = vector.load %arg1[%c0, %c0_0] : memref<16x256xbf16, #tpu.memory_space<vmem>>, vector<16x256xbf16>
    %c0_1 = arith.constant 0 : index
    %c0_2 = arith.constant 0 : index
    %1 = vector.load %arg2[%c0_1, %c0_2] : memref<16x9xbf16, #tpu.memory_space<vmem>>, vector<16x9xbf16>
    %2 = arith.extf %1 : vector<16x9xbf16> to vector<16x9xf32>
    %c0_3 = arith.constant 0 : index
    %c0_4 = arith.constant 0 : index
    %3 = vector.load %arg3[%c0_3, %c0_4] : memref<256x16xbf16, #tpu.memory_space<vmem>>, vector<256x16xbf16>
    %cst = arith.constant dense<0.000000e+00> : vector<16x16xf32>
    %4 = tpu.matmul %0, %3, %cst {dimension_numbers = #tpu.dot_dimension_numbers<[1], [0], [0], [1], [0, 0, 1, 1], [], []>} : vector<16x256xbf16>, vector<256x16xbf16>, vector<16x16xf32> -> vector<16x16xf32>
    %cst_5 = arith.constant dense<0.000000e+00> : vector<16xf32>
    %5 = vector.multi_reduction <add>, %2, %cst_5 [1] : vector<16x9xf32> to vector<16xf32>
    %6 = vector.shape_cast %5 : vector<16xf32> to vector<16x1xf32>
    %cst_6 = arith.constant 0.000000e+00 : f32
    %cst_7 = arith.constant 1.000000e+00 : f32
    %7 = vector.broadcast %cst_6 : f32 to vector<16x1xf32>
    %8 = arith.maximumf %7, %6 : vector<16x1xf32>
    %9 = vector.broadcast %cst_7 : f32 to vector<16x1xf32>
    %10 = arith.minimumf %9, %8 : vector<16x1xf32>
    %cst_8 = arith.constant 9.99999993E-9 : f32
    %11 = vector.broadcast %cst_8 : f32 to vector<16x1xf32>
    %12 = arith.addf %6, %11 : vector<16x1xf32>
    %13 = tpu.reciprocal %12 {approx = true} : vector<16x1xf32> -> vector<16x1xf32>
    %cst_9 = arith.constant 1.440000e+02 : f32
    %14 = vector.broadcast %cst_9 : f32 to vector<16x1xf32>
    %15 = arith.mulf %14, %13 : vector<16x1xf32>
    %16 = arith.mulf %15, %10 : vector<16x1xf32>
    %17 = vector.broadcast %16 : vector<16x1xf32> to vector<16x16xf32>
    %18 = arith.mulf %4, %17 : vector<16x16xf32>
    %c0_10 = arith.constant 0 : index
    %c0_11 = arith.constant 0 : index
    %19 = vector.load %arg5[%c0_10, %c0_11] : memref<1x16xf32, #tpu.memory_space<vmem>>, vector<1x16xf32>
    %20 = vector.broadcast %19 : vector<1x16xf32> to vector<16x16xf32>
    %21 = arith.mulf %18, %20 : vector<16x16xf32>
    %c0_12 = arith.constant 0 : index
    %c0_13 = arith.constant 0 : index
    %22 = vector.load %arg6[%c0_12, %c0_13] : memref<1x16xf32, #tpu.memory_space<vmem>>, vector<1x16xf32>
    %23 = vector.broadcast %22 : vector<1x16xf32> to vector<16x16xf32>
    %24 = arith.addf %21, %23 : vector<16x16xf32>
    %cst_14 = arith.constant 0.000000e+00 : f32
    %25 = vector.broadcast %cst_14 : f32 to vector<16x16xf32>
    %26 = arith.maximumf %24, %25 : vector<16x16xf32>
    %c0_15 = arith.constant 0 : index
    %c0_16 = arith.constant 0 : index
    %27 = vector.load %arg7[%c0_15, %c0_16] : memref<16x16xf32, #tpu.memory_space<vmem>>, vector<16x16xf32>
    tpu.vector_store %arg7[%c0_15, %c0_16], %26 {strides = array<i32>} : memref<16x16xf32, #tpu.memory_space<vmem>>, vector<16x16xf32>,
    return
  }
  func.func @transform_0(%arg0: i32) -> (i32, i32) {
    %c0_i32 = arith.constant 0 : i32
    %c0_i32_0 = arith.constant 0 : i32
    return %arg0, %c0_i32 : i32, i32
  }
  func.func @transform_1(%arg0: i32) -> (i32, i32) {
    %c0_i32 = arith.constant 0 : i32
    %c0_i32_0 = arith.constant 0 : i32
    return %arg0, %c0_i32 : i32, i32
  }
  func.func @transform_2(%arg0: i32) -> (i32, i32) {
    %c0_i32 = arith.constant 0 : i32
    %c0_i32_0 = arith.constant 0 : i32
    %c0_i32_1 = arith.constant 0 : i32
    return %c0_i32, %c0_i32_0 : i32, i32
  }
  func.func @transform_3(%arg0: i32) -> (i32, i32) {
    %c0_i32 = arith.constant 0 : i32
    %c0_i32_0 = arith.constant 0 : i32
    %c0_i32_1 = arith.constant 0 : i32
    return %c0_i32, %c0_i32_0 : i32, i32
  }
  func.func @transform_4(%arg0: i32) -> (i32, i32) {
    %c0_i32 = arith.constant 0 : i32
    %c0_i32_0 = arith.constant 0 : i32
    %c0_i32_1 = arith.constant 0 : i32
    return %c0_i32, %c0_i32_0 : i32, i32
  }
  func.func @transform_5(%arg0: i32) -> (i32, i32) {
    %c0_i32 = arith.constant 0 : i32
    %c0_i32_0 = arith.constant 0 : i32
    %c0_i32_1 = arith.constant 0 : i32
    return %c0_i32, %c0_i32_0 : i32, i32
  }
  func.func @transform_6(%arg0: i32) -> (i32, i32) {
    %c0_i32 = arith.constant 0 : i32
    %c0_i32_0 = arith.constant 0 : i32
    return %arg0, %c0_i32 : i32, i32
  }
}

module attributes {stable_mosaic.version = 11 : i64} {
  func.func @_pconv_matmul_kernel(%arg0: i32, %arg1: memref<16x384xbf16, #tpu.memory_space<vmem>>, %arg2: memref<16x9xbf16, #tpu.memory_space<vmem>>, %arg3: memref<384x16xbf16, #tpu.memory_space<vmem>>, %arg4: memref<1x16xf32, #tpu.memory_space<vmem>>, %arg5: memref<1x16xf32, #tpu.memory_space<vmem>>, %arg6: memref<1x16xf32, #tpu.memory_space<vmem>>, %arg7: memref<16x16xf32, #tpu.memory_space<vmem>>) attributes {dimension_semantics = [#tpu.dimension_semantics<parallel>], iteration_bounds = array<i64: 2>, scalar_prefetch = 0 : i64, scratch_operands = 0 : i64, tpu.core_type = #tpu.core_type<tc>, window_params = [{transform_indices = @transform_0, window_bounds = array<i64: 16, 384>}, {transform_indices = @transform_1, window_bounds = array<i64: 16, 9>}, {pipeline_mode = #tpu.pipeline_mode<synchronous>, transform_indices = @transform_2, window_bounds = array<i64: 384, 16>}, {pipeline_mode = #tpu.pipeline_mode<synchronous>, transform_indices = @transform_3, window_bounds = array<i64: 1, 16>}, {pipeline_mode = #tpu.pipeline_mode<synchronous>, transform_indices = @transform_4, window_bounds = array<i64: 1, 16>}, {pipeline_mode = #tpu.pipeline_mode<synchronous>, transform_indices = @transform_5, window_bounds = array<i64: 1, 16>}, {transform_indices = @transform_6, window_bounds = array<i64: 16, 16>}]} {
    %c0 = arith.constant 0 : index
    %c0_0 = arith.constant 0 : index
    %0 = vector.load %arg1[%c0, %c0_0] : memref<16x384xbf16, #tpu.memory_space<vmem>>, vector<16x384xbf16>
    %c0_1 = arith.constant 0 : index
    %c0_2 = arith.constant 0 : index
    %1 = vector.load %arg2[%c0_1, %c0_2] : memref<16x9xbf16, #tpu.memory_space<vmem>>, vector<16x9xbf16>
    %2 = arith.extf %1 : vector<16x9xbf16> to vector<16x9xf32>
    %c0_3 = arith.constant 0 : index
    %c0_4 = arith.constant 0 : index
    %3 = vector.load %arg3[%c0_3, %c0_4] : memref<384x16xbf16, #tpu.memory_space<vmem>>, vector<384x16xbf16>
    %cst = arith.constant dense<0.000000e+00> : vector<16x16xf32>
    %4 = tpu.matmul %0, %3, %cst {dimension_numbers = #tpu.dot_dimension_numbers<[1], [0], [0], [1], [0, 0, 1, 1], [], []>} : vector<16x384xbf16>, vector<384x16xbf16>, vector<16x16xf32> -> vector<16x16xf32>
    %cst_5 = arith.constant dense<0.000000e+00> : vector<16xf32>
    %5 = vector.multi_reduction <add>, %2, %cst_5 [1] : vector<16x9xf32> to vector<16xf32>
    %6 = vector.shape_cast %5 : vector<16xf32> to vector<16x1xf32>
    %cst_6 = arith.constant 0.000000e+00 : f32
    %cst_7 = arith.constant 1.000000e+00 : f32
    %7 = vector.broadcast %cst_6 : f32 to vector<16x1xf32>
    %8 = arith.maximumf %7, %6 : vector<16x1xf32>
    %9 = vector.broadcast %cst_7 : f32 to vector<16x1xf32>
    %10 = arith.minimumf %9, %8 : vector<16x1xf32>
    %cst_8 = arith.constant 9.99999993E-9 : f32
    %11 = vector.broadcast %cst_8 : f32 to vector<16x1xf32>
    %12 = arith.addf %6, %11 : vector<16x1xf32>
    %13 = tpu.reciprocal %12 {approx = true} : vector<16x1xf32> -> vector<16x1xf32>
    %cst_9 = arith.constant 2.880000e+02 : f32
    %14 = vector.broadcast %cst_9 : f32 to vector<16x1xf32>
    %15 = arith.mulf %14, %13 : vector<16x1xf32>
    %16 = arith.mulf %15, %10 : vector<16x1xf32>
    %17 = vector.broadcast %16 : vector<16x1xf32> to vector<16x16xf32>
    %18 = arith.mulf %4, %17 : vector<16x16xf32>
    %c0_10 = arith.constant 0 : index
    %c0_11 = arith.constant 0 : index
    %19 = vector.load %arg5[%c0_10, %c0_11] : memref<1x16xf32, #tpu.memory_space<vmem>>, vector<1x16xf32>
    %20 = vector.broadcast %19 : vector<1x16xf32> to vector<16x16xf32>
    %21 = arith.mulf %18, %20 : vector<16x16xf32>
    %c0_12 = arith.constant 0 : index
    %c0_13 = arith.constant 0 : index
    %22 = vector.load %arg6[%c0_12, %c0_13] : memref<1x16xf32, #tpu.memory_space<vmem>>, vector<1x16xf32>
    %23 = vector.broadcast %22 : vector<1x16xf32> to vector<16x16xf32>
    %24 = arith.addf %21, %23 : vector<16x16xf32>
    %cst_14 = arith.constant 0.000000e+00 : f32
    %25 = vector.broadcast %cst_14 : f32 to vector<16x16xf32>
    %26 = arith.cmpf oge, %24, %25 : vector<16x16xf32>
    %cst_15 = arith.constant 2.000000e-01 : f32
    %27 = vector.broadcast %cst_15 : f32 to vector<16x16xf32>
    %28 = arith.mulf %24, %27 : vector<16x16xf32>
    %29 = arith.select %26, %24, %28 : vector<16x16xi1>, vector<16x16xf32>
    %c0_16 = arith.constant 0 : index
    %c0_17 = arith.constant 0 : index
    %30 = vector.load %arg7[%c0_16, %c0_17] : memref<16x16xf32, #tpu.memory_space<vmem>>, vector<16x16xf32>
    tpu.vector_store %arg7[%c0_16, %c0_17], %29 {strides = array<i32>} : memref<16x16xf32, #tpu.memory_space<vmem>>, vector<16x16xf32>,
    return
  }
  func.func @transform_0(%arg0: i32) -> (i32, i32) {
    %c0_i32 = arith.constant 0 : i32
    %c0_i32_0 = arith.constant 0 : i32
    return %arg0, %c0_i32 : i32, i32
  }
  func.func @transform_1(%arg0: i32) -> (i32, i32) {
    %c0_i32 = arith.constant 0 : i32
    %c0_i32_0 = arith.constant 0 : i32
    return %arg0, %c0_i32 : i32, i32
  }
  func.func @transform_2(%arg0: i32) -> (i32, i32) {
    %c0_i32 = arith.constant 0 : i32
    %c0_i32_0 = arith.constant 0 : i32
    %c0_i32_1 = arith.constant 0 : i32
    return %c0_i32, %c0_i32_0 : i32, i32
  }
  func.func @transform_3(%arg0: i32) -> (i32, i32) {
    %c0_i32 = arith.constant 0 : i32
    %c0_i32_0 = arith.constant 0 : i32
    %c0_i32_1 = arith.constant 0 : i32
    return %c0_i32, %c0_i32_0 : i32, i32
  }
  func.func @transform_4(%arg0: i32) -> (i32, i32) {
    %c0_i32 = arith.constant 0 : i32
    %c0_i32_0 = arith.constant 0 : i32
    %c0_i32_1 = arith.constant 0 : i32
    return %c0_i32, %c0_i32_0 : i32, i32
  }
  func.func @transform_5(%arg0: i32) -> (i32, i32) {
    %c0_i32 = arith.constant 0 : i32
    %c0_i32_0 = arith.constant 0 : i32
    %c0_i32_1 = arith.constant 0 : i32
    return %c0_i32, %c0_i32_0 : i32, i32
  }
  func.func @transform_6(%arg0: i32) -> (i32, i32) {
    %c0_i32 = arith.constant 0 : i32
    %c0_i32_0 = arith.constant 0 : i32
    return %arg0, %c0_i32 : i32, i32
  }
}

module attributes {stable_mosaic.version = 11 : i64} {
  func.func @_pconv_matmul_kernel(%arg0: i32, %arg1: memref<64x256xbf16, #tpu.memory_space<vmem>>, %arg2: memref<64x9xbf16, #tpu.memory_space<vmem>>, %arg3: memref<256x8xbf16, #tpu.memory_space<vmem>>, %arg4: memref<1x8xf32, #tpu.memory_space<vmem>>, %arg5: memref<1x8xf32, #tpu.memory_space<vmem>>, %arg6: memref<1x8xf32, #tpu.memory_space<vmem>>, %arg7: memref<64x8xf32, #tpu.memory_space<vmem>>) attributes {dimension_semantics = [#tpu.dimension_semantics<parallel>], iteration_bounds = array<i64: 2>, scalar_prefetch = 0 : i64, scratch_operands = 0 : i64, tpu.core_type = #tpu.core_type<tc>, window_params = [{transform_indices = @transform_0, window_bounds = array<i64: 64, 256>}, {transform_indices = @transform_1, window_bounds = array<i64: 64, 9>}, {pipeline_mode = #tpu.pipeline_mode<synchronous>, transform_indices = @transform_2, window_bounds = array<i64: 256, 8>}, {pipeline_mode = #tpu.pipeline_mode<synchronous>, transform_indices = @transform_3, window_bounds = array<i64: 1, 8>}, {pipeline_mode = #tpu.pipeline_mode<synchronous>, transform_indices = @transform_4, window_bounds = array<i64: 1, 8>}, {pipeline_mode = #tpu.pipeline_mode<synchronous>, transform_indices = @transform_5, window_bounds = array<i64: 1, 8>}, {transform_indices = @transform_6, window_bounds = array<i64: 64, 8>}]} {
    %c0 = arith.constant 0 : index
    %c0_0 = arith.constant 0 : index
    %0 = vector.load %arg1[%c0, %c0_0] : memref<64x256xbf16, #tpu.memory_space<vmem>>, vector<64x256xbf16>
    %c0_1 = arith.constant 0 : index
    %c0_2 = arith.constant 0 : index
    %1 = vector.load %arg2[%c0_1, %c0_2] : memref<64x9xbf16, #tpu.memory_space<vmem>>, vector<64x9xbf16>
    %2 = arith.extf %1 : vector<64x9xbf16> to vector<64x9xf32>
    %c0_3 = arith.constant 0 : index
    %c0_4 = arith.constant 0 : index
    %3 = vector.load %arg3[%c0_3, %c0_4] : memref<256x8xbf16, #tpu.memory_space<vmem>>, vector<256x8xbf16>
    %cst = arith.constant dense<0.000000e+00> : vector<64x8xf32>
    %4 = tpu.matmul %0, %3, %cst {dimension_numbers = #tpu.dot_dimension_numbers<[1], [0], [0], [1], [0, 0, 1, 1], [], []>} : vector<64x256xbf16>, vector<256x8xbf16>, vector<64x8xf32> -> vector<64x8xf32>
    %cst_5 = arith.constant dense<0.000000e+00> : vector<64xf32>
    %5 = vector.multi_reduction <add>, %2, %cst_5 [1] : vector<64x9xf32> to vector<64xf32>
    %6 = vector.shape_cast %5 : vector<64xf32> to vector<64x1xf32>
    %cst_6 = arith.constant 0.000000e+00 : f32
    %cst_7 = arith.constant 1.000000e+00 : f32
    %7 = vector.broadcast %cst_6 : f32 to vector<64x1xf32>
    %8 = arith.maximumf %7, %6 : vector<64x1xf32>
    %9 = vector.broadcast %cst_7 : f32 to vector<64x1xf32>
    %10 = arith.minimumf %9, %8 : vector<64x1xf32>
    %cst_8 = arith.constant 9.99999993E-9 : f32
    %11 = vector.broadcast %cst_8 : f32 to vector<64x1xf32>
    %12 = arith.addf %6, %11 : vector<64x1xf32>
    %13 = tpu.reciprocal %12 {approx = true} : vector<64x1xf32> -> vector<64x1xf32>
    %cst_9 = arith.constant 2.160000e+02 : f32
    %14 = vector.broadcast %cst_9 : f32 to vector<64x1xf32>
    %15 = arith.mulf %14, %13 : vector<64x1xf32>
    %16 = arith.mulf %15, %10 : vector<64x1xf32>
    %17 = vector.broadcast %16 : vector<64x1xf32> to vector<64x8xf32>
    %18 = arith.mulf %4, %17 : vector<64x8xf32>
    %c0_10 = arith.constant 0 : index
    %c0_11 = arith.constant 0 : index
    %19 = vector.load %arg5[%c0_10, %c0_11] : memref<1x8xf32, #tpu.memory_space<vmem>>, vector<1x8xf32>
    %20 = vector.broadcast %19 : vector<1x8xf32> to vector<64x8xf32>
    %21 = arith.mulf %18, %20 : vector<64x8xf32>
    %c0_12 = arith.constant 0 : index
    %c0_13 = arith.constant 0 : index
    %22 = vector.load %arg6[%c0_12, %c0_13] : memref<1x8xf32, #tpu.memory_space<vmem>>, vector<1x8xf32>
    %23 = vector.broadcast %22 : vector<1x8xf32> to vector<64x8xf32>
    %24 = arith.addf %21, %23 : vector<64x8xf32>
    %cst_14 = arith.constant 0.000000e+00 : f32
    %25 = vector.broadcast %cst_14 : f32 to vector<64x8xf32>
    %26 = arith.cmpf oge, %24, %25 : vector<64x8xf32>
    %cst_15 = arith.constant 2.000000e-01 : f32
    %27 = vector.broadcast %cst_15 : f32 to vector<64x8xf32>
    %28 = arith.mulf %24, %27 : vector<64x8xf32>
    %29 = arith.select %26, %24, %28 : vector<64x8xi1>, vector<64x8xf32>
    %c0_16 = arith.constant 0 : index
    %c0_17 = arith.constant 0 : index
    %30 = vector.load %arg7[%c0_16, %c0_17] : memref<64x8xf32, #tpu.memory_space<vmem>>, vector<64x8xf32>
    tpu.vector_store %arg7[%c0_16, %c0_17], %29 {strides = array<i32>} : memref<64x8xf32, #tpu.memory_space<vmem>>, vector<64x8xf32>,
    return
  }
  func.func @transform_0(%arg0: i32) -> (i32, i32) {
    %c0_i32 = arith.constant 0 : i32
    %c0_i32_0 = arith.constant 0 : i32
    return %arg0, %c0_i32 : i32, i32
  }
  func.func @transform_1(%arg0: i32) -> (i32, i32) {
    %c0_i32 = arith.constant 0 : i32
    %c0_i32_0 = arith.constant 0 : i32
    return %arg0, %c0_i32 : i32, i32
  }
  func.func @transform_2(%arg0: i32) -> (i32, i32) {
    %c0_i32 = arith.constant 0 : i32
    %c0_i32_0 = arith.constant 0 : i32
    %c0_i32_1 = arith.constant 0 : i32
    return %c0_i32, %c0_i32_0 : i32, i32
  }
  func.func @transform_3(%arg0: i32) -> (i32, i32) {
    %c0_i32 = arith.constant 0 : i32
    %c0_i32_0 = arith.constant 0 : i32
    %c0_i32_1 = arith.constant 0 : i32
    return %c0_i32, %c0_i32_0 : i32, i32
  }
  func.func @transform_4(%arg0: i32) -> (i32, i32) {
    %c0_i32 = arith.constant 0 : i32
    %c0_i32_0 = arith.constant 0 : i32
    %c0_i32_1 = arith.constant 0 : i32
    return %c0_i32, %c0_i32_0 : i32, i32
  }
  func.func @transform_5(%arg0: i32) -> (i32, i32) {
    %c0_i32 = arith.constant 0 : i32
    %c0_i32_0 = arith.constant 0 : i32
    %c0_i32_1 = arith.constant 0 : i32
    return %c0_i32, %c0_i32_0 : i32, i32
  }
  func.func @transform_6(%arg0: i32) -> (i32, i32) {
    %c0_i32 = arith.constant 0 : i32
    %c0_i32_0 = arith.constant 0 : i32
    return %arg0, %c0_i32 : i32, i32
  }
}

module attributes {stable_mosaic.version = 11 : i64} {
  func.func @_pconv_matmul_kernel(%arg0: i32, %arg1: memref<256x128xbf16, #tpu.memory_space<vmem>>, %arg2: memref<256x9xbf16, #tpu.memory_space<vmem>>, %arg3: memref<128x4xbf16, #tpu.memory_space<vmem>>, %arg4: memref<1x4xf32, #tpu.memory_space<vmem>>, %arg5: memref<1x4xf32, #tpu.memory_space<vmem>>, %arg6: memref<1x4xf32, #tpu.memory_space<vmem>>, %arg7: memref<256x4xf32, #tpu.memory_space<vmem>>) attributes {dimension_semantics = [#tpu.dimension_semantics<parallel>], iteration_bounds = array<i64: 2>, scalar_prefetch = 0 : i64, scratch_operands = 0 : i64, tpu.core_type = #tpu.core_type<tc>, window_params = [{transform_indices = @transform_0, window_bounds = array<i64: 256, 128>}, {transform_indices = @transform_1, window_bounds = array<i64: 256, 9>}, {pipeline_mode = #tpu.pipeline_mode<synchronous>, transform_indices = @transform_2, window_bounds = array<i64: 128, 4>}, {pipeline_mode = #tpu.pipeline_mode<synchronous>, transform_indices = @transform_3, window_bounds = array<i64: 1, 4>}, {pipeline_mode = #tpu.pipeline_mode<synchronous>, transform_indices = @transform_4, window_bounds = array<i64: 1, 4>}, {pipeline_mode = #tpu.pipeline_mode<synchronous>, transform_indices = @transform_5, window_bounds = array<i64: 1, 4>}, {transform_indices = @transform_6, window_bounds = array<i64: 256, 4>}]} {
    %c0 = arith.constant 0 : index
    %c0_0 = arith.constant 0 : index
    %0 = vector.load %arg1[%c0, %c0_0] : memref<256x128xbf16, #tpu.memory_space<vmem>>, vector<256x128xbf16>
    %c0_1 = arith.constant 0 : index
    %c0_2 = arith.constant 0 : index
    %1 = vector.load %arg2[%c0_1, %c0_2] : memref<256x9xbf16, #tpu.memory_space<vmem>>, vector<256x9xbf16>
    %2 = arith.extf %1 : vector<256x9xbf16> to vector<256x9xf32>
    %c0_3 = arith.constant 0 : index
    %c0_4 = arith.constant 0 : index
    %3 = vector.load %arg3[%c0_3, %c0_4] : memref<128x4xbf16, #tpu.memory_space<vmem>>, vector<128x4xbf16>
    %cst = arith.constant dense<0.000000e+00> : vector<256x4xf32>
    %4 = tpu.matmul %0, %3, %cst {dimension_numbers = #tpu.dot_dimension_numbers<[1], [0], [0], [1], [0, 0, 1, 1], [], []>} : vector<256x128xbf16>, vector<128x4xbf16>, vector<256x4xf32> -> vector<256x4xf32>
    %cst_5 = arith.constant dense<0.000000e+00> : vector<256xf32>
    %5 = vector.multi_reduction <add>, %2, %cst_5 [1] : vector<256x9xf32> to vector<256xf32>
    %6 = vector.shape_cast %5 : vector<256xf32> to vector<256x1xf32>
    %cst_6 = arith.constant 0.000000e+00 : f32
    %cst_7 = arith.constant 1.000000e+00 : f32
    %7 = vector.broadcast %cst_6 : f32 to vector<256x1xf32>
    %8 = arith.maximumf %7, %6 : vector<256x1xf32>
    %9 = vector.broadcast %cst_7 : f32 to vector<256x1xf32>
    %10 = arith.minimumf %9, %8 : vector<256x1xf32>
    %cst_8 = arith.constant 9.99999993E-9 : f32
    %11 = vector.broadcast %cst_8 : f32 to vector<256x1xf32>
    %12 = arith.addf %6, %11 : vector<256x1xf32>
    %13 = tpu.reciprocal %12 {approx = true} : vector<256x1xf32> -> vector<256x1xf32>
    %cst_9 = arith.constant 1.080000e+02 : f32
    %14 = vector.broadcast %cst_9 : f32 to vector<256x1xf32>
    %15 = arith.mulf %14, %13 : vector<256x1xf32>
    %16 = arith.mulf %15, %10 : vector<256x1xf32>
    %c0_10 = arith.constant 0 : index
    %c0_11 = arith.constant 0 : index
    %17 = vector.load %arg4[%c0_10, %c0_11] : memref<1x4xf32, #tpu.memory_space<vmem>>, vector<1x4xf32>
    %18 = vector.broadcast %17 : vector<1x4xf32> to vector<256x4xf32>
    %19 = arith.subf %4, %18 : vector<256x4xf32>
    %20 = vector.broadcast %16 : vector<256x1xf32> to vector<256x4xf32>
    %21 = arith.mulf %19, %20 : vector<256x4xf32>
    %22 = vector.broadcast %17 : vector<1x4xf32> to vector<256x4xf32>
    %23 = arith.addf %21, %22 : vector<256x4xf32>
    %24 = vector.broadcast %10 : vector<256x1xf32> to vector<256x4xf32>
    %25 = arith.mulf %23, %24 : vector<256x4xf32>
    %c0_12 = arith.constant 0 : index
    %c0_13 = arith.constant 0 : index
    %26 = vector.load %arg5[%c0_12, %c0_13] : memref<1x4xf32, #tpu.memory_space<vmem>>, vector<1x4xf32>
    %27 = vector.broadcast %26 : vector<1x4xf32> to vector<256x4xf32>
    %28 = arith.mulf %25, %27 : vector<256x4xf32>
    %c0_14 = arith.constant 0 : index
    %c0_15 = arith.constant 0 : index
    %29 = vector.load %arg6[%c0_14, %c0_15] : memref<1x4xf32, #tpu.memory_space<vmem>>, vector<1x4xf32>
    %30 = vector.broadcast %29 : vector<1x4xf32> to vector<256x4xf32>
    %31 = arith.addf %28, %30 : vector<256x4xf32>
    %c0_16 = arith.constant 0 : index
    %c0_17 = arith.constant 0 : index
    %32 = vector.load %arg7[%c0_16, %c0_17] : memref<256x4xf32, #tpu.memory_space<vmem>>, vector<256x4xf32>
    tpu.vector_store %arg7[%c0_16, %c0_17], %31 {strides = array<i32>} : memref<256x4xf32, #tpu.memory_space<vmem>>, vector<256x4xf32>,
    return
  }
  func.func @transform_0(%arg0: i32) -> (i32, i32) {
    %c0_i32 = arith.constant 0 : i32
    %c0_i32_0 = arith.constant 0 : i32
    return %arg0, %c0_i32 : i32, i32
  }
  func.func @transform_1(%arg0: i32) -> (i32, i32) {
    %c0_i32 = arith.constant 0 : i32
    %c0_i32_0 = arith.constant 0 : i32
    return %arg0, %c0_i32 : i32, i32
  }
  func.func @transform_2(%arg0: i32) -> (i32, i32) {
    %c0_i32 = arith.constant 0 : i32
    %c0_i32_0 = arith.constant 0 : i32
    %c0_i32_1 = arith.constant 0 : i32
    return %c0_i32, %c0_i32_0 : i32, i32
  }
  func.func @transform_3(%arg0: i32) -> (i32, i32) {
    %c0_i32 = arith.constant 0 : i32
    %c0_i32_0 = arith.constant 0 : i32
    %c0_i32_1 = arith.constant 0 : i32
    return %c0_i32, %c0_i32_0 : i32, i32
  }
  func.func @transform_4(%arg0: i32) -> (i32, i32) {
    %c0_i32 = arith.constant 0 : i32
    %c0_i32_0 = arith.constant 0 : i32
    %c0_i32_1 = arith.constant 0 : i32
    return %c0_i32, %c0_i32_0 : i32, i32
  }
  func.func @transform_5(%arg0: i32) -> (i32, i32) {
    %c0_i32 = arith.constant 0 : i32
    %c0_i32_0 = arith.constant 0 : i32
    %c0_i32_1 = arith.constant 0 : i32
    return %c0_i32, %c0_i32_0 : i32, i32
  }
  func.func @transform_6(%arg0: i32) -> (i32, i32) {
    %c0_i32 = arith.constant 0 : i32
    %c0_i32_0 = arith.constant 0 : i32
    return %arg0, %c0_i32 : i32, i32
  }
}

</mosaic_0001>

<bundles_post_ra>
// kernel: pconv_encoder_decoder_forward.6
= control target key start
LH: loop header
LB: loop body
LE: loop exit
PB: predicated region body
PF: predicated region fallthrough
CT: control target
= control target key end

     0   :  { %s977_s21 = smov 0   ;;  %s1146_s0 = inlined_call_operand.vmem [shape: bf16[128,256], index: 0, kind: input, shape index: {}]   ;;  %s1147_s1 = inlined_call_operand.vmem [shape: bf16[128,49], index: 1, kind: input, shape index: {}]   ;;  %s1148_s2 = inlined_call_operand.vmem [shape: bf16[256,8], index: 2, kind: input, shape index: {}]   ;;  %s1149_s3 = inlined_call_operand.vmem [shape: f32[1,8], index: 3, kind: input, shape index: {}]   ;;  %s1150_s4 = inlined_call_operand.vmem [shape: f32[1,8], index: 4, kind: input, shape index: {}]   ;;  %s1151_s5 = inlined_call_operand.vmem [shape: f32[1,8], index: 5, kind: input, shape index: {}]   ;;  %s1152_s6 = inlined_call_operand.vmem [shape: f32[128,8], index: 6, kind: output, shape index: {}]  }
   0x1 LB: > { %s765_s22 = sadd.s32 4294967295, %s940_s21   ;;  %p769_p0 = scmp.ge.s32.totalorder %s940_s21, 1  ;;  %s940_s21 = sphi %s977_s21, %s16_s21  }
   0x2   : > { %p225_p1 = scmp.lt.s32.totalorder %s940_s21, 3 }
   0x4   : > { %p226_p2 = pnand %p769_p0, %p225_p1 }
   0x5   : > { %v890_v0 = vld [vmem:[%s1148_s2 + $0x40] sm:$0xff] (!%p226_p2)   ;;  %s770_s25 = sshll.u32 (!%p226_p2), %s765_s22, 3  ;;  %v892_v2 = vld [vmem:[%s1148_s2 + $0x48] sm:$0xff] (!%p226_p2)   ;;  %v894_v4 = vld [vmem:[%s1148_s2 + $0x50] sm:$0xff] (!%p226_p2)   ;;  %vm538_vm0 = vcmask (!%p226_p2), 400384   ;;  %vm688_vm1 = vcmask (!%p226_p2), 64512  }
   0x6   : > { %229 = sbr.rel (%p226_p2) target bundleno = 279 (0x117), region = 44  ;;  %v891_v1 = vld [vmem:[%s1148_s2] sm:$0xff] (!%p226_p2)   ;;  %826 = vmatprep.subr.bf16.mxu0 (!%p226_p2), %v890_v0  ;;  %866 = vmatprep.subr.bf16.mxu1 (!%p226_p2), %v890_v0  ;;  %v893_v3 = vld [vmem:[%s1148_s2 + $0x8] sm:$0xff] (!%p226_p2)   ;;  %p262_p3 = scmp.lt.s32.totalorder (!%p226_p2), %s770_s25, 15  ;;  %v895_v5 = vld [vmem:[%s1148_s2 + $0x10] sm:$0xff] (!%p226_p2)  }
   0x7   : > { %827 = vmatpush3.bf16.msra.mxu0 (!%p226_p2), %v891_v1  ;;  %874 = vmatpush3.bf16.msra.mxu1 (!%p226_p2), %v891_v1  ;;  %v896_v6 = vld [vmem:[%s1148_s2 + $0x58] sm:$0xff] (!%p226_p2)   ;;  %v898_v8 = vld [vmem:[%s1148_s2 + $0x60] sm:$0xff] (!%p226_p2)   ;;  %v900_v10 = vld [vmem:[%s1148_s2 + $0x68] sm:$0xff] (!%p226_p2)  }
   0x8   : > { %828 = vmatprep.subr.bf16.mxu0 (!%p226_p2), %v892_v2  ;;  %867 = vmatprep.subr.bf16.mxu1 (!%p226_p2), %v892_v2  ;;  %v897_v7 = vld [vmem:[%s1148_s2 + $0x18] sm:$0xff] (!%p226_p2)   ;;  %v899_v9 = vld [vmem:[%s1148_s2 + $0x20] sm:$0xff] (!%p226_p2)   ;;  %v901_v13 = vld [vmem:[%s1148_s2 + $0x28] sm:$0xff] (!%p226_p2)  }
   0x9   : > { %v902_v14 = vld [vmem:[%s1148_s2 + $0x70] sm:$0xff] (!%p226_p2)   ;;  %v904_v23 = vld [vmem:[%s1148_s2 + $0x78] sm:$0xff] (!%p226_p2)  }
   0xa   : > { %v903_v21 = vld [vmem:[%s1148_s2 + $0x30] sm:$0xff] (!%p226_p2)   ;;  %v905_v30 = vld [vmem:[%s1148_s2 + $0x38] sm:$0xff] (!%p226_p2)  }
   0xb   : > { %829 = vmatpush3.bf16.msra.mxu0 (!%p226_p2), %v893_v3  ;;  %875 = vmatpush3.bf16.msra.mxu1 (!%p226_p2), %v893_v3 }
   0xc   : > { %830 = vmatprep.subr.bf16.mxu0 (!%p226_p2), %v894_v4  ;;  %868 = vmatprep.subr.bf16.mxu1 (!%p226_p2), %v894_v4 }
   0xd   : > { %s1154_s25 = smov (!%p262_p3, %s770_s25), 15 }
   0xe   : > { %s806_s16 = sshll.u32 %s1154_s25, 3  ;;  %s774_s26 = sshll.u32 %s1154_s25, 2 }
   0xf   : > { %831 = vmatpush3.bf16.msra.mxu0 %v895_v5  ;;  %876 = vmatpush3.bf16.msra.mxu1 %v895_v5  ;;  %s1020_s22 = scalar_lea.vmem %s1146_s0, %s806_s16  ;;  %s1034_s7 = scalar_lea.vmem %s1147_s1, %s774_s26 }
  0x10   : > { %832 = vmatprep.subr.bf16.mxu0 %v896_v6  ;;  %869 = vmatprep.subr.bf16.mxu1 %v896_v6  ;;  %v908_v11 = vld [vmem:[%s1020_s22 + $0x4] ss:$8 sps:$4 sm:$0xff]   ;;  %v824_v22 = vld [vmem:[%s1034_s7 + $0x10] sm:$0xff]   ;;  %v825_v31 = vld [vmem:[%s1034_s7 + $0x18] sm:$0xff]   ;;  %s1116_s29 = scalar_lea.vmem %s1152_s6, %s806_s16 }
  0x11   : > { %v911_v12 = vld [vmem:[%s1020_s22 + $0x24] ss:$8 sps:$4 sm:$0xff]   ;;  %505 = vmatprep.mubr.bf16.mxu0 %v908_v11  ;;  %v818_v28 = vunpack.c.h.bf16 %v824_v22  ;;  %v817_v29 = vunpack.c.l.bf16 %v824_v22  ;;  %v906_v32 = vld [vmem:[%s1020_s22] ss:$8 sps:$4 sm:$0xff]   ;;  %v822_v36 = vunpack.c.h.bf16 %v825_v31  ;;  %v821_v37 = vunpack.c.l.bf16 %v825_v31  ;;  %v912_v38 = vld [vmem:[%s1020_s22 + $0x14] ss:$8 sps:$4 sm:$0xff]  }
  0x12   : > { %521 = vmatprep.mubr.bf16.mxu1 %v911_v12  ;;  %v823_v15 = vld [vmem:[%s1034_s7 + $0x8] sm:$0xff]   ;;  %v808_v16 = vld [vmem:[%s1034_s7] sm:$0xff]   ;;  %v914_v39 = vld [vmem:[%s1020_s22 + $0x34] ss:$8 sps:$4 sm:$0xff]  }
  0x13   : > { %833 = vmatpush3.bf16.msra.mxu0 %v897_v7  ;;  %877 = vmatpush3.bf16.msra.mxu1 %v897_v7  ;;  %v813_v17 = vunpack.c.l.bf16 %v823_v15  ;;  %v809_v18 = vunpack.c.l.bf16 %v808_v16  ;;  %v814_v19 = vunpack.c.h.bf16 %v823_v15  ;;  %v810_v20 = vunpack.c.h.bf16 %v808_v16  ;;  %v909_v33 = vld [vmem:[%s1020_s22 + $0x20] ss:$8 sps:$4 sm:$0xff]   ;;  %v916_v42 = vld [vmem:[%s1020_s22 + $0x10] ss:$8 sps:$4 sm:$0xff]  }
  0x14   : > { %834 = vmatprep.subr.bf16.mxu0 %v898_v8  ;;  %870 = vmatprep.subr.bf16.mxu1 %v898_v8  ;;  %v554_v34 = vsel %vm538_vm0, %v818_v28, 0.0  ;;  %v551_v35 = vsel %vm538_vm0, %v817_v29, 0.0  ;;  %v560_v40 = vsel %vm538_vm0, %v822_v36, 0.0  ;;  %v557_v41 = vsel %vm538_vm0, %v821_v37, 0.0  ;;  %v917_v43 = vld [vmem:[%s1020_s22 + $0x30] ss:$8 sps:$4 sm:$0xff]  }
  0x15   : > { %v545_v24 = vsel %vm538_vm0, %v813_v17, 0.0  ;;  %v539_v25 = vsel %vm538_vm0, %v809_v18, 0.0  ;;  %v548_v26 = vsel %vm538_vm0, %v814_v19, 0.0  ;;  %v542_v27 = vsel %vm538_vm0, %v810_v20, 0.0  ;;  %v1075_v12 = vld [vmem:[%s1149_s3] ss:$0 sm:$0xff] }
  0x16   : > { %546 = vadd.xlane.f32.xlu1 %v545_v24  ;;  %540 = vadd.xlane.f32.xlu0 %v539_v25 }
  0x17   : > { %835 = vmatpush3.bf16.msra.mxu0 %v899_v9  ;;  %878 = vmatpush3.bf16.msra.mxu1 %v899_v9 }
  0x18   : > { %836 = vmatprep.subr.bf16.mxu0 %v900_v10  ;;  %871 = vmatprep.subr.bf16.mxu1 %v900_v10 }
  0x1a   : > { %549 = vadd.xlane.f32.xlu1 %v548_v26  ;;  %543 = vadd.xlane.f32.xlu0 %v542_v27 }
  0x1b   : > { %837 = vmatpush3.bf16.msra.mxu0 %v901_v13  ;;  %879 = vmatpush3.bf16.msra.mxu1 %v901_v13 }
  0x1c   : > { %838 = vmatprep.subr.bf16.mxu0 %v902_v14  ;;  %872 = vmatprep.subr.bf16.mxu1 %v902_v14 }
  0x1e   : > { %555 = vadd.xlane.f32.xlu1 %v554_v34  ;;  %552 = vadd.xlane.f32.xlu0 %v551_v35 }
  0x1f   : > { %839 = vmatpush3.bf16.msra.mxu0 %v903_v21  ;;  %880 = vmatpush3.bf16.msra.mxu1 %v903_v21 }
  0x20   : > { %840 = vmatprep.subr.bf16.mxu0 %v904_v23  ;;  %873 = vmatprep.subr.bf16.mxu1 %v904_v23 }
  0x22   : > { %561 = vadd.xlane.f32.xlu1 %v560_v40  ;;  %558 = vadd.xlane.f32.xlu0 %v557_v41 }
  0x23   : > { %841 = vmatpush3.bf16.msra.mxu0 %v905_v30  ;;  %881 = vmatpush3.bf16.msra.mxu1 %v905_v30 }
  0x26   : > { %506 = vmatmul.mubr.bf16.vlgmr.msra.gmra.mrb[0].mxu0 %v906_v32  ;;  %522 = vmatmul.mubr.bf16.vlgmr.msra.gmra.mrb[0].mxu1 %v909_v33 }
  0x27   : > { %513 = vmatprep.mubr.bf16.mxu0 %v912_v38  ;;  %529 = vmatprep.mubr.bf16.mxu1 %v914_v39 }
  0x2e   : > { %514 = vmatmul.mubr.bf16.gmra.mrb[4].mxu0 %v916_v42  ;;  %530 = vmatmul.mubr.bf16.gmra.mrb[4].mxu1 %v917_v43 }
  0xa3   : > { %v541_v44 = vpop.xlane.xlu0 %540  ;;  %v547_v45 = vpop.xlane.xlu1 %546 }
  0xa4   : > { %v579_v50 = vadd.f32 1e-08, %v541_v44  ;;  %v581_v55 = vadd.f32 1e-08, %v547_v45  ;;  %v563_v61 = vmax.f32 %v541_v44, 0.0  ;;  %v565_v4 = vmax.f32 %v547_v45, 0.0 }
  0xa6   : > { %918 = vrcp.f32 %v579_v50  ;;  %v571_v6 = vmin.f32 %v563_v61, 1.0  ;;  %v1081_v21 = vmin.f32 %v565_v4, 1.0 }
  0xa7   : > { %v544_v46 = vpop.xlane.xlu0 %543  ;;  %v550_v47 = vpop.xlane.xlu1 %549 }
  0xa8   : > { %v580_v52 = vadd.f32 1e-08, %v544_v46  ;;  %v582_v57 = vadd.f32 1e-08, %v550_v47  ;;  %v564_v1 = vmax.f32 %v544_v46, 0.0  ;;  %v566_v5 = vmax.f32 %v550_v47, 0.0 }
  0xaa   : > { %v1077_v14 = vmin.f32 %v564_v1, 1.0  ;;  %v1083_v22 = vmin.f32 %v566_v5, 1.0 }
  0xab   : > { %v553_v48 = vpop.xlane.xlu0 %552  ;;  %v556_v49 = vpop.xlane.xlu1 %555 }
  0xac   : > { %v583_v51 = vadd.f32 1e-08, %v553_v48  ;;  %v584_v53 = vadd.f32 1e-08, %v556_v49  ;;  %v567_v62 = vmax.f32 %v553_v48, 0.0  ;;  %v568_v2 = vmax.f32 %v556_v49, 0.0 }
  0xae   : > { %920 = vrcp.f32 %v583_v51  ;;  %v575_v8 = vmin.f32 %v567_v62, 1.0  ;;  %v1079_v16 = vmin.f32 %v568_v2, 1.0 }
  0xaf   : > { %v1069_v54 = vpop.xlane.xlu1 %561  ;;  %922 = vrcp.f32 %v580_v52  ;;  %v559_v56 = vpop.xlane.xlu0 %558 }
  0xb0   : > { %924 = vrcp.f32 %v584_v53  ;;  %v586_v58 = vadd.f32 1e-08, %v1069_v54  ;;  %v585_v59 = vadd.f32 1e-08, %v559_v56  ;;  %v919_v60 = vpop.eup %918  ;;  %v570_v30 = vmax.f32 %v1069_v54, 0.0 }
  0xb1   : > { %926 = vrcp.f32 %v581_v55  ;;  %v595_v7 = vmul.f32 196.0, %v919_v60  ;;  %v569_v31 = vmax.f32 %v559_v56, 0.0 }
  0xb2   : > { %928 = vrcp.f32 %v582_v57  ;;  %v1092_v47 = vmin.f32 %v570_v30, 1.0 }
  0xb3   : > { %930 = vrcp.f32 %v586_v58  ;;  %v603_v28 = vmul.f32 %v595_v7, %v571_v6  ;;  %v577_v49 = vmin.f32 %v569_v31, 1.0  ;;  %v803_v7 = vld [vmem:[%s1151_s5] ss:$0 sm:$0xff] }
  0xb4   : > { %932 = vrcp.f32 %v585_v59  ;;  %v802_v59 = vld [vmem:[%s1150_s4] ss:$0 sm:$0xff] }
  0xb8   : > { %v921_v63 = vpop.eup %920 }
  0xb9   : > { %v923_v0 = vpop.eup %922  ;;  %v599_v9 = vmul.f32 196.0, %v921_v63 }
  0xba   : > { %v925_v3 = vpop.eup %924  ;;  %v596_v15 = vmul.f32 196.0, %v923_v0 }
  0xbb   : > { %v927_v13 = vpop.eup %926  ;;  %v600_v17 = vmul.f32 196.0, %v925_v3  ;;  %v607_v29 = vmul.f32 %v599_v9, %v575_v8 }
  0xbc   : > { %v929_v20 = vpop.eup %928  ;;  %v597_v39 = vmul.f32 196.0, %v927_v13  ;;  %v604_v41 = vmul.f32 %v596_v15, %v1077_v14 }
  0xbd   : > { %v931_v27 = vpop.eup %930  ;;  %v598_v40 = vmul.f32 196.0, %v929_v20  ;;  %v608_v42 = vmul.f32 %v600_v17, %v1079_v16 }
  0xbe   : > { %v933_v34 = vpop.eup %932  ;;  %v602_v48 = vmul.f32 196.0, %v931_v27  ;;  %v605_v57 = vmul.f32 %v597_v39, %v1081_v21 }
  0xbf   : > { %v601_v50 = vmul.f32 196.0, %v933_v34  ;;  %v606_v58 = vmul.f32 %v598_v40, %v1083_v22 }
  0xc0   : > { %v610_v4 = vmul.f32 %v602_v48, %v1092_v47 }
  0xc1   : > { %v609_v5 = vmul.f32 %v601_v50, %v577_v49 }
  0xf9   : > { %v842_v10 = vpop.f32.mrb[0].mxu0  ;;  %v854_v11 = vpop.f32.mrb[0].mxu1 }
  0xfa   : > { %v843_v18 = vpop.f32.mrb[1].mxu0  ;;  %v855_v19 = vpop.f32.mrb[1].mxu1 }
  0xfb   : > { %v844_v23 = vadd.f32 %v843_v18, %v842_v10  ;;  %v856_v24 = vadd.f32 %v855_v19, %v854_v11  ;;  %v845_v25 = vpop.f32.mrb[2].mxu0  ;;  %v857_v26 = vpop.f32.mrb[2].mxu1 }
  0xfc   : > { %v846_v32 = vpop.f32.mrb[3].mxu0  ;;  %v858_v33 = vpop.f32.mrb[3].mxu1 }
  0xfd   : > { %v618_v35 = vsub.f32 %v844_v23, %v1075_v12  ;;  %v622_v36 = vsub.f32 %v856_v24, %v1075_v12  ;;  %v847_v37 = vadd.f32 %v846_v32, %v845_v25  ;;  %v859_v38 = vadd.f32 %v858_v33, %v857_v26 }
  0xff   : > { %v626_v43 = vmul.f32 %v618_v35, %v603_v28  ;;  %v630_v44 = vmul.f32 %v622_v36, %v607_v29  ;;  %v619_v45 = vsub.f32 %v847_v37, %v1075_v12  ;;  %v623_v46 = vsub.f32 %v859_v38, %v1075_v12 }
 0x101   : > { %v634_v51 = vadd.f32 %v1075_v12, %v626_v43  ;;  %v638_v52 = vadd.f32 %v1075_v12, %v630_v44  ;;  %v627_v53 = vmul.f32 %v619_v45, %v604_v41  ;;  %v631_v54 = vmul.f32 %v623_v46, %v608_v42  ;;  %v848_v55 = vpop.f32.mrb[4].mxu0  ;;  %v860_v56 = vpop.f32.mrb[4].mxu1 }
 0x102   : > { %v849_v60 = vpop.f32.mrb[5].mxu0  ;;  %v861_v61 = vpop.f32.mrb[5].mxu1 }
 0x103   : > { %v642_v62 = vmul.f32 %v634_v51, %v571_v6  ;;  %v646_v63 = vmul.f32 %v638_v52, %v575_v8  ;;  %v635_v0 = vadd.f32 %v1075_v12, %v627_v53  ;;  %v639_v1 = vadd.f32 %v1075_v12, %v631_v54  ;;  %v851_v2 = vpop.f32.mrb[6].mxu0  ;;  %v863_v3 = vpop.f32.mrb[6].mxu1 }
 0x104   : > { %v850_v9 = vadd.f32 %v849_v60, %v848_v55  ;;  %v862_v10 = vadd.f32 %v861_v61, %v860_v56  ;;  %v852_v11 = vpop.f32.mrb[7].mxu0  ;;  %v864_v13 = vpop.f32.mrb[7].mxu1 }
 0x105   : > { %v657_v6 = vmul.f32 %v802_v59, %v642_v62  ;;  %v661_v8 = vmul.f32 %v802_v59, %v646_v63  ;;  %v643_v15 = vmul.f32 %v635_v0, %v1077_v14  ;;  %v647_v17 = vmul.f32 %v639_v1, %v1079_v16 }
 0x106   : > { %v620_v18 = vsub.f32 %v850_v9, %v1075_v12  ;;  %v624_v19 = vsub.f32 %v862_v10, %v1075_v12  ;;  %v853_v20 = vadd.f32 %v852_v11, %v851_v2  ;;  %v865_v23 = vadd.f32 %v864_v13, %v863_v3 }
 0x107   : > { %v672_v24 = vadd.f32 %v803_v7, %v657_v6  ;;  %v676_v25 = vadd.f32 %v803_v7, %v661_v8  ;;  %v658_v26 = vmul.f32 %v802_v59, %v643_v15  ;;  %v662_v27 = vmul.f32 %v802_v59, %v647_v17 }
 0x108   : > { %v628_v14 = vmul.f32 %v620_v18, %v605_v57  ;;  %v632_v16 = vmul.f32 %v624_v19, %v609_v5  ;;  %v621_v28 = vsub.f32 %v853_v20, %v1075_v12  ;;  %v625_v29 = vsub.f32 %v865_v23, %v1075_v12 }
 0x109   : > { %v680_v30 = vmax.f32 %v672_v24, 0.0  ;;  %v684_v31 = vmax.f32 %v676_v25, 0.0  ;;  %v673_v32 = vadd.f32 %v803_v7, %v658_v26  ;;  %v677_v33 = vadd.f32 %v803_v7, %v662_v27 }
 0x10a   : > { %v636_v34 = vadd.f32 %v1075_v12, %v628_v14  ;;  %v640_v35 = vadd.f32 %v1075_v12, %v632_v16  ;;  %v629_v36 = vmul.f32 %v621_v28, %v606_v58  ;;  %v633_v37 = vmul.f32 %v625_v29, %v610_v4 }
 0x10b   : > { %689 = vst.msk [vmem:[%s1116_s29] sm:$0xff] %vm688_vm1, %v680_v30  ;;  %693 = vst.msk [vmem:[%s1116_s29 + $0x20] sm:$0xff] %vm688_vm1, %v684_v31  ;;  %v681_v38 = vmax.f32 %v673_v32, 0.0  ;;  %v685_v39 = vmax.f32 %v677_v33, 0.0 }
 0x10c   : > { %v644_v40 = vmul.f32 %v636_v34, %v1081_v21  ;;  %v648_v41 = vmul.f32 %v640_v35, %v577_v49  ;;  %v637_v42 = vadd.f32 %v1075_v12, %v629_v36  ;;  %v641_v43 = vadd.f32 %v1075_v12, %v633_v37 }
 0x10d   : > { %690 = vst.msk [vmem:[%s1116_s29 + $0x8] sm:$0xff] %vm688_vm1, %v681_v38  ;;  %694 = vst.msk [vmem:[%s1116_s29 + $0x28] sm:$0xff] %vm688_vm1, %v685_v39 }
 0x10e   : > { %v659_v44 = vmul.f32 %v802_v59, %v644_v40  ;;  %v663_v45 = vmul.f32 %v802_v59, %v648_v41  ;;  %v645_v46 = vmul.f32 %v637_v42, %v1083_v22  ;;  %v649_v48 = vmul.f32 %v641_v43, %v1092_v47 }
 0x110   : > { %v674_v21 = vadd.f32 %v803_v7, %v659_v44  ;;  %v678_v49 = vadd.f32 %v803_v7, %v663_v45  ;;  %v660_v50 = vmul.f32 %v802_v59, %v645_v46  ;;  %v664_v51 = vmul.f32 %v802_v59, %v649_v48 }
 0x112   : > { %v682_v52 = vmax.f32 %v674_v21, 0.0  ;;  %v686_v53 = vmax.f32 %v678_v49, 0.0  ;;  %v675_v12 = vadd.f32 %v803_v7, %v660_v50  ;;  %v679_v54 = vadd.f32 %v803_v7, %v664_v51 }
 0x114   : > { %691 = vst.msk [vmem:[%s1116_s29 + $0x10] sm:$0xff] %vm688_vm1, %v682_v52  ;;  %695 = vst.msk [vmem:[%s1116_s29 + $0x30] sm:$0xff] %vm688_vm1, %v686_v53  ;;  %v683_v55 = vmax.f32 %v675_v12, 0.0  ;;  %v687_v56 = vmax.f32 %v679_v54, 0.0 }
 0x116   : > { %692 = vst.msk [vmem:[%s1116_s29 + $0x18] sm:$0xff] %vm688_vm1, %v683_v55  ;;  %696 = vst.msk [vmem:[%s1116_s29 + $0x38] sm:$0xff] %vm688_vm1, %v687_v56 }
 0x117 PF: > { %s16_s21 = sadd.s32 1, %s940_s21  }
 0x118   : > { %p13_p4 = scmp.ge.s32.totalorder %s16_s21, 4  }
 0x11a   :  { %15 = sbr.rel (!%p13_p4) target bundleno = 1 (0x1), region = 77 }

// kernel: pconv_encoder_decoder_forward.7
= control target key start
LH: loop header
LB: loop body
LE: loop exit
PB: predicated region body
PF: predicated region fallthrough
CT: control target
= control target key end

     0   :  { %s713_s21 = smov 0   ;;  %s795_s0 = inlined_call_operand.vmem [shape: bf16[32,256], index: 0, kind: input, shape index: {}]   ;;  %s796_s1 = inlined_call_operand.vmem [shape: bf16[32,25], index: 1, kind: input, shape index: {}]   ;;  %s797_s2 = inlined_call_operand.vmem [shape: bf16[256,16], index: 2, kind: input, shape index: {}]   ;;  %s798_s3 = inlined_call_operand.vmem [shape: f32[1,16], index: 3, kind: input, shape index: {}, may-alias: {3,5}]   ;;  %s799_s4 = inlined_call_operand.vmem [shape: f32[1,16], index: 4, kind: input, shape index: {}]   ;;  %s800_s5 = inlined_call_operand.vmem [shape: f32[1,16], index: 5, kind: input, shape index: {}, may-alias: {3,5}]   ;;  %s801_s6 = inlined_call_operand.vmem [shape: f32[32,16], index: 6, kind: output, shape index: {}]  }
   0x1 LB: > { %s578_s3 = sadd.s32 4294967295, %s676_s21   ;;  %p582_p0 = scmp.ge.s32.totalorder %s676_s21, 1  ;;  %s676_s21 = sphi %s713_s21, %s16_s21  }
   0x2   : > { %p225_p1 = scmp.lt.s32.totalorder %s676_s21, 3 }
   0x4   : > { %p226_p2 = pnand %p582_p0, %p225_p1 }
   0x5   : > { %v647_v0 = vld [vmem:[%s797_s2 + $0x40] sm:$0xff] (!%p226_p2)   ;;  %s583_s24 = sshll.u32 (!%p226_p2), %s578_s3, 1  ;;  %v649_v2 = vld [vmem:[%s797_s2 + $0x48] sm:$0xff] (!%p226_p2)   ;;  %v651_v4 = vld [vmem:[%s797_s2 + $0x50] sm:$0xff] (!%p226_p2)   ;;  %vm466_vm0 = vcmask (!%p226_p2), 203776   ;;  %vm507_vm1 = vcmask (!%p226_p2), 130048  }
   0x6   : > { %229 = sbr.rel (%p226_p2) target bundleno = 264 (0x108), region = 44  ;;  %v648_v1 = vld [vmem:[%s797_s2] sm:$0xff] (!%p226_p2)   ;;  %617 = vmatprep.subr.bf16.mxu0 (!%p226_p2), %v647_v0  ;;  %p262_p3 = scmp.lt.s32.totalorder (!%p226_p2), %s583_s24, 3  ;;  %v650_v3 = vld [vmem:[%s797_s2 + $0x8] sm:$0xff] (!%p226_p2)   ;;  %v652_v5 = vld [vmem:[%s797_s2 + $0x10] sm:$0xff] (!%p226_p2)  }
   0x7   : > { %618 = vmatpush3.bf16.msra.mxu0 (!%p226_p2), %v648_v1  ;;  %v653_v6 = vld [vmem:[%s797_s2 + $0x58] sm:$0xff] (!%p226_p2)   ;;  %v655_v8 = vld [vmem:[%s797_s2 + $0x60] sm:$0xff] (!%p226_p2)   ;;  %v657_v10 = vld [vmem:[%s797_s2 + $0x68] sm:$0xff] (!%p226_p2)  }
   0x8   : > { %619 = vmatprep.subr.bf16.mxu0 (!%p226_p2), %v649_v2  ;;  %v654_v7 = vld [vmem:[%s797_s2 + $0x18] sm:$0xff] (!%p226_p2)   ;;  %v656_v9 = vld [vmem:[%s797_s2 + $0x20] sm:$0xff] (!%p226_p2)   ;;  %v658_v15 = vld [vmem:[%s797_s2 + $0x28] sm:$0xff] (!%p226_p2)  }
   0x9   : > { %v659_v16 = vld [vmem:[%s797_s2 + $0x70] sm:$0xff] (!%p226_p2)   ;;  %v661_v20 = vld [vmem:[%s797_s2 + $0x78] sm:$0xff] (!%p226_p2)   ;;  %v608_v40 = vld [vmem:[%s799_s4] ss:$0 sm:$0xff] (!%p226_p2) }
   0xa   : > { %v660_v19 = vld [vmem:[%s797_s2 + $0x30] sm:$0xff] (!%p226_p2)   ;;  %v662_v21 = vld [vmem:[%s797_s2 + $0x38] sm:$0xff] (!%p226_p2)   ;;  %v609_v45 = vld [vmem:[%s800_s5] ss:$0 sm:$0xff] (!%p226_p2) }
   0xb   : > { %620 = vmatpush3.bf16.msra.mxu0 (!%p226_p2), %v650_v3 }
   0xc   : > { %621 = vmatprep.subr.bf16.mxu0 (!%p226_p2), %v651_v4 }
   0xd   : > { %s803_s24 = smov (!%p262_p3, %s583_s24), 3 }
   0xe   : > { %s612_s13 = sshll.u32 %s803_s24, 3  ;;  %s587_s16 = sshll.u32 %s803_s24, 2 }
   0xf   : > { %622 = vmatpush3.bf16.msra.mxu0 %v652_v5  ;;  %s266_s3 = scalar_lea.vmem %s795_s0, %s612_s13  ;;  %s272_s25 = scalar_lea.vmem %s796_s1, %s587_s16 }
  0x10   : > { %623 = vmatprep.subr.bf16.mxu0 %v653_v6  ;;  %v665_v11 = vld [vmem:[%s266_s3 + $0x4] ss:$8 sps:$4 sm:$0xff]   ;;  %v663_v22 = vld [vmem:[%s266_s3] ss:$8 sps:$4 sm:$0xff]   ;;  %s278_s23 = scalar_lea.vmem %s801_s6, %s612_s13 }
  0x11   : > { %v614_v12 = vld [vmem:[%s272_s25] sm:$0xff]   ;;  %457 = vmatprep.mubr.bf16.mxu0 %v665_v11 }
  0x12   : > { %v615_v13 = vunpack.c.l.bf16 %v614_v12  ;;  %v616_v14 = vunpack.c.h.bf16 %v614_v12 }
  0x13   : > { %624 = vmatpush3.bf16.msra.mxu0 %v654_v7 }
  0x14   : > { %625 = vmatprep.subr.bf16.mxu0 %v655_v8  ;;  %v467_v17 = vsel %vm466_vm0, %v615_v13, 0.0  ;;  %v470_v18 = vsel %vm466_vm0, %v616_v14, 0.0 }
  0x15   : > { %468 = vadd.xlane.f32.xlu0 %v467_v17 }
  0x17   : > { %626 = vmatpush3.bf16.msra.mxu0 %v656_v9 }
  0x18   : > { %627 = vmatprep.subr.bf16.mxu0 %v657_v10 }
  0x19   : > { %471 = vadd.xlane.f32.xlu0 %v470_v18 }
  0x1b   : > { %628 = vmatpush3.bf16.msra.mxu0 %v658_v15 }
  0x1c   : > { %629 = vmatprep.subr.bf16.mxu0 %v659_v16 }
  0x1f   : > { %630 = vmatpush3.bf16.msra.mxu0 %v660_v19 }
  0x20   : > { %631 = vmatprep.subr.bf16.mxu0 %v661_v20 }
  0x23   : > { %632 = vmatpush3.bf16.msra.mxu0 %v662_v21 }
  0x26   : > { %458 = vmatmul.mubr.bf16.vlgmr.msra.gmra.mrb[0].mxu0 %v663_v22 }
  0xa2   : > { %v469_v23 = vpop.xlane.xlu0 %468 }
  0xa3   : > { %v477_v25 = vadd.f32 1e-08, %v469_v23  ;;  %v473_v27 = vmax.f32 %v469_v23, 0.0 }
  0xa5   : > { %666 = vrcp.f32 %v477_v25  ;;  %v475_v31 = vmin.f32 %v473_v27, 1.0 }
  0xa6   : > { %v472_v24 = vpop.xlane.xlu0 %471 }
  0xa7   : > { %v478_v26 = vadd.f32 1e-08, %v472_v24  ;;  %v474_v29 = vmax.f32 %v472_v24, 0.0 }
  0xa9   : > { %668 = vrcp.f32 %v478_v26  ;;  %v476_v33 = vmin.f32 %v474_v29, 1.0 }
  0xaf   : > { %v667_v28 = vpop.eup %666 }
  0xb0   : > { %v481_v32 = vmul.f32 200.0, %v667_v28 }
  0xb2   : > { %v483_v37 = vmul.f32 %v481_v32, %v475_v31 }
  0xb3   : > { %v669_v30 = vpop.eup %668 }
  0xb4   : > { %v482_v34 = vmul.f32 200.0, %v669_v30 }
  0xb6   : > { %v484_v42 = vmul.f32 %v482_v34, %v476_v33 }
  0xf9   : > { %v633_v35 = vpop.f32.mrb[0].mxu0 }
  0xfa   : > { %v634_v36 = vpop.f32.mrb[1].mxu0 }
  0xfb   : > { %v635_v38 = vadd.f32 %v634_v36, %v633_v35  ;;  %v636_v39 = vpop.f32.mrb[2].mxu0 }
  0xfc   : > { %v637_v41 = vpop.f32.mrb[3].mxu0 }
  0xfd   : > { %v485_v43 = vmul.f32 %v635_v38, %v483_v37  ;;  %v638_v44 = vadd.f32 %v637_v41, %v636_v39 }
  0xff   : > { %v494_v46 = vmul.f32 %v608_v40, %v485_v43  ;;  %v486_v47 = vmul.f32 %v638_v44, %v484_v42 }
 0x101   : > { %v503_v48 = vadd.f32 %v609_v45, %v494_v46  ;;  %v495_v49 = vmul.f32 %v608_v40, %v486_v47 }
 0x103   : > { %v505_v50 = vmax.f32 %v503_v48, 0.0  ;;  %v504_v51 = vadd.f32 %v609_v45, %v495_v49 }
 0x105   : > { %508 = vst.msk [vmem:[%s278_s23] sm:$0xff] %vm507_vm1, %v505_v50  ;;  %v506_v52 = vmax.f32 %v504_v51, 0.0 }
 0x107   : > { %509 = vst.msk [vmem:[%s278_s23 + $0x8] sm:$0xff] %vm507_vm1, %v506_v52 }
 0x108 PF: > { %s16_s21 = sadd.s32 1, %s676_s21  }
 0x109   : > { %p13_p4 = scmp.ge.s32.totalorder %s16_s21, 4  }
 0x10b   :  { %15 = sbr.rel (!%p13_p4) target bundleno = 1 (0x1), region = 77 }

// kernel: pconv_encoder_decoder_forward.8
= control target key start
LH: loop header
LB: loop body
LE: loop exit
PB: predicated region body
PF: predicated region fallthrough
CT: control target
= control target key end

     0   :  { %vm209_vm0 = vcmask 72704   ;;  %vm250_vm1 = vcmask 130048   ;;  %s430_s2 = inlined_call_operand.vmem [shape: bf16[256,16], index: 2, kind: input, shape index: {}]   ;;  %s431_s3 = inlined_call_operand.vmem [shape: f32[1,16], index: 3, kind: input, shape index: {}, may-alias: {3,5}]   ;;  %s432_s0 = inlined_call_operand.vmem [shape: bf16[16,256], index: 0, kind: input, shape index: {}]   ;;  %s433_s1 = inlined_call_operand.vmem [shape: bf16[16,9], index: 1, kind: input, shape index: {}]   ;;  %s434_s4 = inlined_call_operand.vmem [shape: f32[1,16], index: 4, kind: input, shape index: {}]   ;;  %s435_s5 = inlined_call_operand.vmem [shape: f32[1,16], index: 5, kind: input, shape index: {}, may-alias: {3,5}]   ;;  %s436_s6 = inlined_call_operand.vmem [shape: f32[16,16], index: 6, kind: output, shape index: {}]  }
   0x1   :  { %v303_v0 = vld [vmem:[%s430_s2 + $0x40] sm:$0xff]   ;;  %v305_v2 = vld [vmem:[%s430_s2 + $0x48] sm:$0xff]   ;;  %v307_v4 = vld [vmem:[%s430_s2 + $0x50] sm:$0xff]  }
   0x2   :  { %v304_v1 = vld [vmem:[%s430_s2] sm:$0xff]   ;;  %281 = vmatprep.subr.bf16.mxu0 %v303_v0  ;;  %v306_v3 = vld [vmem:[%s430_s2 + $0x8] sm:$0xff]   ;;  %v308_v5 = vld [vmem:[%s430_s2 + $0x10] sm:$0xff]  }
   0x3   :  { %282 = vmatpush3.bf16.msra.mxu0 %v304_v1  ;;  %v309_v6 = vld [vmem:[%s430_s2 + $0x58] sm:$0xff]   ;;  %v311_v8 = vld [vmem:[%s430_s2 + $0x60] sm:$0xff]   ;;  %v313_v10 = vld [vmem:[%s430_s2 + $0x68] sm:$0xff]  }
   0x4   :  { %283 = vmatprep.subr.bf16.mxu0 %v305_v2  ;;  %v310_v7 = vld [vmem:[%s430_s2 + $0x18] sm:$0xff]   ;;  %v312_v9 = vld [vmem:[%s430_s2 + $0x20] sm:$0xff]   ;;  %v314_v15 = vld [vmem:[%s430_s2 + $0x28] sm:$0xff]  }
   0x5   :  { %v321_v11 = vld [vmem:[%s432_s0 + $0x4] ss:$8 sps:$4 sm:$0xff]   ;;  %v315_v16 = vld [vmem:[%s430_s2 + $0x70] sm:$0xff]   ;;  %v317_v20 = vld [vmem:[%s430_s2 + $0x78] sm:$0xff]  }
   0x6   :  { %v278_v12 = vld [vmem:[%s433_s1] sm:$0xff]   ;;  %200 = vmatprep.mubr.bf16.mxu0 %v321_v11  ;;  %v316_v19 = vld [vmem:[%s430_s2 + $0x30] sm:$0xff]   ;;  %v318_v21 = vld [vmem:[%s430_s2 + $0x38] sm:$0xff]  }
   0x7   :  { %284 = vmatpush3.bf16.msra.mxu0 %v306_v3  ;;  %v279_v13 = vunpack.c.l.bf16 %v278_v12  ;;  %v280_v14 = vunpack.c.h.bf16 %v278_v12  ;;  %v319_v22 = vld [vmem:[%s432_s0] ss:$8 sps:$4 sm:$0xff]  }
   0x8   :  { %285 = vmatprep.subr.bf16.mxu0 %v307_v4  ;;  %v275_v40 = vld [vmem:[%s434_s4] ss:$0 sm:$0xff] }
   0x9   :  { %v210_v17 = vsel %vm209_vm0, %v279_v13, 0.0  ;;  %v213_v18 = vsel %vm209_vm0, %v280_v14, 0.0  ;;  %v276_v45 = vld [vmem:[%s435_s5] ss:$0 sm:$0xff] }
   0xa   :  { %211 = vadd.xlane.f32.xlu0 %v210_v17 }
   0xb   :  { %286 = vmatpush3.bf16.msra.mxu0 %v308_v5 }
   0xc   :  { %287 = vmatprep.subr.bf16.mxu0 %v309_v6 }
   0xe   :  { %214 = vadd.xlane.f32.xlu0 %v213_v18 }
   0xf   :  { %288 = vmatpush3.bf16.msra.mxu0 %v310_v7 }
  0x10   :  { %289 = vmatprep.subr.bf16.mxu0 %v311_v8 }
  0x13   :  { %290 = vmatpush3.bf16.msra.mxu0 %v312_v9 }
  0x14   :  { %291 = vmatprep.subr.bf16.mxu0 %v313_v10 }
  0x17   :  { %292 = vmatpush3.bf16.msra.mxu0 %v314_v15 }
  0x18   :  { %293 = vmatprep.subr.bf16.mxu0 %v315_v16 }
  0x1b   :  { %294 = vmatpush3.bf16.msra.mxu0 %v316_v19 }
  0x1c   :  { %295 = vmatprep.subr.bf16.mxu0 %v317_v20 }
  0x1f   :  { %296 = vmatpush3.bf16.msra.mxu0 %v318_v21 }
  0x22   :  { %201 = vmatmul.mubr.bf16.vlgmr.msra.gmra.mrb[0].mxu0 %v319_v22 }
  0x97   :  { %v212_v23 = vpop.xlane.xlu0 %211 }
  0x98   :  { %v220_v25 = vadd.f32 1e-08, %v212_v23  ;;  %v216_v27 = vmax.f32 %v212_v23, 0.0 }
  0x9a   :  { %322 = vrcp.f32 %v220_v25  ;;  %v218_v31 = vmin.f32 %v216_v27, 1.0 }
  0x9b   :  { %v215_v24 = vpop.xlane.xlu0 %214 }
  0x9c   :  { %v221_v26 = vadd.f32 1e-08, %v215_v24  ;;  %v217_v29 = vmax.f32 %v215_v24, 0.0 }
  0x9e   :  { %324 = vrcp.f32 %v221_v26  ;;  %v219_v33 = vmin.f32 %v217_v29, 1.0 }
  0xa4   :  { %v323_v28 = vpop.eup %322 }
  0xa5   :  { %v224_v32 = vmul.f32 144.0, %v323_v28 }
  0xa7   :  { %v226_v37 = vmul.f32 %v224_v32, %v218_v31 }
  0xa8   :  { %v325_v30 = vpop.eup %324 }
  0xa9   :  { %v225_v34 = vmul.f32 144.0, %v325_v30 }
  0xab   :  { %v227_v42 = vmul.f32 %v225_v34, %v219_v33 }
  0xf5   :  { %v297_v35 = vpop.f32.mrb[0].mxu0 }
  0xf6   :  { %v298_v36 = vpop.f32.mrb[1].mxu0 }
  0xf7   :  { %v299_v38 = vadd.f32 %v298_v36, %v297_v35  ;;  %v300_v39 = vpop.f32.mrb[2].mxu0 }
  0xf8   :  { %v301_v41 = vpop.f32.mrb[3].mxu0 }
  0xf9   :  { %v228_v43 = vmul.f32 %v299_v38, %v226_v37  ;;  %v302_v44 = vadd.f32 %v301_v41, %v300_v39 }
  0xfb   :  { %v237_v46 = vmul.f32 %v275_v40, %v228_v43  ;;  %v229_v47 = vmul.f32 %v302_v44, %v227_v42 }
  0xfd   :  { %v246_v48 = vadd.f32 %v276_v45, %v237_v46  ;;  %v238_v49 = vmul.f32 %v275_v40, %v229_v47 }
  0xff   :  { %v248_v50 = vmax.f32 %v246_v48, 0.0  ;;  %v247_v51 = vadd.f32 %v276_v45, %v238_v49 }
 0x101   :  { %251 = vst.msk [vmem:[%s436_s6] sm:$0xff] %vm250_vm1, %v248_v50  ;;  %v249_v52 = vmax.f32 %v247_v51, 0.0 }
 0x103   :  { %252 = vst.msk [vmem:[%s436_s6 + $0x8] sm:$0xff] %vm250_vm1, %v249_v52 }

// kernel: pconv_encoder_decoder_forward.9
= control target key start
LH: loop header
LB: loop body
LE: loop exit
PB: predicated region body
PF: predicated region fallthrough
CT: control target
= control target key end

     0   :  { %s880_s21 = smov 0   ;;  %s992_s0 = inlined_call_operand.vmem [shape: bf16[32,384], index: 0, kind: input, shape index: {}]   ;;  %s993_s1 = inlined_call_operand.vmem [shape: bf16[32,9], index: 1, kind: input, shape index: {}]   ;;  %s994_s2 = inlined_call_operand.vmem [shape: bf16[384,16], index: 2, kind: input, shape index: {}]   ;;  %s995_s3 = inlined_call_operand.vmem [shape: f32[1,16], index: 3, kind: input, shape index: {}, may-alias: {3,5}]   ;;  %s996_s4 = inlined_call_operand.vmem [shape: f32[1,16], index: 4, kind: input, shape index: {}]   ;;  %s997_s5 = inlined_call_operand.vmem [shape: f32[1,16], index: 5, kind: input, shape index: {}, may-alias: {3,5}]   ;;  %s998_s6 = inlined_call_operand.vmem [shape: f32[32,16], index: 6, kind: output, shape index: {}]  }
   0x1 LB: > { %s695_s3 = sadd.s32 4294967295, %s841_s21   ;;  %p699_p0 = scmp.ge.s32.totalorder %s841_s21, 1  ;;  %s841_s21 = sphi %s880_s21, %s16_s21  }
   0x2   : > { %p225_p1 = scmp.lt.s32.totalorder %s841_s21, 3 }
   0x4   : > { %p226_p2 = pnand %p699_p0, %p225_p1 }
   0x5   : > { %v803_v0 = vld [vmem:[%s994_s2 + $0x40] sm:$0xff] (!%p226_p2)   ;;  %v843_v1 = vmov (!%p226_p2), 0.0   ;;  %v806_v4 = vld [vmem:[%s994_s2 + $0x48] sm:$0xff] (!%p226_p2)   ;;  %vm844_vm0 = vmmov (!%p226_p2), 0   ;;  %v809_v7 = vld [vmem:[%s994_s2 + $0x50] sm:$0xff] (!%p226_p2)   ;;  %s700_s14 = sshll.u32 (!%p226_p2), %s695_s3, 1 }
   0x6   : > { %229 = sbr.rel (%p226_p2) target bundleno = 267 (0x10b), region = 44  ;;  %772 = vmatprep.subr.bf16.mxu1 (!%p226_p2), %v843_v1  ;;  %v804_v2 = vld [vmem:[%s994_s2] sm:$0xff] (!%p226_p2)   ;;  %741 = vmatprep.subr.bf16.mxu0 (!%p226_p2), %v803_v0  ;;  %v807_v5 = vld [vmem:[%s994_s2 + $0x8] sm:$0xff] (!%p226_p2)   ;;  %v810_v8 = vld [vmem:[%s994_s2 + $0x10] sm:$0xff] (!%p226_p2)   ;;  %p262_p3 = scmp.lt.s32.totalorder (!%p226_p2), %s700_s14, 3  ;;  %vm579_vm1 = vcmask (!%p226_p2), 72704  }
   0x7   : > { %v805_v3 = vld [vmem:[%s994_s2 + $0x80] sm:$0xff] (!%p226_p2)   ;;  %742 = vmatpush3.bf16.msra.mxu0 (!%p226_p2), %v804_v2  ;;  %788 = vmatprep.mubr.msk.bf16.mxu1 (!%p226_p2), %vm844_vm0, %v843_v1  ;;  %v808_v6 = vld [vmem:[%s994_s2 + $0x88] sm:$0xff] (!%p226_p2)   ;;  %v811_v9 = vld [vmem:[%s994_s2 + $0x90] sm:$0xff] (!%p226_p2)   ;;  %vm624_vm3 = vcmask (!%p226_p2), 130048  }
   0x8   : > { %773 = vmatpush3.bf16.msra.mxu1 (!%p226_p2), %v805_v3  ;;  %743 = vmatprep.subr.bf16.mxu0 (!%p226_p2), %v806_v4  ;;  %v812_v10 = vld [vmem:[%s994_s2 + $0x58] sm:$0xff] (!%p226_p2)   ;;  %v815_v13 = vld [vmem:[%s994_s2 + $0x60] sm:$0xff] (!%p226_p2)   ;;  %v818_v16 = vld [vmem:[%s994_s2 + $0x68] sm:$0xff] (!%p226_p2)  }
   0x9   : > { %774 = vmatprep.subr.bf16.mxu1 (!%p226_p2), %v843_v1  ;;  %v813_v11 = vld [vmem:[%s994_s2 + $0x18] sm:$0xff] (!%p226_p2)   ;;  %v816_v14 = vld [vmem:[%s994_s2 + $0x20] sm:$0xff] (!%p226_p2)   ;;  %v819_v17 = vld [vmem:[%s994_s2 + $0x28] sm:$0xff] (!%p226_p2)  }
   0xa   : > { %v814_v12 = vld [vmem:[%s994_s2 + $0x98] sm:$0xff] (!%p226_p2)   ;;  %v817_v15 = vld [vmem:[%s994_s2 + $0xa0] sm:$0xff] (!%p226_p2)   ;;  %v820_v18 = vld [vmem:[%s994_s2 + $0xa8] sm:$0xff] (!%p226_p2)  }
   0xb   : > { %744 = vmatpush3.bf16.msra.mxu0 (!%p226_p2), %v807_v5  ;;  %v821_v19 = vld [vmem:[%s994_s2 + $0x70] sm:$0xff] (!%p226_p2)   ;;  %v824_v22 = vld [vmem:[%s994_s2 + $0x78] sm:$0xff] (!%p226_p2)   ;;  %v733_v57 = vld [vmem:[%s996_s4] ss:$0 sm:$0xff] (!%p226_p2) }
   0xc   : > { %775 = vmatpush3.bf16.msra.mxu1 (!%p226_p2), %v808_v6  ;;  %745 = vmatprep.subr.bf16.mxu0 (!%p226_p2), %v809_v7  ;;  %v822_v20 = vld [vmem:[%s994_s2 + $0x30] sm:$0xff] (!%p226_p2)   ;;  %v825_v25 = vld [vmem:[%s994_s2 + $0x38] sm:$0xff] (!%p226_p2)   ;;  %v734_v61 = vld [vmem:[%s997_s5] ss:$0 sm:$0xff] (!%p226_p2) }
   0xd   : > { %776 = vmatprep.subr.bf16.mxu1 %v843_v1  ;;  %s1000_s14 = smov (!%p262_p3, %s700_s14), 3  ;;  %v823_v21 = vld [vmem:[%s994_s2 + $0xb0] sm:$0xff]   ;;  %v826_v28 = vld [vmem:[%s994_s2 + $0xb8] sm:$0xff]  }
   0xe   : > { %s792_s9 = smul.u32 12, %s1000_s14  ;;  %s703_s15 = sshll.u32 %s1000_s14, 2 }
   0xf   : > { %746 = vmatpush3.bf16.msra.mxu0 %v810_v8  ;;  %s272_s25 = scalar_lea.vmem %s993_s1, %s703_s15  ;;  %s705_s12 = sshll.u32 %s1000_s14, 3 }
  0x10   : > { %777 = vmatpush3.bf16.msra.mxu1 %v811_v9  ;;  %747 = vmatprep.subr.bf16.mxu0 %v812_v10  ;;  %s266_s20 = scalar_lea.vmem %s992_s0, %s792_s9  ;;  %v738_v24 = vld [vmem:[%s272_s25] sm:$0xff]   ;;  %s278_s16 = scalar_lea.vmem %s998_s6, %s705_s12 }
  0x11   : > { %778 = vmatprep.subr.bf16.mxu1 %v843_v1  ;;  %v829_v23 = vld [vmem:[%s266_s20 + $0x4] ss:$12 sps:$4 sm:$0xff]   ;;  %v739_v26 = vunpack.c.l.bf16 %v738_v24  ;;  %v740_v27 = vunpack.c.h.bf16 %v738_v24  ;;  %v827_v30 = vld [vmem:[%s266_s20] ss:$12 sps:$4 sm:$0xff]   ;;  %v830_v31 = vld [vmem:[%s266_s20 + $0x8] ss:$12 sps:$4 sm:$0xff]  }
  0x12   : > { %529 = vmatprep.mubr.bf16.mxu0 %v829_v23 }
  0x13   : > { %748 = vmatpush3.bf16.msra.mxu0 %v813_v11  ;;  %v580_v29 = vsel %vm579_vm1, %v739_v26, 0.0  ;;  %v583_v32 = vsel %vm579_vm1, %v740_v27, 0.0 }
  0x14   : > { %779 = vmatpush3.bf16.msra.mxu1 %v814_v12  ;;  %749 = vmatprep.subr.bf16.mxu0 %v815_v13 }
  0x15   : > { %780 = vmatprep.subr.bf16.mxu1 %v843_v1  ;;  %581 = vadd.xlane.f32.xlu0 %v580_v29 }
  0x17   : > { %750 = vmatpush3.bf16.msra.mxu0 %v816_v14 }
  0x18   : > { %781 = vmatpush3.bf16.msra.mxu1 %v817_v15  ;;  %751 = vmatprep.subr.bf16.mxu0 %v818_v16 }
  0x19   : > { %782 = vmatprep.subr.bf16.mxu1 %v843_v1  ;;  %584 = vadd.xlane.f32.xlu0 %v583_v32 }
  0x1b   : > { %752 = vmatpush3.bf16.msra.mxu0 %v819_v17 }
  0x1c   : > { %783 = vmatpush3.bf16.msra.mxu1 %v820_v18  ;;  %753 = vmatprep.subr.bf16.mxu0 %v821_v19 }
  0x1d   : > { %784 = vmatprep.subr.bf16.mxu1 %v843_v1 }
  0x1f   : > { %754 = vmatpush3.bf16.msra.mxu0 %v822_v20 }
  0x20   : > { %785 = vmatpush3.bf16.msra.mxu1 %v823_v21  ;;  %755 = vmatprep.subr.bf16.mxu0 %v824_v22 }
  0x21   : > { %786 = vmatprep.subr.bf16.mxu1 %v843_v1 }
  0x23   : > { %756 = vmatpush3.bf16.msra.mxu0 %v825_v25 }
  0x24   : > { %787 = vmatpush3.bf16.msra.mxu1 %v826_v28 }
  0x26   : > { %530 = vmatmul.mubr.bf16.vlgmr.msra.gmra.mrb[0].mxu0 %v827_v30 }
  0x27   : > { %789 = vmatmul.mubr.bf16.vlgmr.msra.gmra.mrb[0].mxu1 %v830_v31 }
  0xa2   : > { %v582_v33 = vpop.xlane.xlu0 %581 }
  0xa3   : > { %v590_v35 = vadd.f32 1e-08, %v582_v33  ;;  %v586_v37 = vmax.f32 %v582_v33, 0.0 }
  0xa5   : > { %831 = vrcp.f32 %v590_v35  ;;  %v588_v41 = vmin.f32 %v586_v37, 1.0 }
  0xa6   : > { %v585_v34 = vpop.xlane.xlu0 %584 }
  0xa7   : > { %v591_v36 = vadd.f32 1e-08, %v585_v34  ;;  %v587_v39 = vmax.f32 %v585_v34, 0.0 }
  0xa9   : > { %833 = vrcp.f32 %v591_v36  ;;  %v589_v46 = vmin.f32 %v587_v39, 1.0 }
  0xaf   : > { %v832_v38 = vpop.eup %831 }
  0xb0   : > { %v594_v42 = vmul.f32 288.0, %v832_v38 }
  0xb2   : > { %v596_v53 = vmul.f32 %v594_v42, %v588_v41 }
  0xb3   : > { %v834_v40 = vpop.eup %833 }
  0xb4   : > { %v595_v47 = vmul.f32 288.0, %v834_v40 }
  0xb6   : > { %v597_v58 = vmul.f32 %v595_v47, %v589_v46 }
  0xf9   : > { %v757_v43 = vpop.f32.mrb[0].mxu0 }
  0xfa   : > { %v572_v44 = vpop.f32.mrb[0].mxu1  ;;  %v758_v45 = vpop.f32.mrb[1].mxu0 }
  0xfb   : > { %v759_v48 = vadd.f32 %v758_v45, %v757_v43  ;;  %v790_v49 = vpop.f32.mrb[1].mxu1  ;;  %v760_v50 = vpop.f32.mrb[2].mxu0 }
  0xfc   : > { %v575_v51 = vpop.f32.mrb[2].mxu1  ;;  %v761_v52 = vpop.f32.mrb[3].mxu0 }
  0xfd   : > { %v573_v54 = vadd.f32 %v759_v48, %v572_v44  ;;  %v762_v55 = vadd.f32 %v761_v52, %v760_v50  ;;  %v791_v56 = vpop.f32.mrb[3].mxu1 }
  0xff   : > { %v598_v59 = vmul.f32 %v596_v53, %v573_v54  ;;  %v576_v60 = vadd.f32 %v762_v55, %v575_v51 }
 0x101   : > { %v607_v62 = vmul.f32 %v733_v57, %v598_v59  ;;  %v599_v63 = vmul.f32 %v597_v58, %v576_v60 }
 0x103   : > { %v616_v0 = vadd.f32 %v734_v61, %v607_v62  ;;  %v608_v1 = vmul.f32 %v733_v57, %v599_v63 }
 0x105   : > { %vm618_vm2 = vcmp.ge.f32.partialorder %v616_v0, 0.0  ;;  %v620_v2 = vmul.f32 0.2, %v616_v0  ;;  %v617_v3 = vadd.f32 %v734_v61, %v608_v1 }
 0x107   : > { %v622_v4 = vsel %vm618_vm2, %v616_v0, %v620_v2  ;;  %vm619_vm4 = vcmp.ge.f32.partialorder %v617_v3, 0.0  ;;  %v621_v5 = vmul.f32 0.2, %v617_v3 }
 0x108   : > { %625 = vst.msk [vmem:[%s278_s16] sm:$0xff] %vm624_vm3, %v622_v4 }
 0x109   : > { %v623_v6 = vsel %vm619_vm4, %v617_v3, %v621_v5 }
 0x10a   : > { %626 = vst.msk [vmem:[%s278_s16 + $0x8] sm:$0xff] %vm624_vm3, %v623_v6 }
 0x10b PF: > { %s16_s21 = sadd.s32 1, %s841_s21  }
 0x10c   : > { %p13_p4 = scmp.ge.s32.totalorder %s16_s21, 4  }
 0x10e   :  { %15 = sbr.rel (!%p13_p4) target bundleno = 1 (0x1), region = 77 }

// kernel: pconv_encoder_decoder_forward.10
= control target key start
LH: loop header
LB: loop body
LE: loop exit
PB: predicated region body
PF: predicated region fallthrough
CT: control target
= control target key end

     0   :  { %s961_s21 = smov 0   ;;  %s1113_s0 = inlined_call_operand.vmem [shape: bf16[128,256], index: 0, kind: input, shape index: {}]   ;;  %s1114_s1 = inlined_call_operand.vmem [shape: bf16[128,9], index: 1, kind: input, shape index: {}]   ;;  %s1115_s2 = inlined_call_operand.vmem [shape: bf16[256,8], index: 2, kind: input, shape index: {}]   ;;  %s1116_s3 = inlined_call_operand.vmem [shape: f32[1,8], index: 3, kind: input, shape index: {}, may-alias: {3,5}]   ;;  %s1117_s4 = inlined_call_operand.vmem [shape: f32[1,8], index: 4, kind: input, shape index: {}]   ;;  %s1118_s5 = inlined_call_operand.vmem [shape: f32[1,8], index: 5, kind: input, shape index: {}, may-alias: {3,5}]   ;;  %s1119_s6 = inlined_call_operand.vmem [shape: f32[128,8], index: 6, kind: output, shape index: {}]  }
   0x1 LB: > { %s750_s3 = sadd.s32 4294967295, %s924_s21   ;;  %p754_p0 = scmp.ge.s32.totalorder %s924_s21, 1  ;;  %s924_s21 = sphi %s961_s21, %s16_s21  }
   0x2   : > { %p225_p1 = scmp.lt.s32.totalorder %s924_s21, 3 }
   0x4   : > { %p226_p2 = pnand %p754_p0, %p225_p1 }
   0x5   : > { %v874_v0 = vld [vmem:[%s1115_s2 + $0x40] sm:$0xff] (!%p226_p2)   ;;  %s755_s24 = sshll.u32 (!%p226_p2), %s750_s3, 3  ;;  %v876_v2 = vld [vmem:[%s1115_s2 + $0x48] sm:$0xff] (!%p226_p2)   ;;  %v878_v4 = vld [vmem:[%s1115_s2 + $0x50] sm:$0xff] (!%p226_p2)   ;;  %vm538_vm0 = vcmask (!%p226_p2), 72704   ;;  %vm673_vm1 = vcmask (!%p226_p2), 64512  }
   0x6   : > { %229 = sbr.rel (%p226_p2) target bundleno = 276 (0x114), region = 44  ;;  %v875_v1 = vld [vmem:[%s1115_s2] sm:$0xff] (!%p226_p2)   ;;  %810 = vmatprep.subr.bf16.mxu0 (!%p226_p2), %v874_v0  ;;  %850 = vmatprep.subr.bf16.mxu1 (!%p226_p2), %v874_v0  ;;  %v877_v3 = vld [vmem:[%s1115_s2 + $0x8] sm:$0xff] (!%p226_p2)   ;;  %p262_p3 = scmp.lt.s32.totalorder (!%p226_p2), %s755_s24, 15  ;;  %v879_v5 = vld [vmem:[%s1115_s2 + $0x10] sm:$0xff] (!%p226_p2)  }
   0x7   : > { %811 = vmatpush3.bf16.msra.mxu0 (!%p226_p2), %v875_v1  ;;  %858 = vmatpush3.bf16.msra.mxu1 (!%p226_p2), %v875_v1  ;;  %v880_v6 = vld [vmem:[%s1115_s2 + $0x58] sm:$0xff] (!%p226_p2)   ;;  %v882_v8 = vld [vmem:[%s1115_s2 + $0x60] sm:$0xff] (!%p226_p2)   ;;  %v884_v10 = vld [vmem:[%s1115_s2 + $0x68] sm:$0xff] (!%p226_p2)  }
   0x8   : > { %812 = vmatprep.subr.bf16.mxu0 (!%p226_p2), %v876_v2  ;;  %851 = vmatprep.subr.bf16.mxu1 (!%p226_p2), %v876_v2  ;;  %v881_v7 = vld [vmem:[%s1115_s2 + $0x18] sm:$0xff] (!%p226_p2)   ;;  %v883_v9 = vld [vmem:[%s1115_s2 + $0x20] sm:$0xff] (!%p226_p2)   ;;  %v885_v13 = vld [vmem:[%s1115_s2 + $0x28] sm:$0xff] (!%p226_p2)  }
   0x9   : > { %v886_v14 = vld [vmem:[%s1115_s2 + $0x70] sm:$0xff] (!%p226_p2)   ;;  %v888_v23 = vld [vmem:[%s1115_s2 + $0x78] sm:$0xff] (!%p226_p2)  }
   0xa   : > { %v887_v21 = vld [vmem:[%s1115_s2 + $0x30] sm:$0xff] (!%p226_p2)   ;;  %v889_v30 = vld [vmem:[%s1115_s2 + $0x38] sm:$0xff] (!%p226_p2)  }
   0xb   : > { %813 = vmatpush3.bf16.msra.mxu0 (!%p226_p2), %v877_v3  ;;  %859 = vmatpush3.bf16.msra.mxu1 (!%p226_p2), %v877_v3 }
   0xc   : > { %814 = vmatprep.subr.bf16.mxu0 (!%p226_p2), %v878_v4  ;;  %852 = vmatprep.subr.bf16.mxu1 (!%p226_p2), %v878_v4 }
   0xd   : > { %s1121_s24 = smov (!%p262_p3, %s755_s24), 15 }
   0xe   : > { %s790_s15 = sshll.u32 %s1121_s24, 3  ;;  %s759_s23 = sshll.u32 %s1121_s24, 2 }
   0xf   : > { %815 = vmatpush3.bf16.msra.mxu0 %v879_v5  ;;  %860 = vmatpush3.bf16.msra.mxu1 %v879_v5  ;;  %s1004_s20 = scalar_lea.vmem %s1113_s0, %s790_s15  ;;  %s1018_s29 = scalar_lea.vmem %s1114_s1, %s759_s23 }
  0x10   : > { %816 = vmatprep.subr.bf16.mxu0 %v880_v6  ;;  %853 = vmatprep.subr.bf16.mxu1 %v880_v6  ;;  %v892_v11 = vld [vmem:[%s1004_s20 + $0x4] ss:$8 sps:$4 sm:$0xff]   ;;  %v808_v22 = vld [vmem:[%s1018_s29 + $0x10] sm:$0xff]   ;;  %v809_v31 = vld [vmem:[%s1018_s29 + $0x18] sm:$0xff]   ;;  %s1082_s23 = scalar_lea.vmem %s1119_s6, %s790_s15 }
  0x11   : > { %v895_v12 = vld [vmem:[%s1004_s20 + $0x24] ss:$8 sps:$4 sm:$0xff]   ;;  %505 = vmatprep.mubr.bf16.mxu0 %v892_v11  ;;  %v802_v28 = vunpack.c.h.bf16 %v808_v22  ;;  %v801_v29 = vunpack.c.l.bf16 %v808_v22  ;;  %v890_v32 = vld [vmem:[%s1004_s20] ss:$8 sps:$4 sm:$0xff]   ;;  %v806_v36 = vunpack.c.h.bf16 %v809_v31  ;;  %v805_v37 = vunpack.c.l.bf16 %v809_v31  ;;  %v896_v38 = vld [vmem:[%s1004_s20 + $0x14] ss:$8 sps:$4 sm:$0xff]  }
  0x12   : > { %521 = vmatprep.mubr.bf16.mxu1 %v895_v12  ;;  %v807_v15 = vld [vmem:[%s1018_s29 + $0x8] sm:$0xff]   ;;  %v792_v16 = vld [vmem:[%s1018_s29] sm:$0xff]   ;;  %v898_v39 = vld [vmem:[%s1004_s20 + $0x34] ss:$8 sps:$4 sm:$0xff]  }
  0x13   : > { %817 = vmatpush3.bf16.msra.mxu0 %v881_v7  ;;  %861 = vmatpush3.bf16.msra.mxu1 %v881_v7  ;;  %v797_v17 = vunpack.c.l.bf16 %v807_v15  ;;  %v793_v18 = vunpack.c.l.bf16 %v792_v16  ;;  %v798_v19 = vunpack.c.h.bf16 %v807_v15  ;;  %v794_v20 = vunpack.c.h.bf16 %v792_v16  ;;  %v893_v33 = vld [vmem:[%s1004_s20 + $0x20] ss:$8 sps:$4 sm:$0xff]   ;;  %v900_v42 = vld [vmem:[%s1004_s20 + $0x10] ss:$8 sps:$4 sm:$0xff]  }
  0x14   : > { %818 = vmatprep.subr.bf16.mxu0 %v882_v8  ;;  %854 = vmatprep.subr.bf16.mxu1 %v882_v8  ;;  %v554_v34 = vsel %vm538_vm0, %v802_v28, 0.0  ;;  %v551_v35 = vsel %vm538_vm0, %v801_v29, 0.0  ;;  %v560_v40 = vsel %vm538_vm0, %v806_v36, 0.0  ;;  %v557_v41 = vsel %vm538_vm0, %v805_v37, 0.0  ;;  %v901_v43 = vld [vmem:[%s1004_s20 + $0x30] ss:$8 sps:$4 sm:$0xff]  }
  0x15   : > { %v545_v24 = vsel %vm538_vm0, %v797_v17, 0.0  ;;  %v539_v25 = vsel %vm538_vm0, %v793_v18, 0.0  ;;  %v548_v26 = vsel %vm538_vm0, %v798_v19, 0.0  ;;  %v542_v27 = vsel %vm538_vm0, %v794_v20, 0.0  ;;  %v1064_v31 = vld [vmem:[%s1117_s4] ss:$0 sm:$0xff] }
  0x16   : > { %546 = vadd.xlane.f32.xlu1 %v545_v24  ;;  %540 = vadd.xlane.f32.xlu0 %v539_v25 }
  0x17   : > { %819 = vmatpush3.bf16.msra.mxu0 %v883_v9  ;;  %862 = vmatpush3.bf16.msra.mxu1 %v883_v9 }
  0x18   : > { %820 = vmatprep.subr.bf16.mxu0 %v884_v10  ;;  %855 = vmatprep.subr.bf16.mxu1 %v884_v10 }
  0x1a   : > { %549 = vadd.xlane.f32.xlu1 %v548_v26  ;;  %543 = vadd.xlane.f32.xlu0 %v542_v27 }
  0x1b   : > { %821 = vmatpush3.bf16.msra.mxu0 %v885_v13  ;;  %863 = vmatpush3.bf16.msra.mxu1 %v885_v13 }
  0x1c   : > { %822 = vmatprep.subr.bf16.mxu0 %v886_v14  ;;  %856 = vmatprep.subr.bf16.mxu1 %v886_v14 }
  0x1e   : > { %555 = vadd.xlane.f32.xlu1 %v554_v34  ;;  %552 = vadd.xlane.f32.xlu0 %v551_v35 }
  0x1f   : > { %823 = vmatpush3.bf16.msra.mxu0 %v887_v21  ;;  %864 = vmatpush3.bf16.msra.mxu1 %v887_v21 }
  0x20   : > { %824 = vmatprep.subr.bf16.mxu0 %v888_v23  ;;  %857 = vmatprep.subr.bf16.mxu1 %v888_v23 }
  0x22   : > { %561 = vadd.xlane.f32.xlu1 %v560_v40  ;;  %558 = vadd.xlane.f32.xlu0 %v557_v41 }
  0x23   : > { %825 = vmatpush3.bf16.msra.mxu0 %v889_v30  ;;  %865 = vmatpush3.bf16.msra.mxu1 %v889_v30 }
  0x26   : > { %506 = vmatmul.mubr.bf16.vlgmr.msra.gmra.mrb[0].mxu0 %v890_v32  ;;  %522 = vmatmul.mubr.bf16.vlgmr.msra.gmra.mrb[0].mxu1 %v893_v33 }
  0x27   : > { %513 = vmatprep.mubr.bf16.mxu0 %v896_v38  ;;  %529 = vmatprep.mubr.bf16.mxu1 %v898_v39 }
  0x2e   : > { %514 = vmatmul.mubr.bf16.gmra.mrb[4].mxu0 %v900_v42  ;;  %530 = vmatmul.mubr.bf16.gmra.mrb[4].mxu1 %v901_v43  ;;  %v1069_v43 = vld [vmem:[%s1118_s5] ss:$0 sm:$0xff] }
  0xa3   : > { %v541_v44 = vpop.xlane.xlu0 %540  ;;  %v1053_v45 = vpop.xlane.xlu1 %546 }
  0xa4   : > { %v579_v49 = vadd.f32 1e-08, %v541_v44  ;;  %v581_v55 = vadd.f32 1e-08, %v1053_v45  ;;  %v563_v62 = vmax.f32 %v541_v44, 0.0  ;;  %v565_v15 = vmax.f32 %v1053_v45, 0.0 }
  0xa6   : > { %902 = vrcp.f32 %v579_v49  ;;  %v571_v4 = vmin.f32 %v563_v62, 1.0  ;;  %v573_v39 = vmin.f32 %v565_v15, 1.0 }
  0xa7   : > { %v544_v46 = vpop.xlane.xlu0 %543  ;;  %v1055_v47 = vpop.xlane.xlu1 %549 }
  0xa8   : > { %v580_v51 = vadd.f32 1e-08, %v544_v46  ;;  %v582_v57 = vadd.f32 1e-08, %v1055_v47  ;;  %v564_v1 = vmax.f32 %v544_v46, 0.0  ;;  %v566_v16 = vmax.f32 %v1055_v47, 0.0 }
  0xaa   : > { %904 = vrcp.f32 %v580_v51  ;;  %v572_v8 = vmin.f32 %v564_v1, 1.0  ;;  %v574_v41 = vmin.f32 %v566_v16, 1.0 }
  0xab   : > { %v553_v48 = vpop.xlane.xlu0 %552  ;;  %v556_v50 = vpop.xlane.xlu1 %555 }
  0xac   : > { %v583_v52 = vadd.f32 1e-08, %v553_v48  ;;  %v584_v53 = vadd.f32 1e-08, %v556_v50  ;;  %v567_v63 = vmax.f32 %v553_v48, 0.0  ;;  %v568_v2 = vmax.f32 %v556_v50, 0.0 }
  0xae   : > { %906 = vrcp.f32 %v583_v52  ;;  %v575_v6 = vmin.f32 %v567_v63, 1.0  ;;  %v576_v10 = vmin.f32 %v568_v2, 1.0 }
  0xaf   : > { %908 = vrcp.f32 %v584_v53  ;;  %v562_v54 = vpop.xlane.xlu1 %561  ;;  %v559_v56 = vpop.xlane.xlu0 %558 }
  0xb0   : > { %v586_v58 = vadd.f32 1e-08, %v562_v54  ;;  %v585_v59 = vadd.f32 1e-08, %v559_v56  ;;  %910 = vrcp.f32 %v581_v55  ;;  %v903_v60 = vpop.eup %902  ;;  %v570_v29 = vmax.f32 %v562_v54, 0.0 }
  0xb1   : > { %912 = vrcp.f32 %v582_v57  ;;  %v595_v5 = vmul.f32 216.0, %v903_v60  ;;  %v569_v30 = vmax.f32 %v559_v56, 0.0 }
  0xb2   : > { %914 = vrcp.f32 %v586_v58  ;;  %v578_v48 = vmin.f32 %v570_v29, 1.0 }
  0xb3   : > { %916 = vrcp.f32 %v585_v59  ;;  %v603_v20 = vmul.f32 %v595_v5, %v571_v4  ;;  %v577_v50 = vmin.f32 %v569_v30, 1.0 }
  0xb4   : > { %v905_v61 = vpop.eup %904 }
  0xb5   : > { %v596_v9 = vmul.f32 216.0, %v905_v61 }
  0xb7   : > { %v604_v27 = vmul.f32 %v596_v9, %v572_v8 }
  0xb8   : > { %v907_v0 = vpop.eup %906 }
  0xb9   : > { %v909_v3 = vpop.eup %908  ;;  %v599_v7 = vmul.f32 216.0, %v907_v0 }
  0xba   : > { %v600_v11 = vmul.f32 216.0, %v909_v3  ;;  %v911_v14 = vpop.eup %910 }
  0xbb   : > { %v913_v19 = vpop.eup %912  ;;  %v607_v21 = vmul.f32 %v599_v7, %v575_v6  ;;  %v597_v40 = vmul.f32 216.0, %v911_v14 }
  0xbc   : > { %v915_v26 = vpop.eup %914  ;;  %v608_v28 = vmul.f32 %v600_v11, %v576_v10  ;;  %v598_v42 = vmul.f32 216.0, %v913_v19 }
  0xbd   : > { %v917_v34 = vpop.eup %916  ;;  %v602_v49 = vmul.f32 216.0, %v915_v26  ;;  %v605_v58 = vmul.f32 %v597_v40, %v573_v39 }
  0xbe   : > { %v601_v51 = vmul.f32 216.0, %v917_v34  ;;  %v606_v59 = vmul.f32 %v598_v42, %v574_v41 }
  0xbf   : > { %v610_v6 = vmul.f32 %v602_v49, %v578_v48 }
  0xc0   : > { %v609_v7 = vmul.f32 %v601_v51, %v577_v50 }
  0xf9   : > { %v826_v12 = vpop.f32.mrb[0].mxu0  ;;  %v838_v13 = vpop.f32.mrb[0].mxu1 }
  0xfa   : > { %v827_v17 = vpop.f32.mrb[1].mxu0  ;;  %v839_v18 = vpop.f32.mrb[1].mxu1 }
  0xfb   : > { %v828_v22 = vadd.f32 %v827_v17, %v826_v12  ;;  %v840_v23 = vadd.f32 %v839_v18, %v838_v13  ;;  %v829_v24 = vpop.f32.mrb[2].mxu0  ;;  %v841_v25 = vpop.f32.mrb[2].mxu1 }
  0xfc   : > { %v830_v32 = vpop.f32.mrb[3].mxu0  ;;  %v842_v33 = vpop.f32.mrb[3].mxu1 }
  0xfd   : > { %v611_v35 = vmul.f32 %v828_v22, %v603_v20  ;;  %v615_v36 = vmul.f32 %v840_v23, %v607_v21  ;;  %v831_v37 = vadd.f32 %v830_v32, %v829_v24  ;;  %v843_v38 = vadd.f32 %v842_v33, %v841_v25 }
  0xff   : > { %v626_v44 = vmul.f32 %v1064_v31, %v611_v35  ;;  %v630_v45 = vmul.f32 %v1064_v31, %v615_v36  ;;  %v612_v46 = vmul.f32 %v831_v37, %v604_v27  ;;  %v616_v47 = vmul.f32 %v843_v38, %v608_v28 }
 0x101   : > { %v641_v52 = vadd.f32 %v1069_v43, %v626_v44  ;;  %v645_v53 = vadd.f32 %v1069_v43, %v630_v45  ;;  %v627_v54 = vmul.f32 %v1064_v31, %v612_v46  ;;  %v631_v55 = vmul.f32 %v1064_v31, %v616_v47  ;;  %v832_v56 = vpop.f32.mrb[4].mxu0  ;;  %v844_v57 = vpop.f32.mrb[4].mxu1 }
 0x102   : > { %v833_v60 = vpop.f32.mrb[5].mxu0  ;;  %v845_v61 = vpop.f32.mrb[5].mxu1 }
 0x103   : > { %vm649_vm2 = vcmp.ge.f32.partialorder %v641_v52, 0.0  ;;  %v657_v62 = vmul.f32 0.2, %v641_v52  ;;  %vm653_vm3 = vcmp.ge.f32.partialorder %v645_v53, 0.0  ;;  %v661_v63 = vmul.f32 0.2, %v645_v53 }
 0x104   : > { %v642_v0 = vadd.f32 %v1069_v43, %v627_v54  ;;  %v646_v1 = vadd.f32 %v1069_v43, %v631_v55  ;;  %v834_v2 = vadd.f32 %v833_v60, %v832_v56  ;;  %v846_v3 = vadd.f32 %v845_v61, %v844_v57  ;;  %v835_v4 = vpop.f32.mrb[6].mxu0  ;;  %v847_v5 = vpop.f32.mrb[6].mxu1 }
 0x105   : > { %v665_v8 = vsel %vm649_vm2, %v641_v52, %v657_v62  ;;  %v669_v9 = vsel %vm653_vm3, %v645_v53, %v661_v63  ;;  %v836_v10 = vpop.f32.mrb[7].mxu0  ;;  %v848_v11 = vpop.f32.mrb[7].mxu1 }
 0x106   : > { %674 = vst.msk [vmem:[%s1082_s23] sm:$0xff] %vm673_vm1, %v665_v8  ;;  %678 = vst.msk [vmem:[%s1082_s23 + $0x20] sm:$0xff] %vm673_vm1, %v669_v9  ;;  %vm650_vm4 = vcmp.ge.f32.partialorder %v642_v0, 0.0  ;;  %v658_v12 = vmul.f32 0.2, %v642_v0  ;;  %vm654_vm5 = vcmp.ge.f32.partialorder %v646_v1, 0.0  ;;  %v613_v14 = vmul.f32 %v834_v2, %v605_v58 }
 0x107   : > { %v662_v13 = vmul.f32 0.2, %v646_v1  ;;  %v617_v15 = vmul.f32 %v846_v3, %v609_v7  ;;  %v837_v16 = vadd.f32 %v836_v10, %v835_v4  ;;  %v849_v17 = vadd.f32 %v848_v11, %v847_v5 }
 0x108   : > { %v666_v18 = vsel %vm650_vm4, %v642_v0, %v658_v12  ;;  %v628_v20 = vmul.f32 %v1064_v31, %v613_v14 }
 0x109   : > { %v670_v19 = vsel %vm654_vm5, %v646_v1, %v662_v13  ;;  %675 = vst.msk [vmem:[%s1082_s23 + $0x8] sm:$0xff] %vm673_vm1, %v666_v18  ;;  %v632_v21 = vmul.f32 %v1064_v31, %v617_v15  ;;  %v614_v22 = vmul.f32 %v837_v16, %v606_v59  ;;  %v618_v23 = vmul.f32 %v849_v17, %v610_v6 }
 0x10a   : > { %679 = vst.msk [vmem:[%s1082_s23 + $0x28] sm:$0xff] %vm673_vm1, %v670_v19  ;;  %v643_v24 = vadd.f32 %v1069_v43, %v628_v20 }
 0x10b   : > { %v647_v25 = vadd.f32 %v1069_v43, %v632_v21  ;;  %v629_v26 = vmul.f32 %v1064_v31, %v614_v22  ;;  %v633_v27 = vmul.f32 %v1064_v31, %v618_v23 }
 0x10c   : > { %vm651_vm6 = vcmp.ge.f32.partialorder %v643_v24, 0.0  ;;  %v659_v28 = vmul.f32 0.2, %v643_v24 }
 0x10d   : > { %vm655_vm7 = vcmp.ge.f32.partialorder %v647_v25, 0.0  ;;  %v663_v29 = vmul.f32 0.2, %v647_v25  ;;  %v644_v30 = vadd.f32 %v1069_v43, %v629_v26  ;;  %v648_v32 = vadd.f32 %v1069_v43, %v633_v27 }
 0x10e   : > { %v667_v33 = vsel %vm651_vm6, %v643_v24, %v659_v28 }
 0x10f   : > { %v671_v34 = vsel %vm655_vm7, %v647_v25, %v663_v29  ;;  %676 = vst.msk [vmem:[%s1082_s23 + $0x10] sm:$0xff] %vm673_vm1, %v667_v33  ;;  %vm652_vm8 = vcmp.ge.f32.partialorder %v644_v30, 0.0  ;;  %v660_v35 = vmul.f32 0.2, %v644_v30  ;;  %vm656_vm9 = vcmp.ge.f32.partialorder %v648_v32, 0.0 }
 0x110   : > { %680 = vst.msk [vmem:[%s1082_s23 + $0x30] sm:$0xff] %vm673_vm1, %v671_v34  ;;  %v664_v31 = vmul.f32 0.2, %v648_v32 }
 0x111   : > { %v668_v36 = vsel %vm652_vm8, %v644_v30, %v660_v35 }
 0x112   : > { %v672_v37 = vsel %vm656_vm9, %v648_v32, %v664_v31  ;;  %677 = vst.msk [vmem:[%s1082_s23 + $0x18] sm:$0xff] %vm673_vm1, %v668_v36 }
 0x113   : > { %681 = vst.msk [vmem:[%s1082_s23 + $0x38] sm:$0xff] %vm673_vm1, %v672_v37 }
 0x114 PF: > { %s16_s21 = sadd.s32 1, %s924_s21  }
 0x115   : > { %p13_p4 = scmp.ge.s32.totalorder %s16_s21, 4  }
 0x117   :  { %15 = sbr.rel (!%p13_p4) target bundleno = 1 (0x1), region = 77 }

// kernel: pconv_encoder_decoder_forward.11
= control target key start
LH: loop header
LB: loop body
LE: loop exit
PB: predicated region body
PF: predicated region fallthrough
CT: control target
= control target key end

     0   :  { %s1644_s21 = smov 0   ;;  %s2327_s0 = inlined_call_operand.vmem [shape: bf16[512,128], index: 0, kind: input, shape index: {}]   ;;  %s2328_s1 = inlined_call_operand.vmem [shape: bf16[512,9], index: 1, kind: input, shape index: {}]   ;;  %s2329_s2 = inlined_call_operand.vmem [shape: bf16[128,4], index: 2, kind: input, shape index: {}]   ;;  %s2330_s3 = inlined_call_operand.vmem [shape: f32[1,4], index: 3, kind: input, shape index: {}]   ;;  %s2331_s4 = inlined_call_operand.vmem [shape: f32[1,4], index: 4, kind: input, shape index: {}]   ;;  %s2332_s5 = inlined_call_operand.vmem [shape: f32[1,4], index: 5, kind: input, shape index: {}]   ;;  %s2333_s6 = inlined_call_operand.vmem [shape: f32[512,4], index: 6, kind: output, shape index: {}]  }
   0x1 LB: > { %s1298_s22 = sadd.s32 4294967295, %s1607_s21   ;;  %p1302_p0 = scmp.ge.s32.totalorder %s1607_s21, 1  ;;  %s1607_s21 = sphi %s1644_s21, %s16_s21  }
   0x2   : > { %p224_p1 = scmp.lt.s32.totalorder %s1607_s21, 3 }
   0x4   : > { %p225_p2 = pnand %p1302_p0, %p224_p1 }
   0x6   : > { %228 = sbr.rel (%p225_p2) target bundleno = 313 (0x139), region = 44 }
   0xd   : > { %v1513_v0 = vld [vmem:[%s2329_s2] sm:$0xff]   ;;  %s1303_s25 = sshll.u32 %s1298_s22, 5  ;;  %v1514_v1 = vld [vmem:[%s2329_s2 + $0x8] sm:$0xff]   ;;  %v1515_v2 = vld [vmem:[%s2329_s2 + $0x10] sm:$0xff]   ;;  %vm695_vm0 = vcmask 72704   ;;  %vm1197_vm1 = vcmask 31744  }
   0xe   : > { %p260_p3 = scmp.lt.s32.totalorder %s1303_s25, 63  ;;  %1441 = vmatprep.subr.bf16.mxu0 %v1513_v0  ;;  %1489 = vmatprep.subr.bf16.mxu1 %v1513_v0  ;;  %v1516_v3 = vld [vmem:[%s2329_s2 + $0x18] sm:$0xff]   ;;  %v1517_v6 = vld [vmem:[%s2329_s2 + $0x20] sm:$0xff]   ;;  %v1518_v7 = vld [vmem:[%s2329_s2 + $0x28] sm:$0xff]  }
   0xf   : > { %1442 = vmatpush3.bf16.msra.mxu0 %v1513_v0  ;;  %1497 = vmatpush3.bf16.msra.mxu1 %v1513_v0  ;;  %v1519_v16 = vld [vmem:[%s2329_s2 + $0x30] sm:$0xff]   ;;  %v1520_v23 = vld [vmem:[%s2329_s2 + $0x38] sm:$0xff]  }
  0x10   : > { %s2385_s25 = smov (!%p260_p3, %s1303_s25), 63  ;;  %1443 = vmatprep.subr.bf16.mxu0 %v1514_v1  ;;  %1490 = vmatprep.subr.bf16.mxu1 %v1514_v1 }
  0x11   : > { %s1304_s30 = sshll.u32 %s2385_s25, 2  ;;  %s1308_s29 = sshll.u32 %s2385_s25, 3 }
  0x12   : > { %s1667_s9 = scalar_lea.vmem %s2327_s0, %s1304_s30  ;;  %s1680_s16 = scalar_lea.vmem %s2328_s1, %s1304_s30 }
  0x13   : > { %1444 = vmatpush3.bf16.msra.mxu0 %v1514_v1  ;;  %1498 = vmatpush3.bf16.msra.mxu1 %v1514_v1  ;;  %v1521_v4 = vld [vmem:[%s1667_s9] sm:$0xff]   ;;  %v1402_v8 = vld [vmem:[%s1680_s16 + $0x8] sm:$0xff]   ;;  %v1403_v17 = vld [vmem:[%s1680_s16 + $0x10] sm:$0xff]  }
  0x14   : > { %1445 = vmatprep.subr.bf16.mxu0 %v1515_v2  ;;  %1491 = vmatprep.subr.bf16.mxu1 %v1515_v2  ;;  %v1522_v5 = vld [vmem:[%s1667_s9 + $0x40] sm:$0xff]   ;;  %v1344_v10 = vunpack.c.l.bf16 %v1402_v8  ;;  %v1345_v12 = vunpack.c.h.bf16 %v1402_v8  ;;  %v1349_v20 = vunpack.c.h.bf16 %v1403_v17  ;;  %v1348_v21 = vunpack.c.l.bf16 %v1403_v17  ;;  %v1404_v22 = vld [vmem:[%s1680_s16 + $0x18] sm:$0xff]   ;;  %v1523_v29 = vld [vmem:[%s1667_s9 + $0x8] sm:$0xff]  }
  0x15   : > { %1457 = vmatprep.mubr.bf16.mxu0 %v1521_v4  ;;  %1473 = vmatprep.mubr.bf16.mxu1 %v1522_v5  ;;  %v1339_v9 = vld [vmem:[%s1680_s16] sm:$0xff]   ;;  %v1353_v26 = vunpack.c.h.bf16 %v1404_v22  ;;  %v1352_v27 = vunpack.c.l.bf16 %v1404_v22  ;;  %v1524_v30 = vld [vmem:[%s1667_s9 + $0x48] sm:$0xff]   ;;  %v1525_v35 = vld [vmem:[%s1667_s9 + $0x10] sm:$0xff]  }
  0x16   : > { %v1340_v11 = vunpack.c.l.bf16 %v1339_v9  ;;  %v1341_v13 = vunpack.c.h.bf16 %v1339_v9  ;;  %v702_v14 = vsel %vm695_vm0, %v1344_v10, 0.0  ;;  %v705_v18 = vsel %vm695_vm0, %v1345_v12, 0.0  ;;  %v1405_v28 = vld [vmem:[%s1680_s16 + $0x20] sm:$0xff]   ;;  %v1526_v36 = vld [vmem:[%s1667_s9 + $0x50] sm:$0xff]   ;;  %v1406_v37 = vld [vmem:[%s1680_s16 + $0x28] sm:$0xff]  }
  0x17   : > { %1446 = vmatpush3.bf16.msra.mxu0 %v1515_v2  ;;  %1499 = vmatpush3.bf16.msra.mxu1 %v1515_v2  ;;  %v711_v24 = vsel %vm695_vm0, %v1349_v20, 0.0  ;;  %v708_v25 = vsel %vm695_vm0, %v1348_v21, 0.0  ;;  %v717_v31 = vsel %vm695_vm0, %v1353_v26, 0.0  ;;  %v714_v32 = vsel %vm695_vm0, %v1352_v27, 0.0  ;;  %v1407_v42 = vld [vmem:[%s1680_s16 + $0x30] sm:$0xff]   ;;  %v1527_v43 = vld [vmem:[%s1667_s9 + $0x18] sm:$0xff]  }
  0x18   : > { %1447 = vmatprep.subr.bf16.mxu0 %v1516_v3  ;;  %1492 = vmatprep.subr.bf16.mxu1 %v1516_v3  ;;  %v696_v15 = vsel %vm695_vm0, %v1340_v11, 0.0  ;;  %v699_v19 = vsel %vm695_vm0, %v1341_v13, 0.0  ;;  %v1357_v33 = vunpack.c.h.bf16 %v1405_v28  ;;  %v1356_v34 = vunpack.c.l.bf16 %v1405_v28  ;;  %v1528_v44 = vld [vmem:[%s1667_s9 + $0x58] sm:$0xff]   ;;  %v1529_v49 = vld [vmem:[%s1667_s9 + $0x20] sm:$0xff]   ;;  %v1531_v57 = vld [vmem:[%s1667_s9 + $0x28] sm:$0xff]  }
  0x19   : > { %703 = vadd.xlane.f32.xlu1 %v702_v14  ;;  %697 = vadd.xlane.f32.xlu0 %v696_v15  ;;  %v1361_v40 = vunpack.c.h.bf16 %v1406_v37  ;;  %v1360_v41 = vunpack.c.l.bf16 %v1406_v37  ;;  %v1365_v47 = vunpack.c.h.bf16 %v1407_v42  ;;  %v1364_v48 = vunpack.c.l.bf16 %v1407_v42  ;;  %v1530_v50 = vld [vmem:[%s1667_s9 + $0x60] sm:$0xff]   ;;  %v1408_v51 = vld [vmem:[%s1680_s16 + $0x38] sm:$0xff]   ;;  %v1532_v58 = vld [vmem:[%s1667_s9 + $0x68] sm:$0xff]  }
  0x1a   : > { %v723_v38 = vsel %vm695_vm0, %v1357_v33, 0.0  ;;  %v720_v39 = vsel %vm695_vm0, %v1356_v34, 0.0  ;;  %v1369_v54 = vunpack.c.h.bf16 %v1408_v51  ;;  %v1368_v55 = vunpack.c.l.bf16 %v1408_v51  ;;  %v1409_v56 = vld [vmem:[%s1680_s16 + $0x40] sm:$0xff]   ;;  %v1533_v63 = vld [vmem:[%s1667_s9 + $0x30] sm:$0xff]   ;;  %v1410_v1 = vld [vmem:[%s1680_s16 + $0x48] sm:$0xff]  }
  0x1b   : > { %1448 = vmatpush3.bf16.msra.mxu0 %v1516_v3  ;;  %1500 = vmatpush3.bf16.msra.mxu1 %v1516_v3  ;;  %v729_v45 = vsel %vm695_vm0, %v1361_v40, 0.0  ;;  %v726_v46 = vsel %vm695_vm0, %v1360_v41, 0.0  ;;  %v735_v52 = vsel %vm695_vm0, %v1365_v47, 0.0  ;;  %v732_v53 = vsel %vm695_vm0, %v1364_v48, 0.0  ;;  %v1534_v0 = vld [vmem:[%s1667_s9 + $0x70] sm:$0xff]   ;;  %v1536_v8 = vld [vmem:[%s1667_s9 + $0x78] sm:$0xff]  }
  0x1c   : > { %1449 = vmatprep.subr.bf16.mxu0 %v1517_v6  ;;  %1493 = vmatprep.subr.bf16.mxu1 %v1517_v6  ;;  %v741_v59 = vsel %vm695_vm0, %v1369_v54, 0.0  ;;  %v738_v60 = vsel %vm695_vm0, %v1368_v55, 0.0  ;;  %v1373_v61 = vunpack.c.h.bf16 %v1409_v56  ;;  %v1372_v62 = vunpack.c.l.bf16 %v1409_v56  ;;  %v1412_v13 = vld [vmem:[%s1680_s16 + $0x58] sm:$0xff]   ;;  %v1415_v28 = vld [vmem:[%s1680_s16 + $0x70] sm:$0xff]  }
  0x1d   : > { %706 = vadd.xlane.f32.xlu1 %v705_v18  ;;  %700 = vadd.xlane.f32.xlu0 %v699_v19  ;;  %v1377_v4 = vunpack.c.h.bf16 %v1410_v1  ;;  %v1376_v5 = vunpack.c.l.bf16 %v1410_v1  ;;  %v1384_v17 = vunpack.c.l.bf16 %v1412_v13  ;;  %v1413_v18 = vld [vmem:[%s1680_s16 + $0x60] sm:$0xff]   ;;  %v1416_v33 = vld [vmem:[%s1680_s16 + $0x78] sm:$0xff]  }
  0x1e   : > { %v747_v2 = vsel %vm695_vm0, %v1373_v61, 0.0  ;;  %v744_v3 = vsel %vm695_vm0, %v1372_v62, 0.0  ;;  %v1389_v21 = vunpack.c.h.bf16 %v1413_v18  ;;  %v1388_v22 = vunpack.c.l.bf16 %v1413_v18 }
  0x1f   : > { %1450 = vmatpush3.bf16.msra.mxu0 %v1517_v6  ;;  %1501 = vmatpush3.bf16.msra.mxu1 %v1517_v6  ;;  %v1411_v6 = vld [vmem:[%s1680_s16 + $0x50] sm:$0xff]   ;;  %v753_v9 = vsel %vm695_vm0, %v1377_v4, 0.0  ;;  %v750_v10 = vsel %vm695_vm0, %v1376_v5, 0.0  ;;  %v762_v20 = vsel %vm695_vm0, %v1384_v17, 0.0  ;;  %v1400_v37 = vunpack.c.l.bf16 %v1416_v33 }
  0x20   : > { %1451 = vmatprep.subr.bf16.mxu0 %v1518_v7  ;;  %1494 = vmatprep.subr.bf16.mxu1 %v1518_v7  ;;  %v1381_v11 = vunpack.c.h.bf16 %v1411_v6  ;;  %v1380_v12 = vunpack.c.l.bf16 %v1411_v6 }
  0x21   : > { %712 = vadd.xlane.f32.xlu1 %v711_v24  ;;  %709 = vadd.xlane.f32.xlu0 %v708_v25  ;;  %v771_v24 = vsel %vm695_vm0, %v1389_v21, 0.0  ;;  %v768_v25 = vsel %vm695_vm0, %v1388_v22, 0.0 }
  0x22   : > { %v759_v14 = vsel %vm695_vm0, %v1381_v11, 0.0  ;;  %v756_v15 = vsel %vm695_vm0, %v1380_v12, 0.0 }
  0x23   : > { %1452 = vmatpush3.bf16.msra.mxu0 %v1518_v7  ;;  %1502 = vmatpush3.bf16.msra.mxu1 %v1518_v7  ;;  %v1535_v7 = vld [vmem:[%s1667_s9 + $0x38] sm:$0xff]   ;;  %s2062_s9 = scalar_lea.vmem %s2333_s6, %s1308_s29 }
  0x24   : > { %1453 = vmatprep.subr.bf16.mxu0 %v1519_v16  ;;  %1495 = vmatprep.subr.bf16.mxu1 %v1519_v16 }
  0x25   : > { %718 = vadd.xlane.f32.xlu1 %v717_v31  ;;  %715 = vadd.xlane.f32.xlu0 %v714_v32  ;;  %v1397_v31 = vunpack.c.h.bf16 %v1415_v28  ;;  %v1396_v32 = vunpack.c.l.bf16 %v1415_v28 }
  0x27   : > { %1454 = vmatpush3.bf16.msra.mxu0 %v1519_v16  ;;  %1503 = vmatpush3.bf16.msra.mxu1 %v1519_v16  ;;  %v1385_v16 = vunpack.c.h.bf16 %v1412_v13  ;;  %v783_v34 = vsel %vm695_vm0, %v1397_v31, 0.0 }
  0x28   : > { %1455 = vmatprep.subr.bf16.mxu0 %v1520_v23  ;;  %1496 = vmatprep.subr.bf16.mxu1 %v1520_v23 }
  0x29   : > { %724 = vadd.xlane.f32.xlu1 %v723_v38  ;;  %721 = vadd.xlane.f32.xlu0 %v720_v39  ;;  %v765_v19 = vsel %vm695_vm0, %v1385_v16, 0.0  ;;  %v786_v39 = vsel %vm695_vm0, %v1400_v37, 0.0 }
  0x2b   : > { %1456 = vmatpush3.bf16.msra.mxu0 %v1520_v23  ;;  %1504 = vmatpush3.bf16.msra.mxu1 %v1520_v23  ;;  %v1414_v23 = vld [vmem:[%s1680_s16 + $0x68] sm:$0xff]  }
  0x2c   : > { %v1393_v26 = vunpack.c.h.bf16 %v1414_v23  ;;  %v1392_v27 = vunpack.c.l.bf16 %v1414_v23 }
  0x2d   : > { %730 = vadd.xlane.f32.xlu1 %v729_v45  ;;  %727 = vadd.xlane.f32.xlu0 %v726_v46 }
  0x2e   : > { %1458 = vmatmul.mubr.bf16.vlgmr.msra.gmra.mrb[0].mxu0 %v1523_v29  ;;  %1474 = vmatmul.mubr.bf16.vlgmr.msra.gmra.mrb[0].mxu1 %v1524_v30  ;;  %v777_v29 = vsel %vm695_vm0, %v1393_v26, 0.0  ;;  %v774_v30 = vsel %vm695_vm0, %v1392_v27, 0.0 }
  0x2f   : > { %1461 = vmatprep.mubr.bf16.mxu0 %v1525_v35  ;;  %1477 = vmatprep.mubr.bf16.mxu1 %v1526_v36  ;;  %v780_v35 = vsel %vm695_vm0, %v1396_v32, 0.0  ;;  %v1401_v36 = vunpack.c.h.bf16 %v1416_v33 }
  0x31   : > { %736 = vadd.xlane.f32.xlu1 %v735_v52  ;;  %733 = vadd.xlane.f32.xlu0 %v732_v53  ;;  %v789_v38 = vsel %vm695_vm0, %v1401_v36, 0.0 }
  0x35   : > { %742 = vadd.xlane.f32.xlu1 %v741_v59  ;;  %739 = vadd.xlane.f32.xlu0 %v738_v60 }
  0x36   : > { %1462 = vmatmul.mubr.bf16.gmra.mrb[4].mxu0 %v1527_v43  ;;  %1478 = vmatmul.mubr.bf16.gmra.mrb[4].mxu1 %v1528_v44 }
  0x37   : > { %1465 = vmatprep.mubr.bf16.mxu0 %v1529_v49  ;;  %1481 = vmatprep.mubr.bf16.mxu1 %v1530_v50 }
  0x39   : > { %748 = vadd.xlane.f32.xlu1 %v747_v2  ;;  %745 = vadd.xlane.f32.xlu0 %v744_v3 }
  0x3d   : > { %754 = vadd.xlane.f32.xlu1 %v753_v9  ;;  %751 = vadd.xlane.f32.xlu0 %v750_v10 }
  0x3e   : > { %1466 = vmatmul.mubr.bf16.gmra.mrb[8].mxu0 %v1531_v57  ;;  %1482 = vmatmul.mubr.bf16.gmra.mrb[8].mxu1 %v1532_v58 }
  0x3f   : > { %1469 = vmatprep.mubr.bf16.mxu0 %v1533_v63  ;;  %1485 = vmatprep.mubr.bf16.mxu1 %v1534_v0 }
  0x41   : > { %760 = vadd.xlane.f32.xlu1 %v759_v14  ;;  %757 = vadd.xlane.f32.xlu0 %v756_v15 }
  0x45   : > { %766 = vadd.xlane.f32.xlu1 %v765_v19  ;;  %763 = vadd.xlane.f32.xlu0 %v762_v20 }
  0x46   : > { %1470 = vmatmul.mubr.bf16.gmra.mrb[12].mxu0 %v1535_v7  ;;  %1486 = vmatmul.mubr.bf16.gmra.mrb[12].mxu1 %v1536_v8 }
  0x49   : > { %772 = vadd.xlane.f32.xlu1 %v771_v24  ;;  %769 = vadd.xlane.f32.xlu0 %v768_v25 }
  0x4d   : > { %778 = vadd.xlane.f32.xlu1 %v777_v29  ;;  %775 = vadd.xlane.f32.xlu0 %v774_v30 }
  0x51   : > { %784 = vadd.xlane.f32.xlu1 %v783_v34  ;;  %781 = vadd.xlane.f32.xlu0 %v780_v35 }
  0x55   : > { %790 = vadd.xlane.f32.xlu1 %v789_v38  ;;  %787 = vadd.xlane.f32.xlu0 %v786_v39 }
  0xa6   : > { %v704_v40 = vpop.xlane.xlu1 %703  ;;  %v698_v41 = vpop.xlane.xlu0 %697 }
  0xa7   : > { %v858_v54 = vadd.f32 1e-08, %v704_v40  ;;  %v856_v57 = vadd.f32 1e-08, %v698_v41  ;;  %v794_v2 = vmax.f32 %v704_v40, 0.0  ;;  %v792_v3 = vmax.f32 %v698_v41, 0.0 }
  0xa9   : > { %1537 = vrcp.f32 %v858_v54  ;;  %v1788_v13 = vmin.f32 %v794_v2, 1.0  ;;  %v1790_v14 = vmin.f32 %v792_v3, 1.0 }
  0xaa   : > { %v707_v42 = vpop.xlane.xlu1 %706  ;;  %v701_v43 = vpop.xlane.xlu0 %700  ;;  %1539 = vrcp.f32 %v856_v57 }
  0xab   : > { %v859_v58 = vadd.f32 1e-08, %v707_v42  ;;  %v857_v61 = vadd.f32 1e-08, %v701_v43  ;;  %v795_v4 = vmax.f32 %v707_v42, 0.0  ;;  %v793_v5 = vmax.f32 %v701_v43, 0.0 }
  0xad   : > { %1541 = vrcp.f32 %v859_v58  ;;  %v1793_v18 = vmin.f32 %v795_v4, 1.0  ;;  %v1795_v19 = vmin.f32 %v793_v5, 1.0 }
  0xae   : > { %v713_v44 = vpop.xlane.xlu1 %712  ;;  %v710_v45 = vpop.xlane.xlu0 %709  ;;  %1543 = vrcp.f32 %v857_v61 }
  0xaf   : > { %v861_v62 = vadd.f32 1e-08, %v713_v44  ;;  %v860_v1 = vadd.f32 1e-08, %v710_v45  ;;  %v797_v7 = vmax.f32 %v713_v44, 0.0  ;;  %v796_v15 = vmax.f32 %v710_v45, 0.0 }
  0xb1   : > { %1545 = vrcp.f32 %v861_v62  ;;  %v1798_v21 = vmin.f32 %v797_v7, 1.0  ;;  %v1808_v31 = vmin.f32 %v796_v15, 1.0 }
  0xb2   : > { %v1753_v46 = vpop.xlane.xlu1 %718  ;;  %v1755_v47 = vpop.xlane.xlu0 %715  ;;  %1547 = vrcp.f32 %v860_v1 }
  0xb3   : > { %v863_v6 = vadd.f32 1e-08, %v1753_v46  ;;  %v862_v8 = vadd.f32 1e-08, %v1755_v47  ;;  %v1538_v12 = vpop.eup %1537  ;;  %v799_v22 = vmax.f32 %v1753_v46, 0.0  ;;  %v798_v28 = vmax.f32 %v1755_v47, 0.0 }
  0xb4   : > { %v1540_v17 = vpop.eup %1539  ;;  %v922_v27 = vmul.f32 108.0, %v1538_v12 }
  0xb5   : > { %1549 = vrcp.f32 %v863_v6  ;;  %v920_v30 = vmul.f32 108.0, %v1540_v17  ;;  %v1814_v38 = vmin.f32 %v799_v22, 1.0  ;;  %v1824_v43 = vmin.f32 %v798_v28, 1.0 }
  0xb6   : > { %v1757_v48 = vpop.xlane.xlu1 %724  ;;  %v1759_v49 = vpop.xlane.xlu0 %721  ;;  %1551 = vrcp.f32 %v862_v8  ;;  %v1822_v42 = vmul.f32 %v922_v27, %v1788_v13 }
  0xb7   : > { %v865_v11 = vadd.f32 1e-08, %v1757_v48  ;;  %v864_v16 = vadd.f32 1e-08, %v1759_v49  ;;  %v1542_v26 = vpop.eup %1541  ;;  %v801_v34 = vmax.f32 %v1757_v48, 0.0  ;;  %v800_v35 = vmax.f32 %v1759_v49, 0.0 }
  0xb8   : > { %v1544_v33 = vpop.eup %1543  ;;  %v923_v37 = vmul.f32 108.0, %v1542_v26  ;;  %v1828_v46 = vmul.f32 %v920_v30, %v1790_v14 }
  0xb9   : > { %1553 = vrcp.f32 %v865_v11  ;;  %v921_v47 = vmul.f32 108.0, %v1544_v33  ;;  %v1831_v54 = vmin.f32 %v801_v34, 1.0  ;;  %v1833_v57 = vmin.f32 %v800_v35, 1.0 }
  0xba   : > { %v1761_v50 = vpop.xlane.xlu1 %730  ;;  %v1763_v51 = vpop.xlane.xlu0 %727  ;;  %1555 = vrcp.f32 %v864_v16  ;;  %v1837_v61 = vmul.f32 %v923_v37, %v1793_v18 }
  0xbb   : > { %v867_v20 = vadd.f32 1e-08, %v1761_v50  ;;  %v866_v23 = vadd.f32 1e-08, %v1763_v51  ;;  %v1546_v45 = vpop.eup %1545  ;;  %2346 = vst [vmem:[#allocation2_spill] sm:$0xff] %v1831_v54  ;;  %2347 = vst [vmem:[#allocation3_spill] sm:$0xff] %v1833_v57  ;;  %v1848_v11 = vmul.f32 %v921_v47, %v1795_v19 }
  0xbc   : > { %v1548_v49 = vpop.eup %1547  ;;  %v803_v62 = vmax.f32 %v1761_v50, 0.0  ;;  %v925_v5 = vmul.f32 108.0, %v1546_v45  ;;  %v802_v6 = vmax.f32 %v1763_v51, 0.0 }
  0xbd   : > { %1557 = vrcp.f32 %v867_v20  ;;  %v924_v12 = vmul.f32 108.0, %v1548_v49 }
  0xbe   : > { %v1765_v52 = vpop.xlane.xlu1 %736  ;;  %v1767_v53 = vpop.xlane.xlu0 %733  ;;  %1559 = vrcp.f32 %v866_v23  ;;  %v1854_v23 = vmin.f32 %v803_v62, 1.0  ;;  %v1862_v30 = vmul.f32 %v925_v5, %v1798_v21 }
  0xbf   : > { %v869_v29 = vadd.f32 1e-08, %v1765_v52  ;;  %v868_v32 = vadd.f32 1e-08, %v1767_v53  ;;  %v1550_v4 = vpop.eup %1549  ;;  %v805_v16 = vmax.f32 %v1765_v52, 0.0  ;;  %v804_v17 = vmax.f32 %v1767_v53, 0.0 }
  0xc0   : > { %v1552_v8 = vpop.eup %1551  ;;  %v927_v22 = vmul.f32 108.0, %v1550_v4  ;;  %2348 = vst [vmem:[#allocation4_spill] sm:$0xff] %v1854_v23  ;;  %v1864_v52 = vmin.f32 %v802_v6, 1.0  ;;  %v1868_v33 = vmul.f32 %v924_v12, %v1808_v31 }
  0xc1   : > { %1561 = vrcp.f32 %v869_v29  ;;  %v926_v34 = vmul.f32 108.0, %v1552_v8  ;;  %v1871_v37 = vmin.f32 %v805_v16, 1.0 }
  0xc2   : > { %v1769_v55 = vpop.xlane.xlu1 %742  ;;  %v1771_v56 = vpop.xlane.xlu0 %739  ;;  %1563 = vrcp.f32 %v868_v32  ;;  %2349 = vst [vmem:[#allocation5_spill] sm:$0xff] %v1864_v52  ;;  %v1877_v47 = vmul.f32 %v927_v22, %v1814_v38 }
  0xc3   : > { %v871_v36 = vadd.f32 1e-08, %v1769_v55  ;;  %v870_v39 = vadd.f32 1e-08, %v1771_v56  ;;  %v1554_v15 = vpop.eup %1553  ;;  %2350 = vst [vmem:[#allocation6_spill] sm:$0xff] %v1871_v37  ;;  %v806_v4 = vmax.f32 %v1771_v56, 0.0 }
  0xc4   : > { %v1556_v51 = vpop.eup %1555 }
  0xc5   : > { %1565 = vrcp.f32 %v871_v36  ;;  %v928_v8 = vmul.f32 108.0, %v1556_v51 }
  0xc6   : > { %v1773_v59 = vpop.xlane.xlu1 %748  ;;  %v1775_v60 = vpop.xlane.xlu0 %745  ;;  %1567 = vrcp.f32 %v870_v39  ;;  %v1873_v39 = vmin.f32 %v804_v17, 1.0 }
  0xc7   : > { %v873_v44 = vadd.f32 1e-08, %v1773_v59  ;;  %v872_v48 = vadd.f32 1e-08, %v1775_v60  ;;  %v1558_v29 = vpop.eup %1557  ;;  %v809_v12 = vmax.f32 %v1773_v59, 0.0  ;;  %v808_v17 = vmax.f32 %v1775_v60, 0.0 }
  0xc8   : > { %v1560_v32 = vpop.eup %1559  ;;  %2351 = vst [vmem:[#allocation7_spill] sm:$0xff] %v1873_v39  ;;  %v931_v16 = vmul.f32 108.0, %v1558_v29  ;;  %v1900_v29 = vmin.f32 %v806_v4, 1.0 }
  0xc9   : > { %1569 = vrcp.f32 %v873_v44  ;;  %v930_v22 = vmul.f32 108.0, %v1560_v32 }
  0xca   : > { %v1777_v63 = vpop.xlane.xlu1 %754  ;;  %v1779_v0 = vpop.xlane.xlu0 %751  ;;  %1571 = vrcp.f32 %v872_v48  ;;  %v807_v48 = vmax.f32 %v1769_v55, 0.0  ;;  %2354 = vst [vmem:[#allocation10_spill] sm:$0xff] %v1900_v29 }
  0xcb   : > { %v875_v58 = vadd.f32 1e-08, %v1777_v63  ;;  %v874_v1 = vadd.f32 1e-08, %v1779_v0  ;;  %v1562_v36 = vpop.eup %1561  ;;  %v810_v32 = vmax.f32 %v1779_v0, 0.0 }
  0xcc   : > { %v1564_v45 = vpop.eup %1563 }
  0xcd   : > { %1573 = vrcp.f32 %v875_v58 }
  0xce   : > { %v1783_v9 = vpop.xlane.xlu1 %760  ;;  %v1785_v10 = vpop.xlane.xlu0 %757  ;;  %1575 = vrcp.f32 %v874_v1  ;;  %v929_v1 = vmul.f32 108.0, %v1554_v15 }
  0xcf   : > { %v877_v7 = vadd.f32 1e-08, %v1783_v9  ;;  %v876_v50 = vadd.f32 1e-08, %v1785_v10  ;;  %v1566_v62 = vpop.eup %1565 }
  0xd0   : > { %v1896_v59 = vmul.f32 %v929_v1, %v1831_v54  ;;  %v1910_v1 = vmin.f32 %v809_v12, 1.0  ;;  %v932_v54 = vmul.f32 108.0, %v1564_v45 }
  0xd1   : > { %1577 = vrcp.f32 %v877_v7  ;;  %v1568_v7 = vpop.eup %1567 }
  0xd2   : > { %v1802_v24 = vpop.xlane.xlu1 %766  ;;  %v1804_v25 = vpop.xlane.xlu0 %763  ;;  %1579 = vrcp.f32 %v876_v50  ;;  %2352 = vst [vmem:[#allocation8_spill] sm:$0xff] %v1896_v59  ;;  %v934_v0 = vmul.f32 108.0, %v1568_v7 }
  0xd3   : > { %v879_v20 = vadd.f32 1e-08, %v1802_v24  ;;  %v878_v26 = vadd.f32 1e-08, %v1804_v25  ;;  %v1570_v50 = vpop.eup %1569 }
  0xd4   : > { %v1572_v56 = vpop.eup %1571 }
  0xd5   : > { %1581 = vrcp.f32 %v879_v20  ;;  %v1892_v20 = vmul.f32 %v926_v34, %v1824_v43  ;;  %v811_v34 = vmax.f32 %v1777_v63, 0.0  ;;  %v936_v45 = vmul.f32 108.0, %v1572_v56 }
  0xd6   : > { %v1817_v40 = vpop.xlane.xlu1 %772  ;;  %v1819_v41 = vpop.xlane.xlu0 %769  ;;  %1583 = vrcp.f32 %v878_v26 }
  0xd7   : > { %v881_v53 = vadd.f32 1e-08, %v1817_v40  ;;  %v880_v35 = vadd.f32 1e-08, %v1819_v41  ;;  %v1574_v26 = vpop.eup %1573  ;;  %v1919_v12 = vmin.f32 %v811_v34, 1.0 }
  0xd8   : > { %v1576_v60 = vpop.eup %1575  ;;  %v939_v34 = vmul.f32 108.0, %v1574_v26 }
  0xd9   : > { %1585 = vrcp.f32 %v881_v53  ;;  %v1898_v53 = vmin.f32 %v807_v48, 1.0  ;;  %v1912_v48 = vmin.f32 %v808_v17, 1.0  ;;  %v1921_v17 = vmin.f32 %v810_v32, 1.0 }
  0xda   : > { %v1841_v2 = vpop.xlane.xlu1 %778  ;;  %v1843_v3 = vpop.xlane.xlu0 %775  ;;  %1587 = vrcp.f32 %v880_v35  ;;  %v1903_v35 = vmul.f32 %v928_v8, %v1833_v57  ;;  %v933_v8 = vmul.f32 108.0, %v1562_v36  ;;  %v935_v57 = vmul.f32 108.0, %v1566_v62 }
  0xdb   : > { %v883_v44 = vadd.f32 1e-08, %v1841_v2  ;;  %v882_v49 = vadd.f32 1e-08, %v1843_v3  ;;  %2353 = vst [vmem:[#allocation9_spill] sm:$0xff] %v1898_v53  ;;  %v937_v36 = vmul.f32 108.0, %v1570_v50 }
  0xdc   : > { %v816_v62 = vmax.f32 %v1819_v41, 0.0  ;;  %v938_v32 = vmul.f32 108.0, %v1576_v60  ;;  %v818_v26 = vmax.f32 %v1843_v3, 0.0 }
  0xdd   : > { %1589 = vrcp.f32 %v883_v44  ;;  %v1578_v44 = vpop.eup %1577 }
  0xde   : > { %v1857_v27 = vpop.xlane.xlu1 %784  ;;  %v1859_v28 = vpop.xlane.xlu0 %781  ;;  %1591 = vrcp.f32 %v882_v49  ;;  %v1908_v49 = vmul.f32 %v931_v16, %v1854_v23  ;;  %v812_v16 = vmax.f32 %v1785_v10, 0.0  ;;  %v1931_v10 = vmul.f32 %v932_v54, %v1873_v39 }
  0xdf   : > { %v885_v5 = vadd.f32 1e-08, %v1857_v27  ;;  %v884_v55 = vadd.f32 1e-08, %v1859_v28  ;;  %v1580_v4 = vpop.eup %1579  ;;  %v819_v54 = vmax.f32 %v1841_v2, 0.0  ;;  %v821_v2 = vmax.f32 %v1857_v27, 0.0 }
  0xe0   : > { %2355 = vst [vmem:[#allocation11_spill] sm:$0xff] %v1908_v49  ;;  %v1582_v63 = vpop.eup %1581  ;;  %2357 = vst [vmem:[#allocation13_spill] sm:$0xff] %v1931_v10  ;;  %v820_v3 = vmax.f32 %v1859_v28, 0.0  ;;  %v941_v39 = vmul.f32 108.0, %v1578_v44 }
  0xe1   : > { %1593 = vrcp.f32 %v885_v5  ;;  %v1915_v5 = vmul.f32 %v930_v22, %v1864_v52  ;;  %v1584_v23 = vpop.eup %1583  ;;  %v814_v22 = vmax.f32 %v1804_v25, 0.0  ;;  %v1937_v25 = vmul.f32 %v934_v0, %v1900_v29 }
  0xe2   : > { %v1881_v58 = vpop.xlane.xlu1 %790  ;;  %v1885_v6 = vpop.xlane.xlu0 %787  ;;  %1595 = vrcp.f32 %v884_v55  ;;  %v813_v55 = vmax.f32 %v1783_v9, 0.0  ;;  %v1928_v9 = vmul.f32 %v933_v8, %v1871_v37  ;;  %v968_v0 = vmul.f32 %v936_v45, %v1912_v48 }
  0xe3   : > { %v887_v15 = vadd.f32 1e-08, %v1881_v58  ;;  %v886_v51 = vadd.f32 1e-08, %v1885_v6  ;;  %v1586_v52 = vpop.eup %1585  ;;  %2359 = vst [vmem:[#allocation15_spill] sm:$0xff] %v1937_v25  ;;  %v1945_v8 = vmin.f32 %v814_v22, 1.0  ;;  %v970_v22 = vmul.f32 %v938_v32, %v1921_v17 }
  0xe4   : > { %v1588_v7 = vpop.eup %1587  ;;  %2356 = vst [vmem:[#allocation12_spill] sm:$0xff] %v1928_v9  ;;  %v1939_v50 = vmin.f32 %v813_v55, 1.0  ;;  %v1955_v55 = vmin.f32 %v816_v62, 1.0  ;;  %v823_v29 = vmax.f32 %v1881_v58, 0.0  ;;  %v822_v45 = vmax.f32 %v1885_v6, 0.0 }
  0xe5   : > { %1597 = vrcp.f32 %v887_v15  ;;  %v815_v15 = vmax.f32 %v1802_v24, 0.0  ;;  %v1934_v24 = vmul.f32 %v935_v57, %v1898_v53  ;;  %v1950_v57 = vmul.f32 %v937_v36, %v1910_v1  ;;  %v1976_v58 = vld [vmem:[%s2330_s3] ss:$0 sm:$0xff] }
  0xe6   : > { %1599 = vrcp.f32 %v886_v51  ;;  %v817_v51 = vmax.f32 %v1817_v40, 0.0  ;;  %v1941_v40 = vmin.f32 %v812_v16, 1.0  ;;  %v940_v36 = vmul.f32 108.0, %v1580_v4 }
  0xe7   : > { %v1590_v59 = vpop.eup %1589  ;;  %2358 = vst [vmem:[#allocation14_spill] sm:$0xff] %v1934_v24  ;;  %v1943_v56 = vmin.f32 %v815_v15, 1.0  ;;  %v1958_v15 = vmul.f32 %v939_v34, %v1919_v12  ;;  %v943_v62 = vmul.f32 108.0, %v1582_v63  ;;  %v942_v9 = vmul.f32 108.0, %v1584_v23 }
  0xe8   : > { %v1592_v41 = vpop.eup %1591  ;;  %v1953_v37 = vmin.f32 %v817_v51, 1.0  ;;  %v1965_v24 = vmin.f32 %v819_v54, 1.0  ;;  %v1967_v34 = vmin.f32 %v818_v26, 1.0  ;;  %v945_v10 = vmul.f32 108.0, %v1586_v52 }
  0xe9   : > { %v944_v32 = vmul.f32 108.0, %v1588_v7  ;;  %v947_v25 = vmul.f32 108.0, %v1590_v59  ;;  %v946_v27 = vmul.f32 108.0, %v1592_v41  ;;  %v1969_v49 = vmin.f32 %v821_v2, 1.0 }
  0xea   : > { %v1971_v44 = vmin.f32 %v820_v3, 1.0  ;;  %v1978_v23 = vmin.f32 %v823_v29, 1.0  ;;  %v1980_v63 = vmin.f32 %v822_v45, 1.0  ;;  %v1983_v59 = vmul.f32 %v941_v39, %v1939_v50 }
  0xeb   : > { %v1594_v60 = vpop.eup %1593  ;;  %2360 = vst [vmem:[#allocation16_spill] sm:$0xff] %v1969_v49  ;;  %v1986_v7 = vmul.f32 %v940_v36, %v1941_v40  ;;  %v1989_v41 = vmul.f32 %v943_v62, %v1943_v56  ;;  %v1992_v54 = vmul.f32 %v942_v9, %v1945_v8  ;;  %v1995_v26 = vmul.f32 %v945_v10, %v1953_v37 }
  0xec   : > { %v1596_v16 = vpop.eup %1595  ;;  %v949_v28 = vmul.f32 108.0, %v1594_v60  ;;  %2361 = vst [vmem:[#allocation17_spill] sm:$0xff] %v1971_v44  ;;  %2362 = vst [vmem:[#allocation18_spill] sm:$0xff] %v1978_v23  ;;  %v2001_v29 = vmul.f32 %v947_v25, %v1965_v24  ;;  %v2004_v39 = vmul.f32 %v946_v27, %v1967_v34 }
  0xed   : > { %v948_v4 = vmul.f32 108.0, %v1596_v16  ;;  %2363 = vst [vmem:[#allocation19_spill] sm:$0xff] %v1980_v63 }
  0xee   : > { %v2007_v2 = vmul.f32 %v949_v28, %v1969_v49 }
  0xef   : > { %v1598_v53 = vpop.eup %1597  ;;  %v2010_v9 = vmul.f32 %v948_v4, %v1971_v44 }
  0xf0   : > { %v1600_v51 = vpop.eup %1599  ;;  %v951_v6 = vmul.f32 108.0, %v1598_v53  ;;  %v1998_v53 = vmul.f32 %v944_v32, %v1955_v55  ;;  %2364 = vst [vmem:[#allocation20_spill] sm:$0xff] %v2007_v2 }
  0xf1   : > { %v950_v52 = vmul.f32 108.0, %v1600_v51 }
  0xf2   : > { %v2015_v25 = vmul.f32 %v951_v6, %v1978_v23 }
  0xf3   : > { %v2018_v51 = vmul.f32 %v950_v52, %v1980_v63 }
 0x101   : > { %v1459_v60 = vpop.f32.mrb[0].mxu0  ;;  %v1475_v16 = vpop.f32.mrb[0].mxu1 }
 0x102   : > { %v993_v10 = vsub.f32 %v1459_v60, %v1976_v58  ;;  %v1009_v3 = vsub.f32 %v1475_v16, %v1976_v58  ;;  %v568_v36 = vpop.f32.mrb[1].mxu0  ;;  %v632_v45 = vpop.f32.mrb[1].mxu1 }
 0x103   : > { %v991_v62 = vsub.f32 %v568_v36, %v1976_v58  ;;  %v1007_v32 = vsub.f32 %v632_v45, %v1976_v58  ;;  %v1460_v27 = vpop.f32.mrb[2].mxu0  ;;  %v1476_v28 = vpop.f32.mrb[2].mxu1 }
 0x104   : > { %v1025_v4 = vmul.f32 %v993_v10, %v1822_v42  ;;  %v1041_v60 = vmul.f32 %v1009_v3, %v970_v22  ;;  %v994_v16 = vsub.f32 %v1460_v27, %v1976_v58  ;;  %v1010_v49 = vsub.f32 %v1476_v28, %v1976_v58  ;;  %v571_v44 = vpop.f32.mrb[3].mxu0  ;;  %v635_v6 = vpop.f32.mrb[3].mxu1  ;;  %v2035_v10 = vld [vmem:[%s2331_s4] ss:$0 sm:$0xff] }
 0x105   : > { %v1023_v23 = vmul.f32 %v991_v62, %v1828_v46  ;;  %v1039_v52 = vmul.f32 %v1007_v32, %v968_v0  ;;  %v992_v63 = vsub.f32 %v571_v44, %v1976_v58  ;;  %v1008_v36 = vsub.f32 %v635_v6, %v1976_v58  ;;  %v2049_v32 = vld [vmem:[%s2332_s5] ss:$0 sm:$0xff] }
 0x106   : > { %v1057_v45 = vadd.f32 %v1976_v58, %v1025_v4  ;;  %v1073_v2 = vadd.f32 %v1976_v58, %v1041_v60  ;;  %v1026_v42 = vmul.f32 %v994_v16, %v1837_v61  ;;  %v1042_v22 = vmul.f32 %v1010_v49, %v1958_v15 }
 0x107   : > { %v1055_v46 = vadd.f32 %v1976_v58, %v1023_v23  ;;  %v1071_v0 = vadd.f32 %v1976_v58, %v1039_v52  ;;  %v1024_v44 = vmul.f32 %v992_v63, %v1848_v11  ;;  %v1040_v3 = vmul.f32 %v1008_v36, %v1950_v57 }
 0x108   : > { %v1089_v62 = vmul.f32 %v1057_v45, %v1788_v13  ;;  %v1105_v61 = vmul.f32 %v1073_v2, %v1921_v17  ;;  %v1058_v49 = vadd.f32 %v1976_v58, %v1026_v42  ;;  %v1074_v15 = vadd.f32 %v1976_v58, %v1042_v22 }
 0x109   : > { %v1087_v23 = vmul.f32 %v1055_v46, %v1790_v14  ;;  %v1103_v11 = vmul.f32 %v1071_v0, %v1912_v48  ;;  %v1056_v57 = vadd.f32 %v1976_v58, %v1024_v44  ;;  %v1072_v63 = vadd.f32 %v1976_v58, %v1040_v3  ;;  %v1463_v13 = vpop.f32.mrb[4].mxu0  ;;  %v1479_v27 = vpop.f32.mrb[4].mxu1 }
 0x10a   : > { %v1128_v17 = vmul.f32 %v2035_v10, %v1089_v62  ;;  %v1144_v2 = vmul.f32 %v2035_v10, %v1105_v61  ;;  %v1090_v28 = vmul.f32 %v1058_v49, %v1793_v18  ;;  %v1106_v4 = vmul.f32 %v1074_v15, %v1919_v12  ;;  %v584_v60 = vpop.f32.mrb[5].mxu0  ;;  %v648_v16 = vpop.f32.mrb[5].mxu1 }
 0x10b   : > { %v1126_v14 = vmul.f32 %v2035_v10, %v1087_v23  ;;  %v1142_v48 = vmul.f32 %v2035_v10, %v1103_v11  ;;  %v1088_v6 = vmul.f32 %v1056_v57, %v1795_v19  ;;  %v1104_v52 = vmul.f32 %v1072_v63, %v1910_v1  ;;  %v1464_v18 = vpop.f32.mrb[6].mxu0  ;;  %v1480_v36 = vpop.f32.mrb[6].mxu1 }
 0x10c   : > { %v1167_v12 = vadd.f32 %v2049_v32, %v1128_v17  ;;  %v1183_v45 = vadd.f32 %v2049_v32, %v1144_v2  ;;  %v1129_v42 = vmul.f32 %v2035_v10, %v1090_v28  ;;  %v1145_v22 = vmul.f32 %v2035_v10, %v1106_v4  ;;  %v587_v46 = vpop.f32.mrb[7].mxu0  ;;  %v651_v0 = vpop.f32.mrb[7].mxu1 }
 0x10d   : > { %v1165_v44 = vadd.f32 %v2049_v32, %v1126_v14  ;;  %v1181_v19 = vadd.f32 %v2049_v32, %v1142_v48  ;;  %v1127_v1 = vmul.f32 %v2035_v10, %v1088_v6  ;;  %v1143_v3 = vmul.f32 %v2035_v10, %v1104_v52 }
 0x10e   : > { %1200 = vst.msk [vmem:[%s2062_s9 + $0x10] sm:$0xff] %vm1197_vm1, %v1167_v12  ;;  %1216 = vst.msk [vmem:[%s2062_s9 + $0x90] sm:$0xff] %vm1197_vm1, %v1183_v45  ;;  %v1168_v62 = vadd.f32 %v2049_v32, %v1129_v42  ;;  %v1184_v61 = vadd.f32 %v2049_v32, %v1145_v22  ;;  %v997_v49 = vsub.f32 %v1463_v13, %v1976_v58 }
 0x10f   : > { %v1013_v15 = vsub.f32 %v1479_v27, %v1976_v58  ;;  %1198 = vst.msk [vmem:[%s2062_s9] sm:$0xff] %vm1197_vm1, %v1165_v44  ;;  %1214 = vst.msk [vmem:[%s2062_s9 + $0x80] sm:$0xff] %vm1197_vm1, %v1181_v19  ;;  %v1166_v23 = vadd.f32 %v2049_v32, %v1127_v1  ;;  %v1182_v11 = vadd.f32 %v2049_v32, %v1143_v3 }
 0x110   : > { %v995_v57 = vsub.f32 %v584_v60, %v1976_v58  ;;  %v1011_v63 = vsub.f32 %v648_v16, %v1976_v58  ;;  %1201 = vst.msk [vmem:[%s2062_s9 + $0x18] sm:$0xff] %vm1197_vm1, %v1168_v62  ;;  %1217 = vst.msk [vmem:[%s2062_s9 + $0x98] sm:$0xff] %vm1197_vm1, %v1184_v61  ;;  %v1029_v13 = vmul.f32 %v997_v49, %v1892_v20 }
 0x111   : > { %v1045_v27 = vmul.f32 %v1013_v15, %v1992_v54  ;;  %v998_v17 = vsub.f32 %v1464_v18, %v1976_v58  ;;  %v1014_v2 = vsub.f32 %v1480_v36, %v1976_v58  ;;  %1199 = vst.msk [vmem:[%s2062_s9 + $0x8] sm:$0xff] %vm1197_vm1, %v1166_v23  ;;  %1215 = vst.msk [vmem:[%s2062_s9 + $0x88] sm:$0xff] %vm1197_vm1, %v1182_v11  ;;  %v1467_v14 = vpop.f32.mrb[8].mxu0  ;;  %v1483_v20 = vpop.f32.mrb[8].mxu1 }
 0x112   : > { %v1027_v28 = vmul.f32 %v995_v57, %v1868_v33  ;;  %v1043_v4 = vmul.f32 %v1011_v63, %v1986_v7  ;;  %v996_v60 = vsub.f32 %v587_v46, %v1976_v58  ;;  %v1012_v16 = vsub.f32 %v651_v0, %v1976_v58  ;;  %v2112_v18 = vpop.f32.mrb[9].mxu0  ;;  %v2114_v36 = vpop.f32.mrb[9].mxu1 }
 0x113   : > { %v1061_v54 = vadd.f32 %v1976_v58, %v1029_v13  ;;  %v1077_v48 = vadd.f32 %v1976_v58, %v1045_v27  ;;  %v1030_v6 = vmul.f32 %v998_v17, %v1877_v47  ;;  %v1046_v52 = vmul.f32 %v1014_v2, %v1989_v41  ;;  %v2120_v42 = vpop.f32.mrb[10].mxu0  ;;  %v2122_v22 = vpop.f32.mrb[10].mxu1 }
 0x114   : > { %v1059_v33 = vadd.f32 %v1976_v58, %v1027_v28  ;;  %v1075_v7 = vadd.f32 %v1976_v58, %v1043_v4  ;;  %v1028_v12 = vmul.f32 %v996_v60, %v1862_v30  ;;  %v1044_v45 = vmul.f32 %v1012_v16, %v1983_v59  ;;  %v603_v44 = vpop.f32.mrb[11].mxu0  ;;  %v667_v19 = vpop.f32.mrb[11].mxu1 }
 0x115   : > { %v1093_v47 = vmul.f32 %v1061_v54, %v1824_v43  ;;  %v1109_v41 = vmul.f32 %v1077_v48, %v1945_v8  ;;  %v1062_v46 = vadd.f32 %v1976_v58, %v1030_v6  ;;  %v1078_v0 = vadd.f32 %v1976_v58, %v1046_v52 }
 0x116   : > { %v1091_v1 = vmul.f32 %v1059_v33, %v1808_v31  ;;  %v1107_v30 = vmul.f32 %v1075_v7, %v1941_v40  ;;  %v1060_v59 = vadd.f32 %v1976_v58, %v1028_v12  ;;  %v1076_v3 = vadd.f32 %v1976_v58, %v1044_v45 }
 0x117   : > { %v1132_v62 = vmul.f32 %v2035_v10, %v1093_v47  ;;  %v1148_v43 = vmul.f32 %v2035_v10, %v1109_v41  ;;  %v1094_v8 = vmul.f32 %v1062_v46, %v1814_v38  ;;  %v1110_v61 = vmul.f32 %v1078_v0, %v1943_v56  ;;  %v2365_v46 = vld [vmem:[#allocation11_spill] sm:$0xff] }
 0x118   : > { %v1130_v49 = vmul.f32 %v2035_v10, %v1091_v1  ;;  %v1146_v31 = vmul.f32 %v2035_v10, %v1107_v30  ;;  %v1092_v40 = vmul.f32 %v1060_v59, %v1798_v21  ;;  %v1108_v15 = vmul.f32 %v1076_v3, %v1939_v50  ;;  %v2366_v3 = vld [vmem:[#allocation8_spill] sm:$0xff] }
 0x119   : > { %v1171_v23 = vadd.f32 %v2049_v32, %v1132_v62  ;;  %v1187_v11 = vadd.f32 %v2049_v32, %v1148_v43  ;;  %v1133_v57 = vmul.f32 %v2035_v10, %v1094_v8  ;;  %v1149_v38 = vmul.f32 %v2035_v10, %v1110_v61  ;;  %v2148_v27 = vpop.f32.mrb[12].mxu0  ;;  %v2150_v50 = vpop.f32.mrb[12].mxu1  ;;  %v2367_v62 = vld [vmem:[#allocation5_spill] sm:$0xff]  ;;  %v2368_v61 = vld [vmem:[#allocation3_spill] sm:$0xff] }
 0x11a   : > { %v1169_v56 = vadd.f32 %v2049_v32, %v1130_v49  ;;  %v1185_v63 = vadd.f32 %v2049_v32, %v1146_v31  ;;  %v1131_v13 = vmul.f32 %v2035_v10, %v1092_v40  ;;  %v1147_v21 = vmul.f32 %v2035_v10, %v1108_v15  ;;  %v2160_v60 = vpop.f32.mrb[13].mxu0  ;;  %v2162_v16 = vpop.f32.mrb[13].mxu1 }
 0x11b   : > { %1204 = vst.msk [vmem:[%s2062_s9 + $0x30] sm:$0xff] %vm1197_vm1, %v1171_v23  ;;  %1220 = vst.msk [vmem:[%s2062_s9 + $0xb0] sm:$0xff] %vm1197_vm1, %v1187_v11  ;;  %v1172_v17 = vadd.f32 %v2049_v32, %v1133_v57  ;;  %v1188_v2 = vadd.f32 %v2049_v32, %v1149_v38  ;;  %v1001_v28 = vsub.f32 %v1467_v14, %v1976_v58  ;;  %v2176_v52 = vpop.f32.mrb[14].mxu1  ;;  %v2369_v23 = vld [vmem:[#allocation4_spill] sm:$0xff] }
 0x11c   : > { %v1017_v4 = vsub.f32 %v1483_v20, %v1976_v58  ;;  %1202 = vst.msk [vmem:[%s2062_s9 + $0x20] sm:$0xff] %vm1197_vm1, %v1169_v56  ;;  %1218 = vst.msk [vmem:[%s2062_s9 + $0xa0] sm:$0xff] %vm1197_vm1, %v1185_v63  ;;  %v1170_v54 = vadd.f32 %v2049_v32, %v1131_v13  ;;  %v1186_v48 = vadd.f32 %v2049_v32, %v1147_v21  ;;  %v2174_v20 = vpop.f32.mrb[14].mxu0  ;;  %v2370_v56 = vld [vmem:[#allocation2_spill] sm:$0xff] }
 0x11d   : > { %v999_v6 = vsub.f32 %v2112_v18, %v1976_v58  ;;  %v1015_v14 = vsub.f32 %v2114_v36, %v1976_v58  ;;  %1205 = vst.msk [vmem:[%s2062_s9 + $0x38] sm:$0xff] %vm1197_vm1, %v1172_v17  ;;  %1221 = vst.msk [vmem:[%s2062_s9 + $0xb8] sm:$0xff] %vm1197_vm1, %v1188_v2  ;;  %v1033_v33 = vmul.f32 %v1001_v28, %v1915_v5  ;;  %v2188_v45 = vpop.f32.mrb[15].mxu0  ;;  %v2190_v36 = vpop.f32.mrb[15].mxu1 }
 0x11e   : > { %v1049_v7 = vmul.f32 %v1017_v4, %v2004_v39  ;;  %v1002_v12 = vsub.f32 %v2120_v42, %v1976_v58  ;;  %v1018_v18 = vsub.f32 %v2122_v22, %v1976_v58  ;;  %1203 = vst.msk [vmem:[%s2062_s9 + $0x28] sm:$0xff] %vm1197_vm1, %v1170_v54  ;;  %1219 = vst.msk [vmem:[%s2062_s9 + $0xa8] sm:$0xff] %vm1197_vm1, %v1186_v48 }
 0x11f   : > { %v1031_v47 = vmul.f32 %v999_v6, %v1903_v35  ;;  %v1047_v5 = vmul.f32 %v1015_v14, %v1998_v53  ;;  %v1000_v39 = vsub.f32 %v603_v44, %v1976_v58  ;;  %v1016_v41 = vsub.f32 %v667_v19, %v1976_v58 }
 0x120   : > { %v1065_v42 = vadd.f32 %v1976_v58, %v1033_v33  ;;  %v1081_v22 = vadd.f32 %v1976_v58, %v1049_v7  ;;  %v1034_v0 = vmul.f32 %v1002_v12, %v2365_v46  ;;  %v1050_v1 = vmul.f32 %v1018_v18, %v2001_v29  ;;  %v2373_v46 = vld [vmem:[#allocation14_spill] sm:$0xff] }
 0x121   : > { %v1063_v30 = vadd.f32 %v1976_v58, %v1031_v47  ;;  %v1079_v59 = vadd.f32 %v1976_v58, %v1047_v5  ;;  %v1032_v35 = vmul.f32 %v1000_v39, %v2366_v3  ;;  %v1048_v53 = vmul.f32 %v1016_v41, %v1995_v26  ;;  %v2375_v3 = vld [vmem:[#allocation20_spill] sm:$0xff] }
 0x122   : > { %v1097_v44 = vmul.f32 %v1065_v42, %v2367_v62  ;;  %v1113_v19 = vmul.f32 %v1081_v22, %v1967_v34  ;;  %v1066_v43 = vadd.f32 %v1976_v58, %v1034_v0  ;;  %v1082_v8 = vadd.f32 %v1976_v58, %v1050_v1  ;;  %v2377_v62 = vld [vmem:[#allocation19_spill] sm:$0xff] }
 0x123   : > { %v1095_v49 = vmul.f32 %v1063_v30, %v2368_v61  ;;  %v1111_v29 = vmul.f32 %v1079_v59, %v1955_v55  ;;  %v1064_v31 = vadd.f32 %v1976_v58, %v1032_v35  ;;  %v1080_v40 = vadd.f32 %v1976_v58, %v1048_v53  ;;  %v2374_v59 = vld [vmem:[#allocation12_spill] sm:$0xff]  ;;  %v2379_v61 = vld [vmem:[#allocation17_spill] sm:$0xff] }
 0x124   : > { %v1136_v15 = vmul.f32 %v2035_v10, %v1097_v44  ;;  %v1152_v26 = vmul.f32 %v2035_v10, %v1113_v19  ;;  %v1098_v34 = vmul.f32 %v1066_v43, %v2369_v23  ;;  %v1114_v11 = vmul.f32 %v1082_v8, %v1965_v24  ;;  %v2378_v43 = vld [vmem:[#allocation7_spill] sm:$0xff]  ;;  %v2381_v23 = vld [vmem:[#allocation18_spill] sm:$0xff] }
 0x125   : > { %v1134_v57 = vmul.f32 %v2035_v10, %v1095_v49  ;;  %v1150_v38 = vmul.f32 %v2035_v10, %v1111_v29  ;;  %v1096_v55 = vmul.f32 %v1064_v31, %v2370_v56  ;;  %v1112_v63 = vmul.f32 %v1080_v40, %v1953_v37 }
 0x126   : > { %v1175_v13 = vadd.f32 %v2049_v32, %v1136_v15  ;;  %v1191_v21 = vadd.f32 %v2049_v32, %v1152_v26  ;;  %v1137_v17 = vmul.f32 %v2035_v10, %v1098_v34  ;;  %v1153_v2 = vmul.f32 %v2035_v10, %v1114_v11  ;;  %v2380_v15 = vld [vmem:[#allocation9_spill] sm:$0xff] }
 0x127   : > { %v1173_v24 = vadd.f32 %v2049_v32, %v1134_v57  ;;  %v1189_v28 = vadd.f32 %v2049_v32, %v1150_v38  ;;  %v1135_v4 = vmul.f32 %v2035_v10, %v1096_v55  ;;  %v1151_v54 = vmul.f32 %v2035_v10, %v1112_v63  ;;  %v2382_v38 = vld [vmem:[#allocation6_spill] sm:$0xff]  ;;  %v2383_v55 = vld [vmem:[#allocation16_spill] sm:$0xff] }
 0x128   : > { %1208 = vst.msk [vmem:[%s2062_s9 + $0x50] sm:$0xff] %vm1197_vm1, %v1175_v13  ;;  %1224 = vst.msk [vmem:[%s2062_s9 + $0xd0] sm:$0xff] %vm1197_vm1, %v1191_v21  ;;  %v1176_v37 = vadd.f32 %v2049_v32, %v1137_v17  ;;  %v1192_v48 = vadd.f32 %v2049_v32, %v1153_v2  ;;  %v1005_v6 = vsub.f32 %v2148_v27, %v1976_v58  ;;  %v2371_v27 = vld [vmem:[#allocation15_spill] sm:$0xff] }
 0x129   : > { %v1021_v14 = vsub.f32 %v2150_v50, %v1976_v58  ;;  %1206 = vst.msk [vmem:[%s2062_s9 + $0x40] sm:$0xff] %vm1197_vm1, %v1173_v24  ;;  %1222 = vst.msk [vmem:[%s2062_s9 + $0xc0] sm:$0xff] %vm1197_vm1, %v1189_v28  ;;  %v1174_v33 = vadd.f32 %v2049_v32, %v1135_v4  ;;  %v1190_v7 = vadd.f32 %v2049_v32, %v1151_v54 }
 0x12a   : > { %v1003_v12 = vsub.f32 %v2160_v60, %v1976_v58  ;;  %v1019_v18 = vsub.f32 %v2162_v16, %v1976_v58  ;;  %1209 = vst.msk [vmem:[%s2062_s9 + $0x58] sm:$0xff] %vm1197_vm1, %v1176_v37  ;;  %1225 = vst.msk [vmem:[%s2062_s9 + $0xd8] sm:$0xff] %vm1197_vm1, %v1192_v48  ;;  %v1037_v50 = vmul.f32 %v1005_v6, %v2371_v27  ;;  %v2372_v60 = vld [vmem:[#allocation13_spill] sm:$0xff] }
 0x12b   : > { %v1053_v47 = vmul.f32 %v1021_v14, %v2018_v51  ;;  %v1006_v5 = vsub.f32 %v2174_v20, %v1976_v58  ;;  %v1022_v39 = vsub.f32 %v2176_v52, %v1976_v58  ;;  %1207 = vst.msk [vmem:[%s2062_s9 + $0x48] sm:$0xff] %vm1197_vm1, %v1174_v33  ;;  %1223 = vst.msk [vmem:[%s2062_s9 + $0xc8] sm:$0xff] %vm1197_vm1, %v1190_v7 }
 0x12c   : > { %v1035_v16 = vmul.f32 %v1003_v12, %v2372_v60  ;;  %v1051_v41 = vmul.f32 %v1019_v18, %v2010_v9  ;;  %v1004_v42 = vsub.f32 %v2188_v45, %v1976_v58  ;;  %v1020_v51 = vsub.f32 %v2190_v36, %v1976_v58  ;;  %v2376_v45 = vld [vmem:[#allocation10_spill] sm:$0xff] }
 0x12d   : > { %v1069_v22 = vadd.f32 %v1976_v58, %v1037_v50  ;;  %v1085_v20 = vadd.f32 %v1976_v58, %v1053_v47  ;;  %v1038_v52 = vmul.f32 %v1006_v5, %v2373_v46  ;;  %v1054_v0 = vmul.f32 %v1022_v39, %v2015_v25 }
 0x12e   : > { %v1067_v1 = vadd.f32 %v1976_v58, %v1035_v16  ;;  %v1083_v30 = vadd.f32 %v1976_v58, %v1051_v41  ;;  %v1036_v9 = vmul.f32 %v1004_v42, %v2374_v59  ;;  %v1052_v35 = vmul.f32 %v1020_v51, %v2375_v3 }
 0x12f   : > { %v1101_v53 = vmul.f32 %v1069_v22, %v2376_v45  ;;  %v1117_v36 = vmul.f32 %v1085_v20, %v2377_v62  ;;  %v1070_v44 = vadd.f32 %v1976_v58, %v1038_v52  ;;  %v1086_v19 = vadd.f32 %v1976_v58, %v1054_v0 }
 0x130   : > { %v1099_v8 = vmul.f32 %v1067_v1, %v2378_v43  ;;  %v1115_v25 = vmul.f32 %v1083_v30, %v2379_v61  ;;  %v1068_v49 = vadd.f32 %v1976_v58, %v1036_v9  ;;  %v1084_v29 = vadd.f32 %v1976_v58, %v1052_v35 }
 0x131   : > { %v1140_v31 = vmul.f32 %v2035_v10, %v1101_v53  ;;  %v1156_v40 = vmul.f32 %v2035_v10, %v1117_v36  ;;  %v1102_v26 = vmul.f32 %v1070_v44, %v2380_v15  ;;  %v1118_v34 = vmul.f32 %v1086_v19, %v2381_v23 }
 0x132   : > { %v1138_v11 = vmul.f32 %v2035_v10, %v1099_v8  ;;  %v1154_v57 = vmul.f32 %v2035_v10, %v1115_v25  ;;  %v1100_v56 = vmul.f32 %v1068_v49, %v2382_v38  ;;  %v1116_v58 = vmul.f32 %v1084_v29, %v2383_v55 }
 0x133   : > { %v1179_v63 = vadd.f32 %v2049_v32, %v1140_v31  ;;  %v1195_v13 = vadd.f32 %v2049_v32, %v1156_v40  ;;  %v1141_v21 = vmul.f32 %v2035_v10, %v1102_v26  ;;  %v1157_v17 = vmul.f32 %v2035_v10, %v1118_v34 }
 0x134   : > { %v1177_v2 = vadd.f32 %v2049_v32, %v1138_v11  ;;  %v1193_v24 = vadd.f32 %v2049_v32, %v1154_v57  ;;  %v1139_v28 = vmul.f32 %v2035_v10, %v1100_v56  ;;  %v1155_v4 = vmul.f32 %v2035_v10, %v1116_v58 }
 0x135   : > { %1212 = vst.msk [vmem:[%s2062_s9 + $0x70] sm:$0xff] %vm1197_vm1, %v1179_v63  ;;  %1228 = vst.msk [vmem:[%s2062_s9 + $0xf0] sm:$0xff] %vm1197_vm1, %v1195_v13  ;;  %v1180_v54 = vadd.f32 %v2049_v32, %v1141_v21  ;;  %v1196_v37 = vadd.f32 %v2049_v32, %v1157_v17 }
 0x136   : > { %1210 = vst.msk [vmem:[%s2062_s9 + $0x60] sm:$0xff] %vm1197_vm1, %v1177_v2  ;;  %1226 = vst.msk [vmem:[%s2062_s9 + $0xe0] sm:$0xff] %vm1197_vm1, %v1193_v24  ;;  %v1178_v48 = vadd.f32 %v2049_v32, %v1139_v28  ;;  %v1194_v6 = vadd.f32 %v2049_v32, %v1155_v4 }
 0x137   : > { %1213 = vst.msk [vmem:[%s2062_s9 + $0x78] sm:$0xff] %vm1197_vm1, %v1180_v54  ;;  %1229 = vst.msk [vmem:[%s2062_s9 + $0xf8] sm:$0xff] %vm1197_vm1, %v1196_v37 }
 0x138   : > { %1211 = vst.msk [vmem:[%s2062_s9 + $0x68] sm:$0xff] %vm1197_vm1, %v1178_v48  ;;  %1227 = vst.msk [vmem:[%s2062_s9 + $0xe8] sm:$0xff] %vm1197_vm1, %v1194_v6 }
 0x139 PF: > { %s16_s21 = sadd.s32 1, %s1607_s21  }
 0x13a   : > { %p13_p4 = scmp.ge.s32.totalorder %s16_s21, 4  }
 0x13c   :  { %15 = sbr.rel (!%p13_p4) target bundleno = 1 (0x1), region = 77 }

</bundles_post_ra>
